<compile_context>
chip_gen: v7x
topology: tpu7x:2x2x1
jax: 0.10.0
libtpu: 0.0.40
codegen_flags: <defaults>
</compile_context>

<pallas_src>
import functools

import jax
import jax.numpy as jnp
from jax.experimental import pallas as pl
from jax.experimental.pallas import tpu as pltpu

LANE = 128


def _round_up(x, m):
    return (x + m - 1) // m * m


# ----------------------------- Pallas kernel -------------------------------


def _basic_block_kernel(*refs, M1, Wq, Cin_p, Cout_p, stride, halo, has_proj):
    if has_proj:
        (x_ref, mask_ref, w1_ref, b1_ref, w2_ref, b2_ref, ws_ref, bs_ref,
         o_ref, im1_ref, o1_ref, im2_ref) = refs
    else:
        (x_ref, mask_ref, w1_ref, b1_ref, w2_ref, b2_ref,
         o_ref, im1_ref, o1_ref, im2_ref) = refs
        ws_ref = bs_ref = None

    s = stride

    # ---- conv1 im2col: 9 contiguous bf16 row-shifted flat slices straight
    #      from the resident input -- no f32 staging pass, no casts, and all
    #      scratch stores are full-row / 128-lane-aligned.
    for kh in range(3):
        for kw in range(3):
            t = kh * 3 + kw
            p = (kh % s) * s + (kw % s)
            off = (kh // s) * Wq + (kw // s)
            im1_ref[:, t * Cin_p:(t + 1) * Cin_p] = x_ref[p, off:off + M1, :]

    # conv1 + folded BN1 as one big-K bf16 matmul (f32 accumulation).
    # Epilogue: +bias, ReLU, then zero the Wq-Wo junk columns with a single
    # narrow (M1,1) mask (lane broadcast is free) so that those columns act
    # as conv2's zero W-padding.
    out1 = jnp.dot(im1_ref[...], w1_ref[...],
                   preferred_element_type=jnp.float32)
    out1 = jnp.maximum(out1 + b1_ref[...], 0.0) * mask_ref[...]

    # ---- stage out1 once, in bf16, into a flat scratch with zero halo rows.
    zeros_halo = jnp.zeros((halo, Cout_p), jnp.bfloat16)
    o1_ref[0:halo, :] = zeros_halo
    o1_ref[halo + M1:2 * halo + M1, :] = zeros_halo
    o1_ref[halo:halo + M1, :] = out1.astype(jnp.bfloat16)

    # ---- conv2: 3x3 / stride 1 / pad 1 == 9 plain contiguous bf16 slices of
    #      the flat scratch (halo rows + zeroed junk columns supply all the
    #      padding, so NO edge masks are needed) -> one big-K matmul.
    for dh in (-1, 0, 1):
        for dw in (-1, 0, 1):
            t = (dh + 1) * 3 + (dw + 1)
            start = halo + dh * Wq + dw
            im2_ref[:, t * Cout_p:(t + 1) * Cout_p] = o1_ref[start:start + M1, :]

    out2 = jnp.dot(im2_ref[...], w2_ref[...],
                   preferred_element_type=jnp.float32)
    out2 = out2 + b2_ref[...]

    # ---- shortcut: reuse the bf16 input already resident in VMEM (no extra
    #      HBM read of x); cast to f32 only at its single point of use.
    p_sc = (1 % s) * s + (1 % s)
    off_sc = (1 // s) * Wq + (1 // s)
    xsc = x_ref[p_sc, off_sc:off_sc + M1, :]
    if has_proj:
        sc = jnp.dot(xsc, ws_ref[...], preferred_element_type=jnp.float32)
        sc = sc + bs_ref[...]
    else:
        sc = xsc.astype(jnp.float32)   # identity: Cin_p == Cout_p

    # Lane-dense bf16 output block (halves HBM writeback).
    o_ref[...] = jnp.maximum(out2 + sc, 0.0).astype(jnp.bfloat16)


# ------------------------------- wrapper ------------------------------------


def _fold_bn_into_conv(w, bn, cin, cin_p, cout, cout_p, eps=1e-5):
    """Fold BN scale into the conv weight, return (padded matmul weight, bias)."""
    gamma, beta, mean, var = bn
    scale = gamma / jnp.sqrt(var + eps)            # (cout,)
    bias = beta - mean * scale                     # (cout,)
    kh, kw = w.shape[2], w.shape[3]
    wm = jnp.transpose(w, (2, 3, 1, 0)) * scale[None, None, None, :]
    wm = jnp.pad(wm, ((0, 0), (0, 0), (0, cin_p - cin), (0, cout_p - cout)))
    wm = wm.reshape(kh * kw * cin_p, cout_p).astype(jnp.bfloat16)
    b = jnp.pad(bias, (0, cout_p - cout)).reshape(1, cout_p).astype(jnp.float32)
    return wm, b


def basic_block_forward(x, params, stride):
    """x: (N, Cin, H, W) float32 NCHW.  Returns (N, Cout, Ho, Wo) float32."""
    N, Cin, H, W = x.shape
    Cout = params["w1"].shape[0]
    has_proj = (stride != 1) or (Cin != Cout)
    s = int(stride)

    Ho = (H - 1) // s + 1          # 3x3 conv, pad=1
    Wo = (W - 1) // s + 1
    Cin_p = _round_up(Cin, LANE)
    Cout_p = _round_up(Cout, LANE)
    Hq = -(-(H + 2) // s)
    Wq = -(-(W + 2) // s)
    M1 = Ho * Wq                   # matmul M: Wq-strided rows (Wq-Wo junk cols)
    Lflat = Hq * Wq + Wq           # +Wq: one trailing zero row per phase plane
    halo = _round_up(Wq + 1, 8)    # zero halo rows around out1 for conv2 taps

    # NHWC; zero-pad: spatial pad=1 (rounded so H/W+2 is a stride multiple)
    # and channels up to a lane-dense multiple of 128; activations in bf16.
    x_nhwc = jnp.transpose(x, (0, 2, 3, 1))
    x_pad = jnp.pad(x_nhwc, ((0, 0), (1, Hq * s - (H + 1)),
                             (1, Wq * s - (W + 1)), (0, Cin_p - Cin)))
    x_pad = x_pad.astype(jnp.bfloat16)
    # Space-to-depth phase split over the conv1 stride (pure re-layout, no
    # data duplication), then flatten each phase plane to (Hq*Wq, Cin_p):
    #   xp[n, a*s+b, i*Wq+j, c] = x_pad[n, i*s+a, j*s+b, c]
    xp = x_pad.reshape(N, Hq, s, Wq, s, Cin_p)
    xp = jnp.transpose(xp, (0, 2, 4, 1, 3, 5)).reshape(N, s * s, Hq * Wq, Cin_p)
    xp = jnp.pad(xp, ((0, 0), (0, 0), (0, Wq), (0, 0)))   # trailing zero row

    # Narrow (M1, 1) validity mask over flat rows: 1.0 where j = m % Wq < Wo.
    mask = (jnp.tile(jnp.arange(Wq, dtype=jnp.int32), Ho) <
            Wo).astype(jnp.float32).reshape(M1, 1)

    w1_m, b1 = _fold_bn_into_conv(params["w1"], params["bn1"],
                                  Cin, Cin_p, Cout, Cout_p)
    w2_m, b2 = _fold_bn_into_conv(params["w2"], params["bn2"],
                                  Cout, Cout_p, Cout, Cout_p)

    inputs = [xp, mask, w1_m, b1, w2_m, b2]
    in_specs = [
        pl.BlockSpec((None, s * s, Lflat, Cin_p), lambda n: (n, 0, 0, 0)),
        pl.BlockSpec((M1, 1), lambda n: (0, 0)),
        pl.BlockSpec((9 * Cin_p, Cout_p), lambda n: (0, 0)),
        pl.BlockSpec((1, Cout_p), lambda n: (0, 0)),
        pl.BlockSpec((9 * Cout_p, Cout_p), lambda n: (0, 0)),
        pl.BlockSpec((1, Cout_p), lambda n: (0, 0)),
    ]
    if has_proj:
        ws_m, bs = _fold_bn_into_conv(params["ws"], params["bns"],
                                      Cin, Cin_p, Cout, Cout_p)
        inputs += [ws_m, bs]
        in_specs += [pl.BlockSpec((Cin_p, Cout_p), lambda n: (0, 0)),
                     pl.BlockSpec((1, Cout_p), lambda n: (0, 0))]

    kernel = functools.partial(
        _basic_block_kernel, M1=M1, Wq=Wq, Cin_p=Cin_p, Cout_p=Cout_p,
        stride=s, halo=halo, has_proj=has_proj)

    scratch_shapes = [
        pltpu.VMEM((M1, 9 * Cin_p), jnp.bfloat16),          # conv1 im2col
        pltpu.VMEM((2 * halo + M1, Cout_p), jnp.bfloat16),  # out1 + halos
        pltpu.VMEM((M1, 9 * Cout_p), jnp.bfloat16),         # conv2 im2col
    ]

    # Cost estimate: activation read + weights + bf16 writeback.
    flops = 2 * N * M1 * Cout_p * (9 * Cin_p + 9 * Cout_p
                                   + (Cin_p if has_proj else 0))
    bytes_accessed = (sum(int(a.size) * a.dtype.itemsize for a in inputs)
                      + N * M1 * Cout_p * 2)

    # VMEM budget from the actual per-step working set (double-buffered
    # blocks + bf16 scratches + margin), clamped to this chip's capacity.
    xp_blk = s * s * Lflat * Cin_p * 2
    out_blk = M1 * Cout_p * 2
    const_bytes = sum(int(a.size) * a.dtype.itemsize for a in inputs[1:])
    scratch_bytes = 2 * (M1 * 9 * Cin_p + (2 * halo + M1) * Cout_p
                         + M1 * 9 * Cout_p)
    vmem_need = 2 * (xp_blk + out_blk + const_bytes) + scratch_bytes + (4 << 20)
    try:
        vmem_cap = int(pltpu.get_tpu_info().vmem_capacity_bytes)
    except Exception:
        vmem_cap = 64 << 20
    vmem_limit = int(min(max(vmem_need, 16 << 20), vmem_cap))

    out = pl.pallas_call(
        kernel,
        out_shape=jax.ShapeDtypeStruct((N, M1, Cout_p), jnp.bfloat16),
        grid_spec=pltpu.PrefetchScalarGridSpec(
            num_scalar_prefetch=0,
            grid=(N,),
            in_specs=in_specs,
            out_specs=pl.BlockSpec((None, M1, Cout_p), lambda n: (n, 0, 0)),
            scratch_shapes=scratch_shapes),
        compiler_params=pltpu.CompilerParams(
            dimension_semantics=("parallel",),
            vmem_limit_bytes=vmem_limit),
        cost_estimate=pl.CostEstimate(flops=flops, transcendentals=0,
                                      bytes_accessed=bytes_accessed),
    )(*inputs)

    # Strip junk columns / channel padding; back to NCHW f32 in the wrapper.
    out = out.reshape(N, Ho, Wq, Cout_p)[:, :, :Wo, :Cout]
    return jnp.transpose(out, (0, 3, 1, 2)).astype(jnp.float32)


# --------------------------- reference (pure JAX) ----------------------------


def ref_forward(x, params, stride):
    def conv(x, w, s, p):
        return jax.lax.conv_general_dilated(
            x, w, (s, s), [(p, p), (p, p)],
            dimension_numbers=("NCHW", "OIHW", "NCHW"))

    def bn(x, g, b, m, v, eps=1e-5):
        s = g / jnp.sqrt(v + eps)
        return x * s[None, :, None, None] + (b - m * s)[None, :, None, None]

    out = jax.nn.relu(bn(conv(x, params["w1"], stride, 1), *params["bn1"]))
    out = bn(conv(out, params["w2"], 1, 1), *params["bn2"])
    if "ws" in params:
        sc = bn(conv(x, params["ws"], stride, 0), *params["bns"])
    else:
        sc = x
    return jax.nn.relu(out + sc)


# ------------------------------ param init ----------------------------------


def init_params(key, cin, cout, stride):
    ks = jax.random.split(key, 8)

    def bn_params(k):
        k1, k2, k3, k4 = jax.random.split(k, 4)
        gamma = jax.random.uniform(k1, (cout,), jnp.float32, 0.5, 1.5)
        beta = 0.1 * jax.random.normal(k2, (cout,), jnp.float32)
        mean = 0.1 * jax.random.normal(k3, (cout,), jnp.float32)
        var = jax.random.uniform(k4, (cout,), jnp.float32, 0.5, 1.5)
        return (gamma, beta, mean, var)

    params = {
        "w1": 0.1 * jax.random.normal(ks[0], (cout, cin, 3, 3), jnp.float32),
        "bn1": bn_params(ks[1]),
        "w2": 0.1 * jax.random.normal(ks[2], (cout, cout, 3, 3), jnp.float32),
        "bn2": bn_params(ks[3]),
    }
    if stride != 1 or cin != cout:
        params["ws"] = 0.1 * jax.random.normal(ks[4], (cout, cin, 1, 1),
                                               jnp.float32)
        params["bns"] = bn_params(ks[5])
    return params


if __name__ == "__main__":
    key = jax.random.PRNGKey(0)
    k_x1, k_p1, k_x2, k_p2 = jax.random.split(key, 4)

    # Case 1: projection shortcut (stride=2, channel change).
    N, Cin, H, W = 2, 4, 16, 16
    Cout, stride = 8, 2
    x = jax.random.normal(k_x1, (N, Cin, H, W), jnp.float32)
    params = init_params(k_p1, Cin, Cout, stride)

    y = jax.block_until_ready(basic_block_forward(x, params, stride))
    y_ref = ref_forward(x, params, stride)
    assert y.shape == (N, Cout, H // stride, W // stride)
    # Tolerance sized for bf16 activations/weights (accumulation stays f32).
    assert jnp.allclose(y, y_ref, atol=5e-2, rtol=5e-2), \
        float(jnp.max(jnp.abs(y - y_ref)))

    # Case 2: identity shortcut (stride=1, same channels).
    Cin2 = Cout2 = 8
    x2 = jax.random.normal(k_x2, (N, Cin2, H, W), jnp.float32)
    params2 = init_params(k_p2, Cin2, Cout2, 1)
    y2 = jax.block_until_ready(basic_block_forward(x2, params2, 1))
    y2_ref = ref_forward(x2, params2, 1)
    assert y2.shape == (N, Cout2, H, W)
    assert jnp.allclose(y2, y2_ref, atol=5e-2, rtol=5e-2), \
        float(jnp.max(jnp.abs(y2 - y2_ref)))

    print("KERNEL_OK")
</pallas_src>

<mosaic_0001>
module attributes {stable_mosaic.version = 11 : i64} {
  func.func @_basic_block_kernel(%arg0: i32, %arg1: memref<1x4x90x128xbf16, #tpu.memory_space<vmem>>, %arg2: memref<72x1xf32, #tpu.memory_space<vmem>>, %arg3: memref<1152x128xbf16, #tpu.memory_space<vmem>>, %arg4: memref<1x128xf32, #tpu.memory_space<vmem>>, %arg5: memref<1152x128xbf16, #tpu.memory_space<vmem>>, %arg6: memref<1x128xf32, #tpu.memory_space<vmem>>, %arg7: memref<128x128xbf16, #tpu.memory_space<vmem>>, %arg8: memref<1x128xf32, #tpu.memory_space<vmem>>, %arg9: memref<1x72x128xbf16, #tpu.memory_space<vmem>>, %arg10: memref<72x1152xbf16, #tpu.memory_space<vmem>>, %arg11: memref<104x128xbf16, #tpu.memory_space<vmem>>, %arg12: memref<72x1152xbf16, #tpu.memory_space<vmem>>) attributes {dimension_semantics = [#tpu.dimension_semantics<parallel>], iteration_bounds = array<i64: 2>, scalar_prefetch = 0 : i64, scratch_operands = 3 : i64, tpu.core_type = #tpu.core_type<tc>, window_params = [{transform_indices = @transform_0, window_bounds = array<i64: 1, 4, 90, 128>}, {pipeline_mode = #tpu.pipeline_mode<synchronous>, transform_indices = @transform_1, window_bounds = array<i64: 72, 1>}, {pipeline_mode = #tpu.pipeline_mode<synchronous>, transform_indices = @transform_2, window_bounds = array<i64: 1152, 128>}, {pipeline_mode = #tpu.pipeline_mode<synchronous>, transform_indices = @transform_3, window_bounds = array<i64: 1, 128>}, {pipeline_mode = #tpu.pipeline_mode<synchronous>, transform_indices = @transform_4, window_bounds = array<i64: 1152, 128>}, {pipeline_mode = #tpu.pipeline_mode<synchronous>, transform_indices = @transform_5, window_bounds = array<i64: 1, 128>}, {pipeline_mode = #tpu.pipeline_mode<synchronous>, transform_indices = @transform_6, window_bounds = array<i64: 128, 128>}, {pipeline_mode = #tpu.pipeline_mode<synchronous>, transform_indices = @transform_7, window_bounds = array<i64: 1, 128>}, {transform_indices = @transform_8, window_bounds = array<i64: 1, 72, 128>}]} {
    %c0 = arith.constant 0 : index
    %c0_0 = arith.constant 0 : index
    %c0_1 = arith.constant 0 : index
    %c0_2 = arith.constant 0 : index
    %0 = vector.load %arg1[%c0, %c0_0, %c0_1, %c0_2] : memref<1x4x90x128xbf16, #tpu.memory_space<vmem>>, vector<1x1x72x128xbf16>
    %1 = vector.shape_cast %0 : vector<1x1x72x128xbf16> to vector<72x128xbf16>
    %c0_3 = arith.constant 0 : index
    %c0_4 = arith.constant 0 : index
    %2 = vector.load %arg10[%c0_3, %c0_4] : memref<72x1152xbf16, #tpu.memory_space<vmem>>, vector<72x128xbf16>
    tpu.vector_store %arg10[%c0_3, %c0_4], %1 {strides = array<i32>} : memref<72x1152xbf16, #tpu.memory_space<vmem>>, vector<72x128xbf16>,
    %c0_5 = arith.constant 0 : index
    %c1 = arith.constant 1 : index
    %c0_6 = arith.constant 0 : index
    %c0_7 = arith.constant 0 : index
    %3 = vector.load %arg1[%c0_5, %c1, %c0_6, %c0_7] : memref<1x4x90x128xbf16, #tpu.memory_space<vmem>>, vector<1x1x72x128xbf16>
    %4 = vector.shape_cast %3 : vector<1x1x72x128xbf16> to vector<72x128xbf16>
    %c0_8 = arith.constant 0 : index
    %c128 = arith.constant 128 : index
    %5 = vector.load %arg10[%c0_8, %c128] : memref<72x1152xbf16, #tpu.memory_space<vmem>>, vector<72x128xbf16>
    tpu.vector_store %arg10[%c0_8, %c128], %4 {strides = array<i32>} : memref<72x1152xbf16, #tpu.memory_space<vmem>>, vector<72x128xbf16>,
    %c0_9 = arith.constant 0 : index
    %c0_10 = arith.constant 0 : index
    %c1_11 = arith.constant 1 : index
    %c0_12 = arith.constant 0 : index
    %6 = vector.load %arg1[%c0_9, %c0_10, %c1_11, %c0_12] : memref<1x4x90x128xbf16, #tpu.memory_space<vmem>>, vector<1x1x72x128xbf16>
    %7 = vector.shape_cast %6 : vector<1x1x72x128xbf16> to vector<72x128xbf16>
    %c0_13 = arith.constant 0 : index
    %c256 = arith.constant 256 : index
    %8 = vector.load %arg10[%c0_13, %c256] : memref<72x1152xbf16, #tpu.memory_space<vmem>>, vector<72x128xbf16>
    tpu.vector_store %arg10[%c0_13, %c256], %7 {strides = array<i32>} : memref<72x1152xbf16, #tpu.memory_space<vmem>>, vector<72x128xbf16>,
    %c0_14 = arith.constant 0 : index
    %c2 = arith.constant 2 : index
    %c0_15 = arith.constant 0 : index
    %c0_16 = arith.constant 0 : index
    %9 = vector.load %arg1[%c0_14, %c2, %c0_15, %c0_16] : memref<1x4x90x128xbf16, #tpu.memory_space<vmem>>, vector<1x1x72x128xbf16>
    %10 = vector.shape_cast %9 : vector<1x1x72x128xbf16> to vector<72x128xbf16>
    %c0_17 = arith.constant 0 : index
    %c384 = arith.constant 384 : index
    %11 = vector.load %arg10[%c0_17, %c384] : memref<72x1152xbf16, #tpu.memory_space<vmem>>, vector<72x128xbf16>
    tpu.vector_store %arg10[%c0_17, %c384], %10 {strides = array<i32>} : memref<72x1152xbf16, #tpu.memory_space<vmem>>, vector<72x128xbf16>,
    %c0_18 = arith.constant 0 : index
    %c3 = arith.constant 3 : index
    %c0_19 = arith.constant 0 : index
    %c0_20 = arith.constant 0 : index
    %12 = vector.load %arg1[%c0_18, %c3, %c0_19, %c0_20] : memref<1x4x90x128xbf16, #tpu.memory_space<vmem>>, vector<1x1x72x128xbf16>
    %13 = vector.shape_cast %12 : vector<1x1x72x128xbf16> to vector<72x128xbf16>
    %c0_21 = arith.constant 0 : index
    %c512 = arith.constant 512 : index
    %14 = vector.load %arg10[%c0_21, %c512] : memref<72x1152xbf16, #tpu.memory_space<vmem>>, vector<72x128xbf16>
    tpu.vector_store %arg10[%c0_21, %c512], %13 {strides = array<i32>} : memref<72x1152xbf16, #tpu.memory_space<vmem>>, vector<72x128xbf16>,
    %c0_22 = arith.constant 0 : index
    %c2_23 = arith.constant 2 : index
    %c1_24 = arith.constant 1 : index
    %c0_25 = arith.constant 0 : index
    %15 = vector.load %arg1[%c0_22, %c2_23, %c1_24, %c0_25] : memref<1x4x90x128xbf16, #tpu.memory_space<vmem>>, vector<1x1x72x128xbf16>
    %16 = vector.shape_cast %15 : vector<1x1x72x128xbf16> to vector<72x128xbf16>
    %c0_26 = arith.constant 0 : index
    %c640 = arith.constant 640 : index
    %17 = vector.load %arg10[%c0_26, %c640] : memref<72x1152xbf16, #tpu.memory_space<vmem>>, vector<72x128xbf16>
    tpu.vector_store %arg10[%c0_26, %c640], %16 {strides = array<i32>} : memref<72x1152xbf16, #tpu.memory_space<vmem>>, vector<72x128xbf16>,
    %c0_27 = arith.constant 0 : index
    %c0_28 = arith.constant 0 : index
    %c9 = arith.constant 9 : index
    %c0_29 = arith.constant 0 : index
    %18 = vector.load %arg1[%c0_27, %c0_28, %c9, %c0_29] : memref<1x4x90x128xbf16, #tpu.memory_space<vmem>>, vector<1x1x72x128xbf16>
    %19 = vector.shape_cast %18 : vector<1x1x72x128xbf16> to vector<72x128xbf16>
    %c0_30 = arith.constant 0 : index
    %c768 = arith.constant 768 : index
    %20 = vector.load %arg10[%c0_30, %c768] : memref<72x1152xbf16, #tpu.memory_space<vmem>>, vector<72x128xbf16>
    tpu.vector_store %arg10[%c0_30, %c768], %19 {strides = array<i32>} : memref<72x1152xbf16, #tpu.memory_space<vmem>>, vector<72x128xbf16>,
    %c0_31 = arith.constant 0 : index
    %c1_32 = arith.constant 1 : index
    %c9_33 = arith.constant 9 : index
    %c0_34 = arith.constant 0 : index
    %21 = vector.load %arg1[%c0_31, %c1_32, %c9_33, %c0_34] : memref<1x4x90x128xbf16, #tpu.memory_space<vmem>>, vector<1x1x72x128xbf16>
    %22 = vector.shape_cast %21 : vector<1x1x72x128xbf16> to vector<72x128xbf16>
    %c0_35 = arith.constant 0 : index
    %c896 = arith.constant 896 : index
    %23 = vector.load %arg10[%c0_35, %c896] : memref<72x1152xbf16, #tpu.memory_space<vmem>>, vector<72x128xbf16>
    tpu.vector_store %arg10[%c0_35, %c896], %22 {strides = array<i32>} : memref<72x1152xbf16, #tpu.memory_space<vmem>>, vector<72x128xbf16>,
    %c0_36 = arith.constant 0 : index
    %c0_37 = arith.constant 0 : index
    %c10 = arith.constant 10 : index
    %c0_38 = arith.constant 0 : index
    %24 = vector.load %arg1[%c0_36, %c0_37, %c10, %c0_38] : memref<1x4x90x128xbf16, #tpu.memory_space<vmem>>, vector<1x1x72x128xbf16>
    %25 = vector.shape_cast %24 : vector<1x1x72x128xbf16> to vector<72x128xbf16>
    %c0_39 = arith.constant 0 : index
    %c1024 = arith.constant 1024 : index
    %26 = vector.load %arg10[%c0_39, %c1024] : memref<72x1152xbf16, #tpu.memory_space<vmem>>, vector<72x128xbf16>
    tpu.vector_store %arg10[%c0_39, %c1024], %25 {strides = array<i32>} : memref<72x1152xbf16, #tpu.memory_space<vmem>>, vector<72x128xbf16>,
    %c0_40 = arith.constant 0 : index
    %c0_41 = arith.constant 0 : index
    %27 = vector.load %arg10[%c0_40, %c0_41] : memref<72x1152xbf16, #tpu.memory_space<vmem>>, vector<72x1152xbf16>
    %c0_42 = arith.constant 0 : index
    %c0_43 = arith.constant 0 : index
    %28 = vector.load %arg3[%c0_42, %c0_43] : memref<1152x128xbf16, #tpu.memory_space<vmem>>, vector<1152x128xbf16>
    %cst = arith.constant dense<0.000000e+00> : vector<72x128xf32>
    %29 = tpu.matmul %27, %28, %cst {dimension_numbers = #tpu.dot_dimension_numbers<[1], [0], [0], [1], [0, 0, 1, 1], [], []>} : vector<72x1152xbf16>, vector<1152x128xbf16>, vector<72x128xf32> -> vector<72x128xf32>
    %c0_44 = arith.constant 0 : index
    %c0_45 = arith.constant 0 : index
    %30 = vector.load %arg4[%c0_44, %c0_45] : memref<1x128xf32, #tpu.memory_space<vmem>>, vector<1x128xf32>
    %31 = vector.broadcast %30 : vector<1x128xf32> to vector<72x128xf32>
    %32 = arith.addf %29, %31 : vector<72x128xf32>
    %cst_46 = arith.constant 0.000000e+00 : f32
    %33 = vector.broadcast %cst_46 : f32 to vector<72x128xf32>
    %34 = arith.maximumf %32, %33 : vector<72x128xf32>
    %c0_47 = arith.constant 0 : index
    %c0_48 = arith.constant 0 : index
    %35 = vector.load %arg2[%c0_47, %c0_48] : memref<72x1xf32, #tpu.memory_space<vmem>>, vector<72x1xf32>
    %36 = vector.broadcast %35 : vector<72x1xf32> to vector<72x128xf32>
    %37 = arith.mulf %34, %36 : vector<72x128xf32>
    %cst_49 = arith.constant 0.000000e+00 : bf16
    %38 = vector.broadcast %cst_49 : bf16 to vector<16x128xbf16>
    %c0_50 = arith.constant 0 : index
    %c0_51 = arith.constant 0 : index
    %39 = vector.load %arg11[%c0_50, %c0_51] : memref<104x128xbf16, #tpu.memory_space<vmem>>, vector<16x128xbf16>
    tpu.vector_store %arg11[%c0_50, %c0_51], %38 {strides = array<i32>} : memref<104x128xbf16, #tpu.memory_space<vmem>>, vector<16x128xbf16>,
    %c88 = arith.constant 88 : index
    %c0_52 = arith.constant 0 : index
    %40 = vector.load %arg11[%c88, %c0_52] : memref<104x128xbf16, #tpu.memory_space<vmem>>, vector<16x128xbf16>
    tpu.vector_store %arg11[%c88, %c0_52], %38 {strides = array<i32>} : memref<104x128xbf16, #tpu.memory_space<vmem>>, vector<16x128xbf16>,
    %41 = arith.truncf %37 : vector<72x128xf32> to vector<72x128xbf16>
    %c16 = arith.constant 16 : index
    %c0_53 = arith.constant 0 : index
    %42 = vector.load %arg11[%c16, %c0_53] : memref<104x128xbf16, #tpu.memory_space<vmem>>, vector<72x128xbf16>
    tpu.vector_store %arg11[%c16, %c0_53], %41 {strides = array<i32>} : memref<104x128xbf16, #tpu.memory_space<vmem>>, vector<72x128xbf16>,
    %c6 = arith.constant 6 : index
    %c0_54 = arith.constant 0 : index
    %43 = vector.load %arg11[%c6, %c0_54] : memref<104x128xbf16, #tpu.memory_space<vmem>>, vector<72x128xbf16>
    %c0_55 = arith.constant 0 : index
    %c0_56 = arith.constant 0 : index
    %44 = vector.load %arg12[%c0_55, %c0_56] : memref<72x1152xbf16, #tpu.memory_space<vmem>>, vector<72x128xbf16>
    tpu.vector_store %arg12[%c0_55, %c0_56], %43 {strides = array<i32>} : memref<72x1152xbf16, #tpu.memory_space<vmem>>, vector<72x128xbf16>,
    %c7 = arith.constant 7 : index
    %c0_57 = arith.constant 0 : index
    %45 = vector.load %arg11[%c7, %c0_57] : memref<104x128xbf16, #tpu.memory_space<vmem>>, vector<72x128xbf16>
    %c0_58 = arith.constant 0 : index
    %c128_59 = arith.constant 128 : index
    %46 = vector.load %arg12[%c0_58, %c128_59] : memref<72x1152xbf16, #tpu.memory_space<vmem>>, vector<72x128xbf16>
    tpu.vector_store %arg12[%c0_58, %c128_59], %45 {strides = array<i32>} : memref<72x1152xbf16, #tpu.memory_space<vmem>>, vector<72x128xbf16>,
    %c8 = arith.constant 8 : index
    %c0_60 = arith.constant 0 : index
    %47 = vector.load %arg11[%c8, %c0_60] : memref<104x128xbf16, #tpu.memory_space<vmem>>, vector<72x128xbf16>
    %c0_61 = arith.constant 0 : index
    %c256_62 = arith.constant 256 : index
    %48 = vector.load %arg12[%c0_61, %c256_62] : memref<72x1152xbf16, #tpu.memory_space<vmem>>, vector<72x128xbf16>
    tpu.vector_store %arg12[%c0_61, %c256_62], %47 {strides = array<i32>} : memref<72x1152xbf16, #tpu.memory_space<vmem>>, vector<72x128xbf16>,
    %c15 = arith.constant 15 : index
    %c0_63 = arith.constant 0 : index
    %49 = vector.load %arg11[%c15, %c0_63] : memref<104x128xbf16, #tpu.memory_space<vmem>>, vector<72x128xbf16>
    %c0_64 = arith.constant 0 : index
    %c384_65 = arith.constant 384 : index
    %50 = vector.load %arg12[%c0_64, %c384_65] : memref<72x1152xbf16, #tpu.memory_space<vmem>>, vector<72x128xbf16>
    tpu.vector_store %arg12[%c0_64, %c384_65], %49 {strides = array<i32>} : memref<72x1152xbf16, #tpu.memory_space<vmem>>, vector<72x128xbf16>,
    %c16_66 = arith.constant 16 : index
    %c0_67 = arith.constant 0 : index
    %51 = vector.load %arg11[%c16_66, %c0_67] : memref<104x128xbf16, #tpu.memory_space<vmem>>, vector<72x128xbf16>
    %c0_68 = arith.constant 0 : index
    %c512_69 = arith.constant 512 : index
    %52 = vector.load %arg12[%c0_68, %c512_69] : memref<72x1152xbf16, #tpu.memory_space<vmem>>, vector<72x128xbf16>
    tpu.vector_store %arg12[%c0_68, %c512_69], %51 {strides = array<i32>} : memref<72x1152xbf16, #tpu.memory_space<vmem>>, vector<72x128xbf16>,
    %c17 = arith.constant 17 : index
    %c0_70 = arith.constant 0 : index
    %53 = vector.load %arg11[%c17, %c0_70] : memref<104x128xbf16, #tpu.memory_space<vmem>>, vector<72x128xbf16>
    %c0_71 = arith.constant 0 : index
    %c640_72 = arith.constant 640 : index
    %54 = vector.load %arg12[%c0_71, %c640_72] : memref<72x1152xbf16, #tpu.memory_space<vmem>>, vector<72x128xbf16>
    tpu.vector_store %arg12[%c0_71, %c640_72], %53 {strides = array<i32>} : memref<72x1152xbf16, #tpu.memory_space<vmem>>, vector<72x128xbf16>,
    %c24 = arith.constant 24 : index
    %c0_73 = arith.constant 0 : index
    %55 = vector.load %arg11[%c24, %c0_73] : memref<104x128xbf16, #tpu.memory_space<vmem>>, vector<72x128xbf16>
    %c0_74 = arith.constant 0 : index
    %c768_75 = arith.constant 768 : index
    %56 = vector.load %arg12[%c0_74, %c768_75] : memref<72x1152xbf16, #tpu.memory_space<vmem>>, vector<72x128xbf16>
    tpu.vector_store %arg12[%c0_74, %c768_75], %55 {strides = array<i32>} : memref<72x1152xbf16, #tpu.memory_space<vmem>>, vector<72x128xbf16>,
    %c25 = arith.constant 25 : index
    %c0_76 = arith.constant 0 : index
    %57 = vector.load %arg11[%c25, %c0_76] : memref<104x128xbf16, #tpu.memory_space<vmem>>, vector<72x128xbf16>
    %c0_77 = arith.constant 0 : index
    %c896_78 = arith.constant 896 : index
    %58 = vector.load %arg12[%c0_77, %c896_78] : memref<72x1152xbf16, #tpu.memory_space<vmem>>, vector<72x128xbf16>
    tpu.vector_store %arg12[%c0_77, %c896_78], %57 {strides = array<i32>} : memref<72x1152xbf16, #tpu.memory_space<vmem>>, vector<72x128xbf16>,
    %c26 = arith.constant 26 : index
    %c0_79 = arith.constant 0 : index
    %59 = vector.load %arg11[%c26, %c0_79] : memref<104x128xbf16, #tpu.memory_space<vmem>>, vector<72x128xbf16>
    %c0_80 = arith.constant 0 : index
    %c1024_81 = arith.constant 1024 : index
    %60 = vector.load %arg12[%c0_80, %c1024_81] : memref<72x1152xbf16, #tpu.memory_space<vmem>>, vector<72x128xbf16>
    tpu.vector_store %arg12[%c0_80, %c1024_81], %59 {strides = array<i32>} : memref<72x1152xbf16, #tpu.memory_space<vmem>>, vector<72x128xbf16>,
    %c0_82 = arith.constant 0 : index
    %c0_83 = arith.constant 0 : index
    %61 = vector.load %arg12[%c0_82, %c0_83] : memref<72x1152xbf16, #tpu.memory_space<vmem>>, vector<72x1152xbf16>
    %c0_84 = arith.constant 0 : index
    %c0_85 = arith.constant 0 : index
    %62 = vector.load %arg5[%c0_84, %c0_85] : memref<1152x128xbf16, #tpu.memory_space<vmem>>, vector<1152x128xbf16>
    %cst_86 = arith.constant dense<0.000000e+00> : vector<72x128xf32>
    %63 = tpu.matmul %61, %62, %cst_86 {dimension_numbers = #tpu.dot_dimension_numbers<[1], [0], [0], [1], [0, 0, 1, 1], [], []>} : vector<72x1152xbf16>, vector<1152x128xbf16>, vector<72x128xf32> -> vector<72x128xf32>
    %c0_87 = arith.constant 0 : index
    %c0_88 = arith.constant 0 : index
    %64 = vector.load %arg6[%c0_87, %c0_88] : memref<1x128xf32, #tpu.memory_space<vmem>>, vector<1x128xf32>
    %65 = vector.broadcast %64 : vector<1x128xf32> to vector<72x128xf32>
    %66 = arith.addf %63, %65 : vector<72x128xf32>
    %c0_89 = arith.constant 0 : index
    %c3_90 = arith.constant 3 : index
    %c0_91 = arith.constant 0 : index
    %c0_92 = arith.constant 0 : index
    %67 = vector.load %arg1[%c0_89, %c3_90, %c0_91, %c0_92] : memref<1x4x90x128xbf16, #tpu.memory_space<vmem>>, vector<1x1x72x128xbf16>
    %68 = vector.shape_cast %67 : vector<1x1x72x128xbf16> to vector<72x128xbf16>
    %c0_93 = arith.constant 0 : index
    %c0_94 = arith.constant 0 : index
    %69 = vector.load %arg7[%c0_93, %c0_94] : memref<128x128xbf16, #tpu.memory_space<vmem>>, vector<128x128xbf16>
    %cst_95 = arith.constant dense<0.000000e+00> : vector<72x128xf32>
    %70 = tpu.matmul %68, %69, %cst_95 {dimension_numbers = #tpu.dot_dimension_numbers<[1], [0], [0], [1], [0, 0, 1, 1], [], []>} : vector<72x128xbf16>, vector<128x128xbf16>, vector<72x128xf32> -> vector<72x128xf32>
    %c0_96 = arith.constant 0 : index
    %c0_97 = arith.constant 0 : index
    %71 = vector.load %arg8[%c0_96, %c0_97] : memref<1x128xf32, #tpu.memory_space<vmem>>, vector<1x128xf32>
    %72 = vector.broadcast %71 : vector<1x128xf32> to vector<72x128xf32>
    %73 = arith.addf %70, %72 : vector<72x128xf32>
    %74 = arith.addf %66, %73 : vector<72x128xf32>
    %cst_98 = arith.constant 0.000000e+00 : f32
    %75 = vector.broadcast %cst_98 : f32 to vector<72x128xf32>
    %76 = arith.maximumf %74, %75 : vector<72x128xf32>
    %77 = arith.truncf %76 : vector<72x128xf32> to vector<72x128xbf16>
    %c0_99 = arith.constant 0 : index
    %c0_100 = arith.constant 0 : index
    %c0_101 = arith.constant 0 : index
    %78 = vector.load %arg9[%c0_99, %c0_100, %c0_101] : memref<1x72x128xbf16, #tpu.memory_space<vmem>>, vector<1x72x128xbf16>
    %79 = vector.shape_cast %78 : vector<1x72x128xbf16> to vector<72x128xbf16>
    %80 = vector.shape_cast %77 : vector<72x128xbf16> to vector<1x72x128xbf16>
    tpu.vector_store %arg9[%c0_99, %c0_100, %c0_101], %80 {strides = array<i32>} : memref<1x72x128xbf16, #tpu.memory_space<vmem>>, vector<1x72x128xbf16>,
    return
  }
  func.func @transform_0(%arg0: i32) -> (i32, i32, i32, i32) {
    %c0_i32 = arith.constant 0 : i32
    %c0_i32_0 = arith.constant 0 : i32
    %c0_i32_1 = arith.constant 0 : i32
    %c0_i32_2 = arith.constant 0 : i32
    return %arg0, %c0_i32, %c0_i32_0, %c0_i32_1 : i32, i32, i32, i32
  }
  func.func @transform_1(%arg0: i32) -> (i32, i32) {
    %c0_i32 = arith.constant 0 : i32
    %c0_i32_0 = arith.constant 0 : i32
    %c0_i32_1 = arith.constant 0 : i32
    return %c0_i32, %c0_i32_0 : i32, i32
  }
  func.func @transform_2(%arg0: i32) -> (i32, i32) {
    %c0_i32 = arith.constant 0 : i32
    %c0_i32_0 = arith.constant 0 : i32
    %c0_i32_1 = arith.constant 0 : i32
    return %c0_i32, %c0_i32_0 : i32, i32
  }
  func.func @transform_3(%arg0: i32) -> (i32, i32) {
    %c0_i32 = arith.constant 0 : i32
    %c0_i32_0 = arith.constant 0 : i32
    %c0_i32_1 = arith.constant 0 : i32
    return %c0_i32, %c0_i32_0 : i32, i32
  }
  func.func @transform_4(%arg0: i32) -> (i32, i32) {
    %c0_i32 = arith.constant 0 : i32
    %c0_i32_0 = arith.constant 0 : i32
    %c0_i32_1 = arith.constant 0 : i32
    return %c0_i32, %c0_i32_0 : i32, i32
  }
  func.func @transform_5(%arg0: i32) -> (i32, i32) {
    %c0_i32 = arith.constant 0 : i32
    %c0_i32_0 = arith.constant 0 : i32
    %c0_i32_1 = arith.constant 0 : i32
    return %c0_i32, %c0_i32_0 : i32, i32
  }
  func.func @transform_6(%arg0: i32) -> (i32, i32) {
    %c0_i32 = arith.constant 0 : i32
    %c0_i32_0 = arith.constant 0 : i32
    %c0_i32_1 = arith.constant 0 : i32
    return %c0_i32, %c0_i32_0 : i32, i32
  }
  func.func @transform_7(%arg0: i32) -> (i32, i32) {
    %c0_i32 = arith.constant 0 : i32
    %c0_i32_0 = arith.constant 0 : i32
    %c0_i32_1 = arith.constant 0 : i32
    return %c0_i32, %c0_i32_0 : i32, i32
  }
  func.func @transform_8(%arg0: i32) -> (i32, i32, i32) {
    %c0_i32 = arith.constant 0 : i32
    %c0_i32_0 = arith.constant 0 : i32
    %c0_i32_1 = arith.constant 0 : i32
    return %arg0, %c0_i32, %c0_i32_0 : i32, i32, i32
  }
}

</mosaic_0001>

<bundles_post_ra>
// kernel: tpu_custom_call.1
= control target key start
LH: loop header
LB: loop body
LE: loop exit
PB: predicated region body
PF: predicated region fallthrough
CT: control target
= control target key end

     0   :  { %13 = vsyncpa [#allocation6], 0  ;;  %s7423_s0 = inlined_call_operand.vmem [shape: bf16[2,4,90,128], index: 0, kind: input, shape index: {}]   ;;  %s7424_s1 = inlined_call_operand.vmem [shape: f32[72,1], index: 1, kind: input, shape index: {}]   ;;  %s7425_s2 = inlined_call_operand.vmem [shape: bf16[1152,128], index: 2, kind: input, shape index: {}]   ;;  %s7426_s3 = inlined_call_operand.vmem [shape: f32[1,128], index: 3, kind: input, shape index: {}]   ;;  %s7427_s4 = inlined_call_operand.hbm [shape: bf16[1152,128], index: 4, kind: input, shape index: {}]   ;;  %s7428_s5 = inlined_call_operand.vmem [shape: f32[1,128], index: 5, kind: input, shape index: {}]   ;;  %s7429_s6 = inlined_call_operand.vmem [shape: bf16[128,128], index: 6, kind: input, shape index: {}]   ;;  %s7430_s7 = inlined_call_operand.vmem [shape: f32[1,128], index: 7, kind: input, shape index: {}]   ;;  %s7431_s8 = inlined_call_operand.hbm [shape: bf16[2,72,128], index: 8, kind: output, shape index: {}]  }
   0x1   :  { %14 = vsyncpa [#allocation7], 0 }
   0x2   :  { %16 = vsyncpa [#allocation7 + $0x1], 0  ;;  %s5934_s27 = smov 0   ;;  %s5936_s28 = smov 0  }
   0x3   :  { %s5938_s29 = smov 0   ;;  %s5940_s30 = smov 0  }
   0x4 LB: > { %s5955_s9 = sadd.s32 4294967295, %s5878_s30   ;;  %s4479_s10 = sadd.s32 4294967294, %s5878_s30   ;;  %s5878_s30 = sphi %s5940_s30, %s7582_s30   ;;  %s5874_s29 = sphi %s5938_s29, %s7581_s29   ;;  %s5870_s28 = sphi %s5936_s28, %s7580_s28   ;;  %s5866_s27 = sphi %s5934_s27, %s7579_s27  }
   0x5   : > { %s5959_s11 = sadd.s32 1, %s5878_s30   ;;  %s202_s12 = sadd.s32 1, %s5874_s29 }
   0x6   : > { %s199_s13 = ssub.s32 %s5878_s30, %s5959_s11  ;;  %p212_p0 = scmp.ne.s32.totalorder %s5874_s29, %s5870_s28 }
   0x7   : > { %p200_p1 = scmp.eq.s32.totalorder %s199_s13, 0  ;;  %p213_p2 = scmp.eq.s32.totalorder %s5955_s9, 1 }
   0x8   : > { %p218_p3 = scmp.ne.s32.totalorder %s5870_s28, %s5866_s27  ;;  %p219_p4 = scmp.eq.s32.totalorder %s4479_s10, 1 }
   0x9   : > { %s5970_s14 = scalar_select %p200_p1, %s5874_s29, %s202_s12  }
   0xa   : > { %p5972_p5 = por %p213_p2, %p212_p0  ;;  %p5976_p6 = por %p219_p4, %p218_p3 }
   0xb   : > { %p4480_p7 = scmp.ge.s32.totalorder %s5878_s30, 1  ;;  %p226_p8 = scmp.lt.s32.totalorder %s5878_s30, 3 }
   0xc   : > { %s7474_s15 = scalar_select %p5972_p5, 1, 0 }
   0xd   : > { %s7475_s16 = scalar_select %p5976_p6, 1, 0 }
   0xe   : > { %p7432_p9 = scmp.eq.s32.totalorder %s5955_s9, 0  ;;  %p5983_p10 = pnand %p4480_p7, %p226_p8 }
   0xf   : > { %s5880_s18 = smov [#allocation5]   ;;  %s5784_s23 = scalar_lea.hbm %s7427_s4, 9216 }
  0x10   : > { %s7476_s17 = scalar_select %p5983_p10, 1, 0 }
  0x11   : > { %s247_s19 = sshll.u32 %s5880_s18, 4  ;;  %p5457_p11 = pneg %p5983_p10  ;;  %s248_s19 = int_to_ptr.vmem [resolvable:$true] %s247_s19 }
  0x12   : > { %p5785_p13 = scmp.ne.s32.totalorder %s7427_s4, %s5784_s23  ;;  %p5791_p3 = scmp.lt.u32.totalorder %s5784_s23, %s7427_s4 }
  0x13   : > { %p5991_p12 = pnand %p7432_p9, %p5457_p11 }
  0x15   : > { %p5786_p0 = pneg %p5991_p12 }
  0x17   : > { %p5787_p1 = pnand %p5786_p0, %p5785_p13 }
  0x19   : > { %p5788_p2 = pneg %p5787_p1 }
  0x1b   : > { %p5793_p4 = pnand %p5791_p3, %p5788_p2 }
  0x1d   : > { %5796 = shalt.err (!%p5793_p4)
}
  0x1e   : > { %s5797_s12 = scalar_lea.vmem %s248_s19, 9216  ;;  %p5805_p9 = scmp.lt.s32.totalorder %s248_s19, %s248_s19 }
  0x1f   : > { %p5798_p7 = scmp.ne.s32.totalorder %s248_s19, %s5797_s12  ;;  %p5806_p6 = scmp.lt.s32.totalorder %s5797_s12, %s5797_s12 }
  0x21   : > { %p5800_p8 = pnand %p5798_p7, %p5786_p0  ;;  %p5807_p5 = por %p5806_p6, %p5805_p9 }
  0x23   : > { %p5801_p11 = pneg %p5800_p8 }
  0x25   : > { %p5808_p10 = pnand %p5807_p5, %p5801_p11 }
  0x27   : > { %5811 = shalt.err (!%p5808_p10)
}
  0x28   : > { %s5881_s13 = smov 64   ;;  %s5882_s18 = smov 4  }
  0x29   : > { %5460 = dma.hbm_to_vmem [thread:$0]  (!%p5991_p12), %s7427_s4, 9216, %s248_s19, [#allocation6], %s5881_s13, %s5881_s13, %s5882_s18  }
  0x2a   : > { %p7478_p13 = scmp.ne.s32.totalorder %s7476_s17, 0 }
  0x2c   : > { %280 = sbr.rel (%p7478_p13) target bundleno = 871 (0x367), region = 52 }
  0x33   : > { %p7479_p1 = scmp.eq.s32.totalorder %s5955_s9, 0 }
  0x35   : > { %5857 = dma.done.wait (%p7479_p1), [#allocation6], 9216   ;;  %p7480_p0 = pmov %p7479_p1 }
  0x36   : > { %v5510_v0 = vld [vmem:[%s7425_s2 + $0x40] sm:$0xff]   ;;  %v5514_v4 = vld [vmem:[%s7425_s2 + $0x48] sm:$0xff]   ;;  %v5518_v8 = vld [vmem:[%s7425_s2 + $0x50] sm:$0xff]   ;;  %p314_p5 = scmp.lt.s32.totalorder %s5955_s9, 1  ;;  %vm367_vm0 = vsmask.f32 3328 }
  0x37   : > { %5859 = vsyncadd (%p7480_p0), [#allocation6], 4294958080  ;;  %v5511_v1 = vld [vmem:[%s7425_s2] sm:$0xff]   ;;  %4883 = vmatprep.subr.bf16.mxu0 %v5510_v0  ;;  %v5515_v5 = vld [vmem:[%s7425_s2 + $0x8] sm:$0xff]   ;;  %vm368_vm1 = vsmask.f32 7440 }
  0x38   : > { %v5512_v2 = vld [vmem:[%s7425_s2 + $0xc0] sm:$0xff]   ;;  %4884 = vmatpush3.bf16.msra.mxu0 %v5511_v1  ;;  %v5516_v6 = vld [vmem:[%s7425_s2 + $0xc8] sm:$0xff]   ;;  %v5519_v9 = vld [vmem:[%s7425_s2 + $0x10] sm:$0xff]   ;;  %s315_s10 = scalar_select %p314_p5, %s5955_s9, 1  ;;  %v7481_v52 = vmov 0  ;;  %vm906_vm3 = vcmask 1042432  }
  0x39   : > { %v5513_v3 = vld [vmem:[%s7425_s2 + $0x80] sm:$0xff]   ;;  %4929 = vmatprep.subr.bf16.mxu1 %v5512_v2  ;;  %4885 = vmatprep.subr.bf16.mxu0 %v5514_v4  ;;  %v5517_v7 = vld [vmem:[%s7425_s2 + $0x88] sm:$0xff]   ;;  %v5520_v10 = vld [vmem:[%s7425_s2 + $0xd0] sm:$0xff]   ;;  %vm907_vm4 = vcmask 1046532   ;;  %vm5885_vm6 = vmmov 0   ;;  %vm2301_vm7 = vcmask 1040384  }
  0x3a   : > { %4930 = vmatpush3.bf16.msra.mxu1 %v5513_v3  ;;  %v5521_v11 = vld [vmem:[%s7425_s2 + $0x90] sm:$0xff]   ;;  %v5522_v12 = vld [vmem:[%s7425_s2 + $0x58] sm:$0xff]   ;;  %v5526_v16 = vld [vmem:[%s7425_s2 + $0x60] sm:$0xff]   ;;  %s5449_s26 = smul.u32 192, %s315_s10  ;;  %vm2302_vm8 = vcmask 1044484   ;;  %p7577_p9 = scmp.ne.s32.totalorder %s7474_s15, 0 }
  0x3b   : > { %4931 = vmatprep.subr.bf16.mxu1 %v5516_v6  ;;  %v5523_v13 = vld [vmem:[%s7425_s2 + $0x18] sm:$0xff]   ;;  %v5527_v17 = vld [vmem:[%s7425_s2 + $0x20] sm:$0xff]   ;;  %v5530_v20 = vld [vmem:[%s7425_s2 + $0x68] sm:$0xff]   ;;  %vm2360_vm9 = vsmask.f32 256  ;;  %s5450_s12 = smul.u32 576, %s5955_s9 }
  0x3c   : > { %4886 = vmatpush3.bf16.msra.mxu0 %v5515_v5  ;;  %v5524_v14 = vld [vmem:[%s7425_s2 + $0xd8] sm:$0xff]   ;;  %v5528_v18 = vld [vmem:[%s7425_s2 + $0xe0] sm:$0xff]   ;;  %v5531_v21 = vld [vmem:[%s7425_s2 + $0x28] sm:$0xff]   ;;  %s6115_s24 = scalar_lea.vmem %s7423_s0, %s5449_s26  ;;  %vm2361_vm11 = vsmask.f32 4368  ;;  %s311_s26 = sand.u32 1, %s5870_s28  }
  0x3d   : > { %4887 = vmatprep.subr.bf16.mxu0 %v5518_v8  ;;  %v5525_v15 = vld [vmem:[%s7425_s2 + $0x98] sm:$0xff]   ;;  %v5529_v19 = vld [vmem:[%s7425_s2 + $0xa0] sm:$0xff]   ;;  %v5532_v22 = vld [vmem:[%s7425_s2 + $0xe8] sm:$0xff]   ;;  %s5448_s20 = smul.u32 36, %s311_s26  ;;  %s7377_s21 = scalar_lea.hbm %s7431_s8, %s5450_s12 }
  0x3e   : > { %4932 = vmatpush3.bf16.msra.mxu1 %v5517_v7  ;;  %v5533_v23 = vld [vmem:[%s7425_s2 + $0xa8] sm:$0xff]   ;;  %v5534_v24 = vld [vmem:[%s7425_s2 + $0x70] sm:$0xff]   ;;  %v5538_v28 = vld [vmem:[%s7425_s2 + $0x78] sm:$0xff]   ;;  %s7382_s10 = scalar_lea.sflag [#allocation7], %s311_s26  ;;  %s5886_s9 = smov [#allocation8]  }
  0x3f   : > { %4933 = vmatprep.subr.bf16.mxu1 %v5520_v10  ;;  %v5535_v25 = vld [vmem:[%s7425_s2 + $0x30] sm:$0xff]   ;;  %v5539_v29 = vld [vmem:[%s7425_s2 + $0x38] sm:$0xff]   ;;  %v320_v31 = vld [vmem:[%s6115_s24] sm:$0xf]  ;;  %s7361_s19 = scalar_lea.vmem [#allocation8], %s5448_s20  ;;  %s5816_s23 = sshll.u32 %s5886_s9, 4  ;;  %s5817_s23 = int_to_ptr.vmem [resolvable:$false] %s5816_s23 }
  0x40   : > { %4888 = vmatpush3.bf16.msra.mxu0 %v5519_v9  ;;  %v5536_v26 = vld [vmem:[%s7425_s2 + $0xf0] sm:$0xff]   ;;  %v5540_v30 = vld [vmem:[%s7425_s2 + $0xf8] sm:$0xff]   ;;  %v321_v32 = vld [vmem:[%s6115_s24 + $0x4] sm:$0xf]  ;;  %329 = vst [vmem:[#allocation2] sm:$0xf] %v320_v31 }
  0x41   : > { %4889 = vmatprep.subr.bf16.mxu0 %v5522_v12  ;;  %v5537_v27 = vld [vmem:[%s7425_s2 + $0xb0] sm:$0xff]   ;;  %330 = vst [vmem:[#allocation2 + $0x24] sm:$0xf] %v321_v32  ;;  %v5544_v35 = vld [vmem:[%s7425_s2 + $0xb8] sm:$0xff]   ;;  %v5545_v36 = vld [vmem:[%s7425_s2 + $0x140] sm:$0xff]   ;;  %s4405_s17 = sshll.u32 %s7361_s19, 4  ;;  %s7372_s17 = int_to_ptr.vmem [resolvable:$true] %s4405_s17 }
  0x42   : > { %4934 = vmatpush3.bf16.msra.mxu1 %v5521_v11  ;;  %v4486_v33 = vld [vmem:[%s6115_s24 + $0x30] sm:$0xf]  ;;  %v4487_v34 = vld [vmem:[%s6115_s24 + $0x34] sm:$0xf]  ;;  %v357_v37 = vld [vmem:[%s6115_s24] sm:$0xf]  ;;  %p5819_p2 = scmp.lt.s32.totalorder %s7372_s17, %s5817_s23 }
  0x43   : > { %4935 = vmatprep.subr.bf16.mxu1 %v5524_v14  ;;  %348 = vst [vmem:[#allocation2 + $0x4] sm:$0xf] %v4486_v33  ;;  %349 = vst [vmem:[#allocation2 + $0x28] sm:$0xf] %v4487_v34  ;;  %v358_v38 = vld [vmem:[%s6115_s24 + $0x4] sm:$0xf] }
  0x44   : > { %4890 = vmatpush3.bf16.msra.mxu0 %v5523_v13  ;;  %v359_v39 = vld [vmem:[%s6115_s24 + $0x8] sm:$0xf]  ;;  %v371_v40 = vshrl.u32 %v357_v37, 16  ;;  %v374_v41 = vshll.u32 %v357_v37, 16  ;;  %v380_v42 = vshll.u32 %v358_v38, 16  ;;  %v384_v43 = vshrl.u32 %v358_v38, 16  ;;  %vm6134_vm2 = vmor %vm367_vm0, %vm368_vm1 }
  0x45   : > { %4891 = vmatprep.subr.bf16.mxu0 %v5526_v16  ;;  %v390_v44 = vshll.u32 %v359_v39, 16  ;;  %v394_v45 = vshrl.u32 %v359_v39, 16  ;;  %v4495_v46 = vld [vmem:[%s6115_s24 + $0x60] sm:$0xf]  ;;  %v4496_v47 = vld [vmem:[%s6115_s24 + $0x64] sm:$0xf]  ;;  %vm6513_vm5 = vmor %vm906_vm3, %vm907_vm4 }
  0x46   : > { %4936 = vmatpush3.bf16.msra.mxu1 %v5525_v15  ;;  %v373_v48 = vrot.slane %v371_v40, 4  ;;  %v376_v49 = vrot.slane %v374_v41, 5  ;;  %v382_v50 = vrot.slane %v380_v42, 5  ;;  %v386_v51 = vrot.slane %v384_v43, 4  ;;  %492 = vst [vmem:[#allocation2 + $0xc] sm:$0xf] %v4495_v46  ;;  %vm6593_vm10 = vmor %vm2301_vm7, %vm2302_vm8 }
  0x47   : > { %4937 = vmatprep.subr.bf16.mxu1 %v5528_v18  ;;  %493 = vst [vmem:[#allocation2 + $0x30] sm:$0xf] %v4496_v47  ;;  %v7482_v52 = vsel %vm6134_vm2, 4294967295, %v7481_v52  ;;  %v392_v53 = vrot.slane %v390_v44, 5  ;;  %v396_v54 = vrot.slane %v394_v45, 4  ;;  %v5549_v55 = vld [vmem:[%s7425_s2 + $0x100] sm:$0xff]   ;;  %vm6602_vm12 = vmor %vm2360_vm9, %vm2361_vm11 }
  0x48   : > { %4892 = vmatpush3.bf16.msra.mxu0 %v5527_v17  ;;  %7483 = vst [vmem:[#allocation11_spill] sm:$0xff] %v7482_v52  ;;  %v377_v56 = vor.u32 %v376_v49, %v373_v48  ;;  %v387_v57 = vor.u32 %v386_v51, %v382_v50  ;;  %v5550_v58 = vld [vmem:[%s7425_s2 + $0x148] sm:$0xff]   ;;  %v5541_v59 = vld [vmem:[#allocation2] ss:$36 sps:$4 sm:$0xff]   ;;  %v4488_v6 = vld [vmem:[%s6115_s24 + $0x38] sm:$0xf] }
  0x49   : > { %4893 = vmatprep.subr.bf16.mxu0 %v5530_v20  ;;  %v397_v61 = vor.u32 %v396_v54, %v392_v53  ;;  %v5551_v1 = vld [vmem:[%s7425_s2 + $0x108] sm:$0xff]   ;;  %v4489_v7 = vld [vmem:[%s6115_s24 + $0x3c] sm:$0xf]  ;;  %350 = vst [vmem:[#allocation2 + $0x4c] sm:$0xf] %v4488_v6  ;;  %v5558_v18 = vld [vmem:[%s7425_s2 + $0x150] sm:$0xff]  }
  0x4a   : > { %4938 = vmatpush3.bf16.msra.mxu1 %v5529_v19  ;;  %v5543_v60 = vld [vmem:[#allocation2 + $0x4] ss:$36 sps:$4 sm:$0xff]   ;;  %v378_v62 = vrot.slane %v377_v56, 4  ;;  %v388_v63 = vrot.slane %v387_v57, 4  ;;  %v323_v3 = vld [vmem:[%s6115_s24 + $0xc] sm:$0xf] }
  0x4b   : > { %4939 = vmatprep.subr.bf16.mxu1 %v5532_v22  ;;  %1831 = vmatprep.mubr.bf16.mxu0 %v5543_v60  ;;  %v398_v0 = vrot.slane %v397_v61, 4  ;;  %v322_v2 = vld [vmem:[%s6115_s24 + $0x8] sm:$0xf]  ;;  %332 = vst [vmem:[#allocation2 + $0x6c] sm:$0xf] %v323_v3  ;;  %v5559_v19 = vld [vmem:[%s7425_s2 + $0x1c0] sm:$0xff]  }
  0x4c   : > { %4894 = vmatpush3.bf16.msra.mxu0 %v5531_v21  ;;  %v383_v4 = vsel %vm6134_vm2, %v378_v62, %v382_v50  ;;  %v393_v5 = vsel %vm6134_vm2, %v388_v63, %v392_v53  ;;  %331 = vst [vmem:[#allocation2 + $0x48] sm:$0xf] %v322_v2  ;;  %v360_v8 = vld [vmem:[%s6115_s24 + $0xc] sm:$0xf]  ;;  %351 = vst [vmem:[#allocation2 + $0x70] sm:$0xf] %v4489_v7 }
  0x4d   : > { %4895 = vmatprep.subr.bf16.mxu0 %v5534_v24  ;;  %473 = vst [vmem:[#allocation2 + $0x8] sm:$0xf] %v383_v4  ;;  %474 = vst [vmem:[#allocation2 + $0x2c] sm:$0xf] %v393_v5  ;;  %v361_v9 = vld [vmem:[%s6115_s24 + $0x10] sm:$0xf] }
  0x4e   : > { %4940 = vmatpush3.bf16.msra.mxu1 %v5533_v23  ;;  %v400_v10 = vshll.u32 %v360_v8, 16  ;;  %v404_v11 = vshrl.u32 %v360_v8, 16  ;;  %v4497_v12 = vld [vmem:[%s6115_s24 + $0x68] sm:$0xf]  ;;  %v410_v13 = vshll.u32 %v361_v9, 16  ;;  %v414_v14 = vshrl.u32 %v361_v9, 16 }
  0x4f   : > { %4941 = vmatprep.subr.bf16.mxu1 %v5536_v26  ;;  %v4498_v15 = vld [vmem:[%s6115_s24 + $0x6c] sm:$0xf]  ;;  %494 = vst [vmem:[#allocation2 + $0x54] sm:$0xf] %v4497_v12  ;;  %v5560_v21 = vld [vmem:[%s7425_s2 + $0x110] sm:$0xff]   ;;  %v5561_v26 = vld [vmem:[%s7425_s2 + $0x180] sm:$0xff]  }
  0x50   : > { %4896 = vmatpush3.bf16.msra.mxu0 %v5535_v25  ;;  %v402_v16 = vrot.slane %v400_v10, 5  ;;  %v406_v17 = vrot.slane %v404_v11, 4  ;;  %495 = vst [vmem:[#allocation2 + $0x78] sm:$0xf] %v4498_v15  ;;  %v412_v20 = vrot.slane %v410_v13, 5  ;;  %v416_v24 = vrot.slane %v414_v14, 4 }
  0x51   : > { %4897 = vmatprep.subr.bf16.mxu0 %v5538_v28  ;;  %v325_v34 = vld [vmem:[%s6115_s24 + $0x14] sm:$0xf]  ;;  %v4491_v37 = vld [vmem:[%s6115_s24 + $0x44] sm:$0xf]  ;;  %v5565_v38 = vld [vmem:[%s7425_s2 + $0x158] sm:$0xff]   ;;  %v5883_v14 = vmov 0  }
  0x52   : > { %4942 = vmatpush3.bf16.msra.mxu1 %v5537_v27  ;;  %v403_v22 = vsel %vm6134_vm2, %v398_v0, %v402_v16  ;;  %v407_v23 = vor.u32 %v406_v17, %v402_v16  ;;  %v324_v27 = vld [vmem:[%s6115_s24 + $0x10] sm:$0xf]  ;;  %334 = vst [vmem:[#allocation2 + $0xb4] sm:$0xf] %v325_v34  ;;  %353 = vst [vmem:[#allocation2 + $0xb8] sm:$0xf] %v4491_v37  ;;  %5508 = vset.pattern.permute.xlu0 %v5883_v14 }
  0x53   : > { %4943 = vmatprep.subr.bf16.mxu1 %v5540_v30  ;;  %475 = vst [vmem:[#allocation2 + $0x50] sm:$0xf] %v403_v22  ;;  %333 = vst [vmem:[#allocation2 + $0x90] sm:$0xf] %v324_v27  ;;  %v5548_v30 = vld [vmem:[#allocation2 + $0xc] ss:$36 sps:$4 sm:$0xff]   ;;  %5509 = vset.pattern.permute.xlu1 %v5883_v14 }
  0x54   : > { %4898 = vmatpush3.bf16.msra.mxu0 %v5539_v29  ;;  %v408_v25 = vrot.slane %v407_v23, 4  ;;  %v5546_v28 = vld [vmem:[#allocation2 + $0x8] ss:$36 sps:$4 sm:$0xff]   ;;  %1903 = vmatprep.mubr.bf16.mxu1 %v5548_v30  ;;  %v5568_v40 = vld [vmem:[%s7425_s2 + $0x118] sm:$0xff]   ;;  %v362_v42 = vld [vmem:[%s6115_s24 + $0x14] sm:$0xf] }
  0x55   : > { %4975 = vmatprep.subr.bf16.mxu0 %v5545_v36  ;;  %v5562_v29 = vld [vmem:[%s7425_s2 + $0x1c8] sm:$0xff]   ;;  %v4490_v36 = vld [vmem:[%s6115_s24 + $0x40] sm:$0xf]  ;;  %v363_v43 = vld [vmem:[%s6115_s24 + $0x18] sm:$0xf]  ;;  %v420_v45 = vshll.u32 %v362_v42, 16 }
  0x56   : > { %4944 = vmatpush3.bf16.msra.mxu1 %v5544_v35  ;;  %v413_v31 = vsel %vm6134_vm2, %v408_v25, %v412_v20  ;;  %v5552_v32 = vld [vmem:[#allocation2 + $0x4c] ss:$36 sps:$4 sm:$0xff]   ;;  %v417_v35 = vor.u32 %v416_v24, %v412_v20  ;;  %352 = vst [vmem:[#allocation2 + $0x94] sm:$0xf] %v4490_v36  ;;  %v424_v46 = vshrl.u32 %v362_v42, 16  ;;  %v430_v47 = vshll.u32 %v363_v43, 16 }
  0x57   : > { %1832 = vmatmul.mubr.bf16.vlgmr.msra.gmra.mrb[0].mxu0 %v5541_v59  ;;  %5021 = vmatprep.subr.bf16.mxu1 %v5559_v19  ;;  %v5554_v33 = vld [vmem:[#allocation2 + $0x48] ss:$36 sps:$4 sm:$0xff]   ;;  %476 = vst [vmem:[#allocation2 + $0x74] sm:$0xf] %v413_v31  ;;  %v4499_v44 = vld [vmem:[%s6115_s24 + $0x70] sm:$0xf] }
  0x58   : > { %4976 = vmatpush3.bf16.msra.mxu0 %v5549_v55  ;;  %1839 = vmatprep.mubr.bf16.mxu0 %v5552_v32  ;;  %v5566_v39 = vld [vmem:[%s7425_s2 + $0x188] sm:$0xff]   ;;  %v418_v41 = vrot.slane %v417_v35, 4  ;;  %v434_v48 = vshrl.u32 %v363_v43, 16  ;;  %v4500_v49 = vld [vmem:[%s6115_s24 + $0x74] sm:$0xf]  ;;  %v422_v53 = vrot.slane %v420_v45, 5 }
  0x59   : > { %4977 = vmatprep.subr.bf16.mxu0 %v5550_v58  ;;  %1904 = vmatmul.mubr.bf16.vlgmr.msra.gmra.mrb[0].mxu1 %v5546_v28  ;;  %496 = vst [vmem:[#allocation2 + $0x9c] sm:$0xf] %v4499_v44  ;;  %v5555_v50 = vld [vmem:[#allocation2 + $0x54] ss:$36 sps:$4 sm:$0xff]   ;;  %497 = vst [vmem:[#allocation2 + $0xc0] sm:$0xf] %v4500_v49 }
  0x5a   : > { %5022 = vmatpush3.bf16.msra.mxu1 %v5561_v26  ;;  %v426_v54 = vrot.slane %v424_v46, 4  ;;  %v5572_v55 = vld [vmem:[%s7425_s2 + $0x1d0] sm:$0xff]   ;;  %1911 = vmatprep.mubr.bf16.mxu1 %v5555_v50  ;;  %v432_v57 = vrot.slane %v430_v47, 5  ;;  %v436_v58 = vrot.slane %v434_v48, 4  ;;  %v423_v60 = vsel %vm6134_vm2, %v418_v41, %v422_v53  ;;  %v5575_v2 = vld [vmem:[%s7425_s2 + $0x120] sm:$0xff]   ;;  %v5576_v4 = vld [vmem:[%s7425_s2 + $0x1d8] sm:$0xff]  }
  0x5b   : > { %5023 = vmatprep.subr.bf16.mxu1 %v5562_v29  ;;  %v5567_v59 = vld [vmem:[#allocation2 + $0x90] ss:$36 sps:$4 sm:$0xff]   ;;  %477 = vst [vmem:[#allocation2 + $0x98] sm:$0xf] %v423_v60  ;;  %v326_v5 = vld [vmem:[%s6115_s24 + $0x18] sm:$0xf] }
  0x5c   : > { %4978 = vmatpush3.bf16.msra.mxu0 %v5551_v1  ;;  %v427_v61 = vor.u32 %v426_v54, %v422_v53  ;;  %v5573_v62 = vld [vmem:[%s7425_s2 + $0x190] sm:$0xff]   ;;  %v437_v63 = vor.u32 %v436_v58, %v432_v57  ;;  %v5574_v1 = vld [vmem:[%s7425_s2 + $0x160] sm:$0xff]   ;;  %v327_v7 = vld [vmem:[%s6115_s24 + $0x1c] sm:$0xf]  ;;  %335 = vst [vmem:[#allocation2 + $0xd8] sm:$0xf] %v326_v5 }
  0x5d   : > { %4979 = vmatprep.subr.bf16.mxu0 %v5558_v18  ;;  %v5563_v56 = vld [vmem:[#allocation2 + $0x94] ss:$36 sps:$4 sm:$0xff]   ;;  %v4492_v8 = vld [vmem:[%s6115_s24 + $0x48] sm:$0xf]  ;;  %v4493_v9 = vld [vmem:[%s6115_s24 + $0x4c] sm:$0xf] }
  0x5e   : > { %v5557_v51 = vld [vmem:[#allocation2 + $0x50] ss:$36 sps:$4 sm:$0xff]   ;;  %5024 = vmatpush3.bf16.msra.mxu1 %v5566_v39  ;;  %v428_v0 = vrot.slane %v427_v61, 4  ;;  %v438_v6 = vrot.slane %v437_v63, 4  ;;  %336 = vst [vmem:[#allocation2 + $0xfc] sm:$0xf] %v327_v7 }
  0x5f   : > { %1840 = vmatmul.mubr.bf16.gmra.mrb[4].mxu0 %v5554_v33  ;;  %5025 = vmatprep.subr.bf16.mxu1 %v5572_v55  ;;  %354 = vst [vmem:[#allocation2 + $0xdc] sm:$0xf] %v4492_v8  ;;  %355 = vst [vmem:[#allocation2 + $0x100] sm:$0xf] %v4493_v9  ;;  %v5579_v10 = vld [vmem:[%s7425_s2 + $0x198] sm:$0xff]   ;;  %v5583_v19 = vld [vmem:[%s7425_s2 + $0x168] sm:$0xff]  }
  0x60   : > { %4980 = vmatpush3.bf16.msra.mxu0 %v5560_v21  ;;  %1847 = vmatprep.mubr.bf16.mxu0 %v5563_v56  ;;  %v433_v3 = vsel %vm6134_vm2, %v428_v0, %v432_v57  ;;  %v364_v11 = vld [vmem:[%s6115_s24 + $0x1c] sm:$0xf]  ;;  %v365_v12 = vld [vmem:[%s6115_s24 + $0x20] sm:$0xf]  ;;  %v4501_v13 = vld [vmem:[%s6115_s24 + $0x78] sm:$0xf] }
  0x61   : > { %4981 = vmatprep.subr.bf16.mxu0 %v5565_v38  ;;  %1912 = vmatmul.mubr.bf16.gmra.mrb[4].mxu1 %v5557_v51  ;;  %478 = vst [vmem:[#allocation2 + $0xbc] sm:$0xf] %v433_v3  ;;  %2231 = vst [vmem:[#allocation3] sm:$0xf] %v5883_v14  ;;  %v440_v15 = vshll.u32 %v364_v11, 16  ;;  %v444_v16 = vshrl.u32 %v364_v11, 16 }
  0x62   : > { %5026 = vmatpush3.bf16.msra.mxu1 %v5573_v62  ;;  %2232 = vst [vmem:[#allocation3 + $0x4] sm:$0xf] %v5883_v14  ;;  %2233 = vst [vmem:[#allocation3 + $0x2c] sm:$0xf] %v5883_v14  ;;  %v450_v17 = vshll.u32 %v365_v12, 16  ;;  %v454_v18 = vshrl.u32 %v365_v12, 16 }
  0x63   : > { %5027 = vmatprep.subr.bf16.mxu1 %v5576_v4  ;;  %2234 = vst [vmem:[#allocation3 + $0x30] sm:$0xf] %v5883_v14  ;;  %498 = vst [vmem:[#allocation2 + $0xe4] sm:$0xf] %v4501_v13  ;;  %v4502_v20 = vld [vmem:[%s6115_s24 + $0x7c] sm:$0xf] }
  0x64   : > { %4982 = vmatpush3.bf16.msra.mxu0 %v5568_v40  ;;  %v442_v21 = vrot.slane %v440_v15, 5  ;;  %v446_v22 = vrot.slane %v444_v16, 4  ;;  %v452_v23 = vrot.slane %v450_v17, 5  ;;  %499 = vst [vmem:[#allocation2 + $0x108] sm:$0xf] %v4502_v20  ;;  %v5585_v24 = vld [vmem:[%s7425_s2 + $0x128] sm:$0xff]  }
  0x65   : > { %4983 = vmatprep.subr.bf16.mxu0 %v5574_v1  ;;  %v5569_v25 = vld [vmem:[#allocation2 + $0x9c] ss:$36 sps:$4 sm:$0xff]   ;;  %v456_v29 = vrot.slane %v454_v18, 4  ;;  %v5588_v36 = vld [vmem:[%s7425_s2 + $0x170] sm:$0xff]   ;;  %v5589_v38 = vld [vmem:[%s7425_s2 + $0x1e8] sm:$0xff]   ;;  %s5812_s22 = scalar_lea.vmem %s7372_s17, 576 }
  0x66   : > { %5028 = vmatpush3.bf16.msra.mxu1 %v5579_v10  ;;  %v443_v27 = vsel %vm6134_vm2, %v438_v6, %v442_v21  ;;  %v447_v28 = vor.u32 %v446_v22, %v442_v21  ;;  %v5577_v30 = vld [vmem:[#allocation2 + $0xdc] ss:$36 sps:$4 sm:$0xff]   ;;  %1919 = vmatprep.mubr.bf16.mxu1 %v5569_v25  ;;  %v4494_v40 = vld [vmem:[%s6115_s24 + $0x50] sm:$0xf]  ;;  %v5592_v42 = vld [vmem:[%s7425_s2 + $0x1a8] sm:$0xff]   ;;  %v7435_v6 = vmov 0.0   ;;  %p5813_p6 = scmp.ne.s32.totalorder %s7372_s17, %s5812_s22 }
  0x67   : > { %1848 = vmatmul.mubr.bf16.gmra.mrb[8].mxu0 %v5567_v59  ;;  %479 = vst [vmem:[#allocation2 + $0xe0] sm:$0xf] %v443_v27  ;;  %v5580_v31 = vld [vmem:[#allocation2 + $0xd8] ss:$36 sps:$4 sm:$0xff]   ;;  %v5586_v33 = vld [vmem:[%s7425_s2 + $0x1e0] sm:$0xff]   ;;  %v457_v37 = vor.u32 %v456_v29, %v452_v23  ;;  %v5591_v41 = vld [vmem:[%s7425_s2 + $0x130] sm:$0xff]  }
  0x68   : > { %4984 = vmatpush3.bf16.msra.mxu0 %v5575_v2  ;;  %v5571_v26 = vld [vmem:[#allocation2 + $0x98] ss:$36 sps:$4 sm:$0xff]   ;;  %v448_v32 = vrot.slane %v447_v28, 4  ;;  %1855 = vmatprep.mubr.bf16.mxu0 %v5577_v30  ;;  %v5587_v34 = vld [vmem:[%s7425_s2 + $0x1a0] sm:$0xff]   ;;  %356 = vst [vmem:[#allocation2 + $0x124] sm:$0xf] %v4494_v40  ;;  %p5814_p10 = pnand %p5813_p6, %p7577_p9 }
  0x69   : > { %4985 = vmatprep.subr.bf16.mxu0 %v5583_v19  ;;  %1920 = vmatmul.mubr.bf16.gmra.mrb[8].mxu1 %v5571_v26  ;;  %v328_v39 = vld [vmem:[%s6115_s24 + $0x20] sm:$0xf]  ;;  %v366_v43 = vld [vmem:[%s6115_s24 + $0x24] sm:$0x1]  ;;  %v458_v44 = vrot.slane %v457_v37, 4  ;;  %v5596_v47 = vld [vmem:[%s7425_s2 + $0x1f0] sm:$0xff]  }
  0x6a   : > { %v453_v35 = vsel %vm6134_vm2, %v448_v32, %v452_v23  ;;  %5029 = vmatprep.subr.bf16.mxu1 %v5586_v33  ;;  %337 = vst [vmem:[#allocation2 + $0x120] sm:$0xf] %v328_v39  ;;  %v460_v45 = vshll.u32 %v366_v43, 16  ;;  %v4503_v46 = vld [vmem:[%s6115_s24 + $0x80] sm:$0xf]  ;;  %v5597_v49 = vld [vmem:[%s7425_s2 + $0x178] sm:$0xff]   ;;  %p5815_p12 = pneg %p5814_p10 }
  0x6b   : > { %480 = vst [vmem:[#allocation2 + $0x104] sm:$0xf] %v453_v35  ;;  %5030 = vmatpush3.bf16.msra.mxu1 %v5587_v34  ;;  %500 = vst [vmem:[#allocation2 + $0x12c] sm:$0xf] %v4503_v46  ;;  %v5581_v50 = vld [vmem:[#allocation2 + $0xe4] ss:$36 sps:$4 sm:$0xff]  }
  0x6c   : > { %4986 = vmatpush3.bf16.msra.mxu0 %v5585_v24  ;;  %5031 = vmatprep.subr.bf16.mxu1 %v5589_v38  ;;  %v462_v48 = vrot.slane %v460_v45, 5  ;;  %v5598_v54 = vld [vmem:[%s7425_s2 + $0x1b0] sm:$0xff]   ;;  %v5599_v56 = vld [vmem:[%s7425_s2 + $0x138] sm:$0xff]   ;;  %v4513_v62 = vld [vmem:[%s6115_s24 + $0x60] sm:$0xf] }
  0x6d   : > { %4987 = vmatprep.subr.bf16.mxu0 %v5588_v36  ;;  %1927 = vmatprep.mubr.bf16.mxu1 %v5581_v50  ;;  %v5600_v59 = vld [vmem:[%s7425_s2 + $0x1f8] sm:$0xff]   ;;  %v4504_v60 = vld [vmem:[%s6115_s24 + $0x90] sm:$0xf]  ;;  %v4505_v61 = vld [vmem:[%s6115_s24 + $0x94] sm:$0xf]  ;;  %v531_v1 = vshrl.u32 %v4513_v62, 16 }
  0x6e   : > { %v463_v53 = vsel %vm6134_vm2, %v458_v44, %v462_v48  ;;  %511 = vst [vmem:[#allocation2 + $0x10] sm:$0xf] %v4504_v60  ;;  %v4514_v63 = vld [vmem:[%s6115_s24 + $0x64] sm:$0xf]  ;;  %512 = vst [vmem:[#allocation2 + $0x34] sm:$0xf] %v4505_v61 }
  0x6f   : > { %1856 = vmatmul.mubr.bf16.gmra.mrb[12].mxu0 %v5580_v31  ;;  %5032 = vmatpush3.bf16.msra.mxu1 %v5592_v42  ;;  %481 = vst [vmem:[#allocation2 + $0x128] sm:$0xf] %v463_v53  ;;  %v6279_v0 = vld [vmem:[%s6115_s24 + $0x68] sm:$0xf]  ;;  %v534_v2 = vshll.u32 %v4513_v62, 16  ;;  %v540_v3 = vshll.u32 %v4514_v63, 16 }
  0x70   : > { %4988 = vmatpush3.bf16.msra.mxu0 %v5591_v41  ;;  %5033 = vmatprep.subr.bf16.mxu1 %v5596_v47  ;;  %v544_v4 = vshrl.u32 %v4514_v63, 16  ;;  %v550_v5 = vshll.u32 %v6279_v0, 16  ;;  %v533_v7 = vrot.slane %v531_v1, 4  ;;  %v5604_v11 = vld [vmem:[%s7425_s2 + $0x1b8] sm:$0xff]   ;;  %v554_v13 = vshrl.u32 %v6279_v0, 16 }
  0x71   : > { %4989 = vmatprep.subr.bf16.mxu0 %v5597_v49  ;;  %v995_v55 = vld [vmem:[#allocation2 + $0x120] sm:$0xff]  ;;  %v536_v8 = vrot.slane %v534_v2, 5  ;;  %v542_v9 = vrot.slane %v540_v3, 5  ;;  %v643_v15 = vld [vmem:[%s6115_s24 + $0x8] sm:$0xf] }
  0x72   : > { %v5584_v51 = vld [vmem:[#allocation2 + $0xe0] ss:$36 sps:$4 sm:$0xff]   ;;  %v4572_v57 = vcombine.high %v995_v55, %v995_v55  ;;  %v4571_v58 = vcombine.low %v995_v55, %v995_v55  ;;  %v546_v10 = vrot.slane %v544_v4, 4  ;;  %v6286_v12 = vrot.slane %v550_v5, 5  ;;  %v6292_v19 = vld [vmem:[%s6115_s24 + $0xc] sm:$0xf] }
  0x73   : > { %1928 = vmatmul.mubr.bf16.gmra.mrb[12].mxu1 %v5584_v51  ;;  %v642_v14 = vld [vmem:[%s6115_s24 + $0x4] sm:$0xf]  ;;  %v537_v17 = vor.u32 %v536_v8, %v533_v7  ;;  %v662_v24 = vshll.u32 %v643_v15, 16  ;;  %v666_v25 = vshrl.u32 %v643_v15, 16  ;;  %v4523_v26 = vld [vmem:[%s6115_s24 + $0x34] sm:$0xf] }
  0x74   : > { %5034 = vmatpush3.bf16.msra.mxu1 %v5598_v54  ;;  %4990 = vmatpush3.bf16.msra.mxu0 %v5599_v56  ;;  %v547_v18 = vor.u32 %v546_v10, %v542_v9  ;;  %v653_v20 = vshrl.u32 %v642_v14, 16  ;;  %v656_v21 = vshll.u32 %v642_v14, 16  ;;  %v4524_v27 = vld [vmem:[%s6115_s24 + $0x38] sm:$0xf]  ;;  %v6297_v32 = vld [vmem:[%s6115_s24 + $0x3c] sm:$0xf] }
  0x75   : > { %1863 = vmatprep.mubr.bf16.mxu0 %v4572_v57  ;;  %5035 = vmatprep.subr.bf16.mxu1 %v5600_v59  ;;  %v538_v28 = vrot.slane %v537_v17, 4  ;;  %v664_v33 = vrot.slane %v662_v24, 5  ;;  %v668_v34 = vrot.slane %v666_v25, 4  ;;  %v672_v35 = vshll.u32 %v6292_v19, 16  ;;  %v4506_v49 = vld [vmem:[%s6115_s24 + $0x98] sm:$0xf] }
  0x76   : > { %5290 = vmatprep.subr.bf16.mxu0 %v7435_v6  ;;  %v996_v16 = vld [vmem:[#allocation2 + $0x128] sm:$0xff]  ;;  %v548_v29 = vrot.slane %v547_v18, 4  ;;  %v655_v30 = vrot.slane %v653_v20, 4  ;;  %v658_v31 = vrot.slane %v656_v21, 5  ;;  %v676_v36 = vshrl.u32 %v6292_v19, 16  ;;  %v5608_v8 = vld [vmem:[%s7425_s2 + $0x200] sm:$0xff]  }
  0x77   : > { %1864 = vmatmul.mubr.bf16.gmra.mrb[16].mxu0 %v4571_v58  ;;  %v4574_v22 = vcombine.high %v996_v16, %v996_v16  ;;  %v4573_v23 = vcombine.low %v996_v16, %v996_v16  ;;  %v543_v37 = vsel %vm6134_vm2, %v538_v28, %v542_v9  ;;  %v775_v40 = vshrl.u32 %v4523_v26, 16  ;;  %v4507_v55 = vld [vmem:[%s6115_s24 + $0x9c] sm:$0xf]  ;;  %513 = vst [vmem:[#allocation2 + $0x58] sm:$0xf] %v4506_v49 }
  0x78   : > { %5036 = vmatpush3.bf16.msra.mxu1 %v5604_v11  ;;  %v553_v38 = vsel %vm6134_vm2, %v548_v29, %v6286_v12  ;;  %v659_v39 = vor.u32 %v658_v31, %v655_v30  ;;  %633 = vst [vmem:[#allocation2 + $0x14] sm:$0xf] %v543_v37  ;;  %v669_v41 = vor.u32 %v668_v34, %v664_v33  ;;  %v674_v42 = vrot.slane %v672_v35, 5  ;;  %v4516_v59 = vld [vmem:[%s6115_s24 + $0x6c] sm:$0xf] }
  0x79   : > { %1935 = vmatprep.mubr.bf16.mxu1 %v4574_v22  ;;  %634 = vst [vmem:[#allocation2 + $0x38] sm:$0xf] %v553_v38  ;;  %v778_v43 = vshll.u32 %v4523_v26, 16  ;;  %v784_v44 = vshll.u32 %v4524_v27, 16  ;;  %v777_v46 = vrot.slane %v775_v40, 4  ;;  %v788_v47 = vshrl.u32 %v4524_v27, 16 }
  0x7a   : > { %v660_v45 = vrot.slane %v659_v39, 4  ;;  %v794_v48 = vshll.u32 %v6297_v32, 16  ;;  %v670_v50 = vrot.slane %v669_v41, 4  ;;  %v798_v54 = vshrl.u32 %v6297_v32, 16  ;;  %514 = vst [vmem:[#allocation2 + $0x7c] sm:$0xf] %v4507_v55 }
  0x7b   : > { %1936 = vmatmul.mubr.bf16.gmra.mrb[16].mxu1 %v4573_v23  ;;  %v780_v51 = vrot.slane %v778_v43, 5  ;;  %v786_v53 = vrot.slane %v784_v44, 5  ;;  %v790_v57 = vrot.slane %v788_v47, 4  ;;  %v6316_v60 = vld [vmem:[%s6115_s24 + $0x70] sm:$0xf]  ;;  %v556_v63 = vrot.slane %v554_v13, 4 }
  0x7c   : > { %v665_v56 = vsel %vm6134_vm2, %v660_v45, %v664_v33  ;;  %v6312_v58 = vrot.slane %v794_v48, 5  ;;  %v675_v61 = vsel %vm6134_vm2, %v670_v50, %v674_v42  ;;  %v560_v0 = vshll.u32 %v4516_v59, 16  ;;  %v645_v5 = vld [vmem:[%s6115_s24 + $0x10] sm:$0xf]  ;;  %v6328_v11 = vld [vmem:[%s6115_s24 + $0x14] sm:$0xf] }
  0x7d   : > { %755 = vst [vmem:[#allocation2 + $0x18] sm:$0xf] %v665_v56  ;;  %v781_v62 = vor.u32 %v780_v51, %v777_v46  ;;  %756 = vst [vmem:[#allocation2 + $0x3c] sm:$0xf] %v675_v61  ;;  %v791_v1 = vor.u32 %v790_v57, %v786_v53  ;;  %v564_v2 = vshrl.u32 %v4516_v59, 16  ;;  %v570_v3 = vshll.u32 %v6316_v60, 16 }
  0x7e   : > { %v574_v4 = vshrl.u32 %v6316_v60, 16  ;;  %v557_v9 = vor.u32 %v556_v63, %v6286_v12  ;;  %v562_v10 = vrot.slane %v560_v0, 5  ;;  %v678_v13 = vrot.slane %v676_v36, 4  ;;  %v5601_v14 = vld [vmem:[#allocation2 + $0x10] ss:$36 sps:$4 sm:$0xff]   ;;  %v5609_v33 = vld [vmem:[%s7425_s2 + $0x208] sm:$0xff]  }
  0x7f   : > { %v782_v7 = vrot.slane %v781_v62, 4  ;;  %v792_v15 = vrot.slane %v791_v1, 4  ;;  %v566_v16 = vrot.slane %v564_v2, 4  ;;  %v4526_v17 = vld [vmem:[%s6115_s24 + $0x40] sm:$0xf]  ;;  %v6336_v22 = vrot.slane %v570_v3, 5 }
  0x80   : > { %v6332_v18 = vld [vmem:[%s6115_s24 + $0x44] sm:$0xf]  ;;  %v5603_v19 = vld [vmem:[#allocation2 + $0x14] ss:$36 sps:$4 sm:$0xff]   ;;  %v558_v21 = vrot.slane %v557_v9, 4  ;;  %v679_v12 = vor.u32 %v678_v13, %v674_v42  ;;  %v682_v25 = vshll.u32 %v645_v5, 16 }
  0x81   : > { %v787_v20 = vsel %vm6134_vm2, %v782_v7, %v786_v53  ;;  %v797_v23 = vsel %vm6134_vm2, %v792_v15, %v6312_v58  ;;  %v567_v24 = vor.u32 %v566_v16, %v562_v10  ;;  %v686_v26 = vshrl.u32 %v645_v5, 16  ;;  %v4508_v27 = vld [vmem:[%s6115_s24 + $0xa0] sm:$0xf]  ;;  %1975 = vmatprep.mubr.bf16.mxu0 %v5603_v19  ;;  %v4509_v32 = vld [vmem:[%s6115_s24 + $0xa4] sm:$0xf]  ;;  %v5616_v53 = vld [vmem:[%s7425_s2 + $0x210] sm:$0xff]  }
  0x82   : > { %877 = vst [vmem:[#allocation2 + $0x1c] sm:$0xf] %v787_v20  ;;  %878 = vst [vmem:[#allocation2 + $0x40] sm:$0xf] %v797_v23  ;;  %v563_v28 = vsel %vm6134_vm2, %v558_v21, %v562_v10  ;;  %v680_v29 = vrot.slane %v679_v12, 4  ;;  %v692_v30 = vshll.u32 %v6328_v11, 16  ;;  %1976 = vmatmul.mubr.bf16.vlgmr.msra.gmra.mrb[20].mxu0 %v5601_v14 }
  0x83   : > { %v696_v31 = vshrl.u32 %v6328_v11, 16  ;;  %515 = vst [vmem:[#allocation2 + $0xa0] sm:$0xf] %v4508_v27  ;;  %v568_v34 = vrot.slane %v567_v24, 4  ;;  %635 = vst [vmem:[#allocation2 + $0x5c] sm:$0xf] %v563_v28  ;;  %5291 = vmatpush3.bf16.msra.mxu0 %v5608_v8 }
  0x84   : > { %v684_v35 = vrot.slane %v682_v25, 5  ;;  %v688_v36 = vrot.slane %v686_v26, 4  ;;  %v800_v37 = vrot.slane %v798_v54, 4  ;;  %516 = vst [vmem:[#allocation2 + $0xc4] sm:$0xf] %v4509_v32  ;;  %v6350_v38 = vrot.slane %v692_v30, 5  ;;  %5292 = vmatprep.subr.bf16.mxu0 %v7435_v6 }
  0x85   : > { %v804_v39 = vshll.u32 %v4526_v17, 16  ;;  %v808_v40 = vshrl.u32 %v4526_v17, 16  ;;  %v814_v41 = vshll.u32 %v6332_v18, 16  ;;  %v4518_v42 = vld [vmem:[%s6115_s24 + $0x74] sm:$0xf]  ;;  %v573_v43 = vsel %vm6134_vm2, %v568_v34, %v6336_v22  ;;  %v2168_v14 = vld [vmem:[%s7424_s1] sm:$0xff] }
  0x86   : > { %v685_v44 = vsel %vm6134_vm2, %v680_v29, %v684_v35  ;;  %v689_v45 = vor.u32 %v688_v36, %v684_v35  ;;  %v801_v46 = vor.u32 %v800_v37, %v6312_v58  ;;  %v6362_v47 = vld [vmem:[%s6115_s24 + $0x78] sm:$0xf]  ;;  %636 = vst [vmem:[#allocation2 + $0x80] sm:$0xf] %v573_v43  ;;  %v818_v51 = vshrl.u32 %v6332_v18, 16  ;;  %2179 = vperm.xlu0 %5508, %v2168_v14   ;;  %v2169_v24 = vld [vmem:[%s7424_s1 + $0x8] sm:$0xff] }
  0x87   : > { %757 = vst [vmem:[#allocation2 + $0x60] sm:$0xf] %v685_v44  ;;  %v806_v48 = vrot.slane %v804_v39, 5  ;;  %v810_v49 = vrot.slane %v808_v40, 4  ;;  %v6364_v50 = vrot.slane %v814_v41, 5  ;;  %v576_v56 = vrot.slane %v574_v4, 4  ;;  %5293 = vmatpush3.bf16.msra.mxu0 %v5609_v33 }
  0x88   : > { %v690_v54 = vrot.slane %v689_v45, 4  ;;  %v802_v55 = vrot.slane %v801_v46, 4  ;;  %v580_v57 = vshll.u32 %v4518_v42, 16  ;;  %v647_v58 = vld [vmem:[%s6115_s24 + $0x18] sm:$0xf]  ;;  %v584_v60 = vshrl.u32 %v4518_v42, 16  ;;  %5294 = vmatprep.subr.bf16.mxu0 %v7435_v6 }
  0x89   : > { %v811_v59 = vor.u32 %v810_v49, %v806_v48  ;;  %v590_v61 = vshll.u32 %v6362_v47, 16  ;;  %v594_v62 = vshrl.u32 %v6362_v47, 16  ;;  %v6374_v63 = vld [vmem:[%s6115_s24 + $0x1c] sm:$0xf]  ;;  %v577_v4 = vor.u32 %v576_v56, %v6336_v22  ;;  %v4528_v11 = vld [vmem:[%s6115_s24 + $0x48] sm:$0xf] }
  0x8a   : > { %v5605_v0 = vld [vmem:[#allocation2 + $0x18] ss:$36 sps:$4 sm:$0xff]   ;;  %v695_v2 = vsel %vm6134_vm2, %v690_v54, %v6350_v38  ;;  %v807_v3 = vsel %vm6134_vm2, %v802_v55, %v806_v48  ;;  %v582_v5 = vrot.slane %v580_v57, 5  ;;  %v586_v8 = vrot.slane %v584_v60, 4  ;;  %v6387_v13 = vld [vmem:[%s6115_s24 + $0x4c] sm:$0xf]  ;;  %2184 = vperm.xlu0 %5508, %v2169_v24  }
  0x8b   : > { %v5607_v1 = vld [vmem:[#allocation2 + $0x1c] ss:$36 sps:$4 sm:$0xff]   ;;  %758 = vst [vmem:[#allocation2 + $0x84] sm:$0xf] %v695_v2  ;;  %v812_v7 = vrot.slane %v811_v59, 4  ;;  %v6383_v9 = vrot.slane %v590_v61, 5  ;;  %5295 = vmatpush3.bf16.msra.mxu0 %v5616_v53 }
  0x8c   : > { %879 = vst [vmem:[#allocation2 + $0x64] sm:$0xf] %v807_v3  ;;  %v698_v10 = vrot.slane %v696_v31, 4  ;;  %2047 = vmatprep.mubr.bf16.mxu1 %v5607_v1  ;;  %v578_v15 = vrot.slane %v577_v4, 4  ;;  %v5620_v16 = vld [vmem:[%s7425_s2 + $0x218] sm:$0xff]   ;;  %v702_v17 = vshll.u32 %v647_v58, 16  ;;  %v587_v21 = vor.u32 %v586_v8, %v582_v5  ;;  %5296 = vmatprep.subr.bf16.mxu0 %v7435_v6 }
  0x8d   : > { %v706_v18 = vshrl.u32 %v647_v58, 16  ;;  %v712_v19 = vshll.u32 %v6374_v63, 16  ;;  %2048 = vmatmul.mubr.bf16.vlgmr.msra.gmra.mrb[20].mxu1 %v5605_v0  ;;  %v817_v20 = vsel %vm6134_vm2, %v812_v7, %v6364_v50  ;;  %v716_v12 = vshrl.u32 %v6374_v63, 16  ;;  %v4510_v23 = vld [vmem:[%s6115_s24 + $0xa8] sm:$0xf]  ;;  %v2172_v44 = vld [vmem:[%s7424_s1 + $0x20] sm:$0xff] }
  0x8e   : > { %v699_v22 = vor.u32 %v698_v10, %v6350_v38  ;;  %v5610_v25 = vld [vmem:[#allocation2 + $0x5c] ss:$36 sps:$4 sm:$0xff]   ;;  %880 = vst [vmem:[#allocation2 + $0x88] sm:$0xf] %v817_v20  ;;  %v583_v27 = vsel %vm6134_vm2, %v578_v15, %v582_v5  ;;  %v704_v28 = vrot.slane %v702_v17, 5  ;;  %v588_v29 = vrot.slane %v587_v21, 4  ;;  %2199 = vperm.xlu0 %5508, %v2172_v44  }
  0x8f   : > { %v5612_v26 = vld [vmem:[#allocation2 + $0x58] ss:$36 sps:$4 sm:$0xff]   ;;  %517 = vst [vmem:[#allocation2 + $0xe8] sm:$0xf] %v4510_v23  ;;  %637 = vst [vmem:[#allocation2 + $0xa4] sm:$0xf] %v583_v27  ;;  %1983 = vmatprep.mubr.bf16.mxu0 %v5610_v25  ;;  %5297 = vmatpush3.bf16.msra.mxu0 %v5620_v16 }
  0x90   : > { %v700_v30 = vrot.slane %v699_v22, 4  ;;  %v708_v31 = vrot.slane %v706_v18, 4  ;;  %v6408_v32 = vrot.slane %v712_v19, 5  ;;  %v4511_v33 = vld [vmem:[%s6115_s24 + $0xac] sm:$0xf]  ;;  %v820_v34 = vrot.slane %v818_v51, 4  ;;  %1984 = vmatmul.mubr.bf16.gmra.mrb[24].mxu0 %v5612_v26  ;;  %5298 = vmatprep.subr.bf16.mxu0 %v7435_v6 }
  0x91   : > { %v824_v35 = vshll.u32 %v4528_v11, 16  ;;  %v828_v36 = vshrl.u32 %v4528_v11, 16  ;;  %v834_v37 = vshll.u32 %v6387_v13, 16  ;;  %518 = vst [vmem:[#allocation2 + $0x10c] sm:$0xf] %v4511_v33  ;;  %v593_v39 = vsel %vm6134_vm2, %v588_v29, %v6383_v9  ;;  %v5624_v51 = vld [vmem:[%s7425_s2 + $0x220] sm:$0xff]  }
  0x92   : > { %v4520_v38 = vld [vmem:[%s6115_s24 + $0x7c] sm:$0xf]  ;;  %v705_v40 = vsel %vm6134_vm2, %v700_v30, %v704_v28  ;;  %v709_v41 = vor.u32 %v708_v31, %v704_v28  ;;  %v838_v42 = vshrl.u32 %v6387_v13, 16  ;;  %v6420_v43 = vld [vmem:[%s6115_s24 + $0x80] sm:$0xf]  ;;  %v821_v45 = vor.u32 %v820_v34, %v6364_v50  ;;  %v5631_v0 = vld [vmem:[%s7425_s2 + $0x228] sm:$0xff]  }
  0x93   : > { %638 = vst [vmem:[#allocation2 + $0xc8] sm:$0xf] %v593_v39  ;;  %759 = vst [vmem:[#allocation2 + $0xa8] sm:$0xf] %v705_v40  ;;  %v826_v46 = vrot.slane %v824_v35, 5  ;;  %v830_v48 = vrot.slane %v828_v36, 4  ;;  %5299 = vmatpush3.bf16.msra.mxu0 %v5624_v51 }
  0x94   : > { %v6426_v49 = vrot.slane %v834_v37, 5  ;;  %v710_v53 = vrot.slane %v709_v41, 4  ;;  %v596_v54 = vrot.slane %v594_v62, 4  ;;  %v600_v55 = vshll.u32 %v4520_v38, 16  ;;  %v649_v57 = vld [vmem:[%s6115_s24 + $0x20] sm:$0xf]  ;;  %5300 = vmatprep.subr.bf16.mxu0 %v7435_v6 }
  0x95   : > { %v604_v56 = vshrl.u32 %v4520_v38, 16  ;;  %v822_v58 = vrot.slane %v821_v45, 4  ;;  %v831_v59 = vor.u32 %v830_v48, %v826_v46  ;;  %v610_v50 = vshll.u32 %v6420_v43, 16  ;;  %v6438_v61 = vld [vmem:[%s6115_s24 + $0x24] sm:$0xf]  ;;  %v2170_v47 = vld [vmem:[%s7424_s1 + $0x10] sm:$0xff] }
  0x96   : > { %v614_v60 = vshrl.u32 %v6420_v43, 16  ;;  %v5613_v62 = vld [vmem:[#allocation2 + $0x64] ss:$36 sps:$4 sm:$0xff]   ;;  %v715_v2 = vsel %vm6134_vm2, %v710_v53, %v6408_v32  ;;  %v597_v3 = vor.u32 %v596_v54, %v6383_v9  ;;  %v602_v4 = vrot.slane %v600_v55, 5  ;;  %2189 = vperm.xlu1 %5509, %v2170_v47   ;;  %v4530_v11 = vld [vmem:[%s6115_s24 + $0x50] sm:$0xf] }
  0x97   : > { %v5615_v1 = vld [vmem:[#allocation2 + $0x60] ss:$36 sps:$4 sm:$0xff]   ;;  %760 = vst [vmem:[#allocation2 + $0xcc] sm:$0xf] %v715_v2  ;;  %v827_v5 = vsel %vm6134_vm2, %v822_v58, %v826_v46  ;;  %v832_v7 = vrot.slane %v831_v59, 4  ;;  %v606_v8 = vrot.slane %v604_v56, 4  ;;  %2055 = vmatprep.mubr.bf16.mxu1 %v5613_v62  ;;  %5301 = vmatpush3.bf16.msra.mxu0 %v5631_v0 }
  0x98   : > { %v6452_v10 = vrot.slane %v610_v50, 5  ;;  %881 = vst [vmem:[#allocation2 + $0xac] sm:$0xf] %v827_v5  ;;  %v598_v14 = vrot.slane %v597_v3, 4  ;;  %v718_v9 = vrot.slane %v716_v12, 4  ;;  %v722_v15 = vshll.u32 %v649_v57, 16  ;;  %2056 = vmatmul.mubr.bf16.gmra.mrb[24].mxu1 %v5615_v1  ;;  %5302 = vmatprep.subr.bf16.mxu0 %v7435_v6 }
  0x99   : > { %v726_v16 = vshrl.u32 %v649_v57, 16  ;;  %v837_v17 = vsel %vm6134_vm2, %v832_v7, %v6426_v49  ;;  %v607_v18 = vor.u32 %v606_v8, %v602_v4  ;;  %v732_v19 = vshll.u32 %v6438_v61, 16  ;;  %v4531_v21 = vld [vmem:[%s6115_s24 + $0x54] sm:$0xf]  ;;  %v4512_v22 = vld [vmem:[%s6115_s24 + $0xb0] sm:$0xf] }
  0x9a   : > { %v736_v20 = vshrl.u32 %v6438_v61, 16  ;;  %v5633_v63 = vld [vmem:[%s7425_s2 + $0x230] sm:$0xff]   ;;  %v5617_v12 = vld [vmem:[#allocation2 + $0xa4] ss:$36 sps:$4 sm:$0xff]   ;;  %882 = vst [vmem:[#allocation2 + $0xd0] sm:$0xf] %v837_v17  ;;  %v603_v24 = vsel %vm6134_vm2, %v598_v14, %v602_v4  ;;  %v719_v25 = vor.u32 %v718_v9, %v6408_v32 }
  0x9b   : > { %v5619_v23 = vld [vmem:[#allocation2 + $0xa0] ss:$36 sps:$4 sm:$0xff]   ;;  %v724_v26 = vrot.slane %v722_v15, 5  ;;  %519 = vst [vmem:[#allocation2 + $0x130] sm:$0xf] %v4512_v22  ;;  %v608_v28 = vrot.slane %v607_v18, 4  ;;  %1991 = vmatprep.mubr.bf16.mxu0 %v5617_v12  ;;  %5303 = vmatpush3.bf16.msra.mxu0 %v5633_v63 }
  0x9c   : > { %v4522_v27 = vld [vmem:[%s6115_s24 + $0x84] sm:$0x1]  ;;  %639 = vst [vmem:[#allocation2 + $0xec] sm:$0xf] %v603_v24  ;;  %v728_v29 = vrot.slane %v726_v16, 4  ;;  %v734_v30 = vrot.slane %v732_v19, 5  ;;  %1992 = vmatmul.mubr.bf16.gmra.mrb[28].mxu0 %v5619_v23  ;;  %5304 = vmatprep.subr.bf16.mxu0 %v7435_v6 }
  0x9d   : > { %v840_v31 = vrot.slane %v838_v42, 4  ;;  %v720_v33 = vrot.slane %v719_v25, 4  ;;  %v844_v34 = vshll.u32 %v4530_v11, 16  ;;  %v848_v35 = vshrl.u32 %v4530_v11, 16  ;;  %v651_v13 = vld [vmem:[%s6115_s24 + $0x28] sm:$0x1] }
  0x9e   : > { %v854_v36 = vshll.u32 %v4531_v21, 16  ;;  %v613_v32 = vsel %vm6134_vm2, %v608_v28, %v6452_v10  ;;  %v729_v37 = vor.u32 %v728_v29, %v724_v26  ;;  %v858_v39 = vshrl.u32 %v4531_v21, 16  ;;  %v5637_v40 = vld [vmem:[%s7425_s2 + $0x238] sm:$0xff]   ;;  %v2174_v41 = vld [vmem:[%s7424_s1 + $0x30] sm:$0xff]  ;;  %v2176_v56 = vld [vmem:[%s7424_s1 + $0x40] sm:$0xff] }
  0x9f   : > { %v841_v38 = vor.u32 %v840_v31, %v6426_v49  ;;  %640 = vst [vmem:[#allocation2 + $0x110] sm:$0xf] %v613_v32  ;;  %v725_v42 = vsel %vm6134_vm2, %v720_v33, %v724_v26  ;;  %v846_v44 = vrot.slane %v844_v34, 5  ;;  %v850_v45 = vrot.slane %v848_v35, 4  ;;  %v4532_v48 = vld [vmem:[%s6115_s24 + $0x58] sm:$0x1]  ;;  %2209 = vperm.xlu0 %5508, %v2174_v41   ;;  %5305 = vmatpush3.bf16.msra.mxu0 %v5637_v40 }
  0xa0   : > { %v856_v46 = vrot.slane %v854_v36, 5  ;;  %v2171_v49 = vld [vmem:[%s7424_s1 + $0x18] sm:$0xff]  ;;  %v730_v51 = vrot.slane %v729_v37, 4  ;;  %761 = vst [vmem:[#allocation2 + $0xf0] sm:$0xf] %v725_v42  ;;  %v616_v54 = vrot.slane %v614_v60, 4 }
  0xa1   : > { %v842_v53 = vrot.slane %v841_v38, 4  ;;  %v620_v55 = vshll.u32 %v4522_v27, 16  ;;  %2194 = vperm.xlu1 %5509, %v2171_v49   ;;  %v851_v57 = vor.u32 %v850_v45, %v846_v44  ;;  %v738_v58 = vrot.slane %v736_v20, 4  ;;  %v2173_v61 = vld [vmem:[%s7424_s1 + $0x28] sm:$0xff]  ;;  %v886_v7 = vld [vmem:[%s6115_s24 + $0x4] sm:$0xe] }
  0xa2   : > { %v742_v59 = vshll.u32 %v651_v13, 16  ;;  %v860_v50 = vrot.slane %v858_v39, 4  ;;  %v5621_v43 = vld [vmem:[#allocation2 + $0xac] ss:$36 sps:$4 sm:$0xff]   ;;  %v735_v0 = vsel %vm6134_vm2, %v730_v51, %v734_v30  ;;  %v617_v62 = vor.u32 %v616_v54, %v6452_v10  ;;  %v887_v14 = vld [vmem:[%s6115_s24 + $0x8] sm:$0xf] }
  0xa3   : > { %v5623_v60 = vld [vmem:[#allocation2 + $0xa8] ss:$36 sps:$4 sm:$0xff]   ;;  %v847_v47 = vsel %vm6134_vm2, %v842_v53, %v846_v44  ;;  %v622_v1 = vrot.slane %v620_v55, 5  ;;  %762 = vst [vmem:[#allocation2 + $0x114] sm:$0xf] %v735_v0  ;;  %v852_v2 = vrot.slane %v851_v57, 4  ;;  %v739_v3 = vor.u32 %v738_v58, %v734_v30  ;;  %2219 = vperm.xlu0 %5508, %v2176_v56   ;;  %2063 = vmatprep.mubr.bf16.mxu1 %v5621_v43 }
  0xa4   : > { %883 = vst [vmem:[#allocation2 + $0xf4] sm:$0xf] %v847_v47  ;;  %v744_v4 = vrot.slane %v742_v59, 5  ;;  %v861_v5 = vor.u32 %v860_v50, %v856_v46  ;;  %v618_v8 = vrot.slane %v617_v62, 4  ;;  %v864_v11 = vshll.u32 %v4532_v48, 16  ;;  %2064 = vmatmul.mubr.bf16.gmra.mrb[28].mxu1 %v5623_v60  ;;  %v2175_v20 = vld [vmem:[%s7424_s1 + $0x38] sm:$0xff] }
  0xa5   : > { %v888_v9 = vld [vmem:[%s6115_s24 + $0xc] sm:$0xf]  ;;  %v857_v10 = vsel %vm6134_vm2, %v852_v2, %v856_v46  ;;  %v740_v15 = vrot.slane %v739_v3, 4  ;;  %v4533_v18 = vrot.slane %v886_v7, 9  ;;  %v889_v19 = vld [vmem:[%s6115_s24 + $0x10] sm:$0xf]  ;;  %2204 = vperm.xlu1 %5509, %v2173_v61  }
  0xa6   : > { %v862_v16 = vrot.slane %v861_v5, 4  ;;  %v5625_v21 = vld [vmem:[#allocation2 + $0xec] ss:$36 sps:$4 sm:$0xff]   ;;  %884 = vst [vmem:[#allocation2 + $0x118] sm:$0xf] %v857_v10  ;;  %v623_v63 = vsel %vm6134_vm2, %v618_v8, %v622_v1  ;;  %v866_v12 = vrot.slane %v864_v11, 5 }
  0xa7   : > { %v5627_v22 = vld [vmem:[#allocation2 + $0xe8] ss:$36 sps:$4 sm:$0xff]   ;;  %641 = vst [vmem:[#allocation2 + $0x134] sm:$0xf] %v623_v63  ;;  %v745_v23 = vsel %vm6134_vm2, %v740_v15, %v744_v4  ;;  %v911_v24 = vrot.slane %v887_v14, 5  ;;  %v914_v25 = vrot.slane %v888_v9, 5  ;;  %1999 = vmatprep.mubr.bf16.mxu0 %v5625_v21 }
  0xa8   : > { %v890_v26 = vld [vmem:[%s6115_s24 + $0x14] sm:$0xf]  ;;  %v917_v27 = vrot.slane %v889_v19, 5  ;;  %763 = vst [vmem:[#allocation2 + $0x138] sm:$0xf] %v745_v23  ;;  %v867_v28 = vsel %vm6134_vm2, %v862_v16, %v866_v12  ;;  %2000 = vmatmul.mubr.bf16.gmra.mrb[32].mxu0 %v5627_v22  ;;  %v5643_v8 = vld [vmem:[#allocation5 + $0x40] sm:$0xff]  }
  0xa9   : > { %v920_v29 = vrot.slane %v890_v26, 5  ;;  %v891_v30 = vld [vmem:[%s6115_s24 + $0x18] sm:$0xf]  ;;  %v892_v31 = vld [vmem:[%s6115_s24 + $0x1c] sm:$0xf]  ;;  %v912_v33 = vsel %vm6513_vm5, %v4533_v18, %v911_v24  ;;  %v913_v34 = vrot.slane %v911_v24, 4  ;;  %2214 = vperm.xlu1 %5509, %v2175_v20   ;;  %5080 = vmatprep.subr.bf16.mxu1 %v5643_v8 }
  0xaa   : > { %885 = vst [vmem:[#allocation2 + $0x13c] sm:$0xf] %v867_v28  ;;  %v916_v35 = vrot.slane %v914_v25, 4  ;;  %v919_v36 = vrot.slane %v917_v27, 4  ;;  %v893_v32 = vld [vmem:[%s6115_s24 + $0x20] sm:$0xf] }
  0xab   : > { %946 = vst [vmem:[#allocation2 + $0x20] sm:$0xf] %v912_v33  ;;  %v922_v37 = vrot.slane %v920_v29, 4  ;;  %v923_v38 = vrot.slane %v891_v30, 5  ;;  %v926_v39 = vrot.slane %v892_v31, 5  ;;  %v915_v40 = vsel %vm6513_vm5, %v913_v34, %v914_v25  ;;  %v5644_v11 = vld [vmem:[#allocation5] sm:$0xff]  }
  0xac   : > { %v894_v13 = vld [vmem:[%s6115_s24 + $0x24] sm:$0xf]  ;;  %v918_v41 = vsel %vm6513_vm5, %v916_v35, %v917_v27  ;;  %v921_v42 = vsel %vm6513_vm5, %v919_v36, %v920_v29  ;;  %v929_v44 = vrot.slane %v893_v32, 5  ;;  %v895_v45 = vld [vmem:[%s6115_s24 + $0x28] sm:$0x1]  ;;  %5081 = vmatpush3.bf16.msra.mxu1 %v5644_v11  ;;  %v5647_v18 = vld [vmem:[#allocation5 + $0xc0] sm:$0xff]  }
  0xad   : > { %947 = vst [vmem:[#allocation2 + $0x44] sm:$0xf] %v915_v40  ;;  %948 = vst [vmem:[#allocation2 + $0x68] sm:$0xf] %v918_v41  ;;  %v924_v46 = vsel %vm6513_vm5, %v922_v37, %v923_v38  ;;  %v925_v48 = vrot.slane %v923_v38, 4  ;;  %v928_v49 = vrot.slane %v926_v39, 4  ;;  %5126 = vmatprep.subr.bf16.mxu0 %v5647_v18 }
  0xae   : > { %949 = vst [vmem:[#allocation2 + $0x8c] sm:$0xf] %v921_v42  ;;  %v932_v51 = vrot.slane %v894_v13, 5  ;;  %v5628_v53 = vld [vmem:[#allocation2 + $0xf4] ss:$36 sps:$4 sm:$0xff]   ;;  %v931_v55 = vrot.slane %v929_v44, 4 }
  0xaf   : > { %v5630_v54 = vld [vmem:[#allocation2 + $0xf0] ss:$36 sps:$4 sm:$0xff]   ;;  %950 = vst [vmem:[#allocation2 + $0xb0] sm:$0xf] %v924_v46  ;;  %v927_v57 = vsel %vm6513_vm5, %v925_v48, %v926_v39  ;;  %v930_v58 = vsel %vm6513_vm5, %v928_v49, %v929_v44  ;;  %v935_v50 = vrot.slane %v895_v45, 5  ;;  %2071 = vmatprep.mubr.bf16.mxu1 %v5628_v53  ;;  %v5648_v20 = vld [vmem:[#allocation5 + $0x80] sm:$0xff]  }
  0xb0   : > { %v997_v56 = vld [vmem:[#allocation2 + $0x130] sm:$0xff]  ;;  %v934_v59 = vrot.slane %v932_v51, 4  ;;  %951 = vst [vmem:[#allocation2 + $0xd4] sm:$0xf] %v927_v57  ;;  %v933_v60 = vsel %vm6513_vm5, %v931_v55, %v932_v51  ;;  %952 = vst [vmem:[#allocation2 + $0xf8] sm:$0xf] %v930_v58  ;;  %2072 = vmatmul.mubr.bf16.gmra.mrb[32].mxu1 %v5630_v54 }
  0xb1   : > { %v4576_v61 = vcombine.high %v997_v56, %v997_v56  ;;  %v4575_v43 = vcombine.low %v997_v56, %v997_v56  ;;  %v998_v0 = vld [vmem:[#allocation2 + $0x138] sm:$0xff]  ;;  %953 = vst [vmem:[#allocation2 + $0x11c] sm:$0xf] %v933_v60  ;;  %v5645_v21 = vld [vmem:[#allocation5 + $0x48] sm:$0xff]   ;;  %v6564_v12 = vld [vmem:[%s7426_s3] ss:$0 sm:$0xff] }
  0xb2   : > { %v936_v47 = vsel %vm6513_vm5, %v934_v59, %v935_v50  ;;  %v4578_v62 = vcombine.high %v998_v0, %v998_v0  ;;  %v4577_v1 = vcombine.low %v998_v0, %v998_v0  ;;  %v5651_v22 = vld [vmem:[#allocation5 + $0xc8] sm:$0xff]   ;;  %5082 = vmatprep.subr.bf16.mxu1 %v5645_v21  ;;  %v5649_v24 = vld [vmem:[#allocation5 + $0x50] sm:$0xff]   ;;  %v5653_v42 = vld [vmem:[#allocation5 + $0x58] sm:$0xff]  }
  0xb3   : > { %2007 = vmatprep.mubr.bf16.mxu0 %v4576_v61  ;;  %954 = vst [vmem:[#allocation2 + $0x140] sm:$0xf] %v936_v47  ;;  %v5646_v63 = vld [vmem:[#allocation5 + $0x8] sm:$0xff]   ;;  %v5650_v27 = vld [vmem:[#allocation5 + $0x10] sm:$0xff]   ;;  %v5654_v45 = vld [vmem:[#allocation5 + $0x18] sm:$0xff]  }
  0xb4   : > { %2008 = vmatmul.mubr.bf16.gmra.mrb[36].mxu0 %v4575_v43  ;;  %2079 = vmatprep.mubr.bf16.mxu1 %v4578_v62  ;;  %v5638_v2 = vld [vmem:[#allocation2 + $0x20] ss:$36 sps:$4 sm:$0xff]   ;;  %v5655_v30 = vld [vmem:[#allocation5 + $0xd0] sm:$0xff]   ;;  %v5658_v47 = vld [vmem:[#allocation5 + $0xd8] sm:$0xff]  }
  0xb5   : > { %5306 = vmatprep.mubr.msk.bf16.mxu0 %vm5885_vm6, %v7435_v6  ;;  %v5639_v3 = vld [vmem:[#allocation2 + $0x68] ss:$36 sps:$4 sm:$0xff]   ;;  %5083 = vmatpush3.bf16.msra.mxu1 %v5646_v63  ;;  %v5657_v62 = vld [vmem:[#allocation5 + $0x60] sm:$0xff]  }
  0xb6   : > { %v5652_v23 = vld [vmem:[#allocation5 + $0x88] sm:$0xff]   ;;  %5084 = vmatprep.subr.bf16.mxu1 %v5649_v24  ;;  %v5656_v36 = vld [vmem:[#allocation5 + $0x90] sm:$0xff]   ;;  %v5663_v63 = vld [vmem:[#allocation5 + $0xa0] sm:$0xff]  }
  0xb7   : > { %v5640_v4 = vld [vmem:[#allocation2 + $0xb0] ss:$36 sps:$4 sm:$0xff]   ;;  %v2351_v24 = vld [vmem:[#allocation3 + $0x4] sm:$0xf] }
  0xb8   : > { %2080 = vmatmul.mubr.bf16.gmra.mrb[36].mxu1 %v4577_v1  ;;  %v5641_v5 = vld [vmem:[#allocation2 + $0xf8] ss:$36 sps:$4 sm:$0xff]  }
  0xb9   : > { %5085 = vmatpush3.bf16.msra.mxu1 %v5650_v27  ;;  %v6584_v27 = vld [vmem:[#allocation3 + $0x4] sm:$0xf] }
  0xba   : > { %v5642_v7 = vld [vmem:[#allocation2 + $0x140] ss:$0 sps:$4 sm:$0xff]   ;;  %5086 = vmatprep.subr.bf16.mxu1 %v5653_v42 }
  0xbc   : > { %5307 = vmatmul.mubr.bf16.vlgmr.msra.gmra.mrb[40].mxu0 %v5638_v2 }
  0xbd   : > { %5310 = vmatprep.mubr.msk.bf16.mxu0 %vm5885_vm6, %v7435_v6  ;;  %5127 = vmatpush3.bf16.msra.mxu0 %v5648_v20  ;;  %v5661_v20 = vld [vmem:[#allocation5 + $0xe0] sm:$0xff]  }
  0xbe   : > { %5128 = vmatprep.subr.bf16.mxu0 %v5651_v22  ;;  %5087 = vmatpush3.bf16.msra.mxu1 %v5654_v45  ;;  %v5659_v22 = vld [vmem:[#allocation5 + $0x20] sm:$0xff]  }
  0xbf   : > { %5088 = vmatprep.subr.bf16.mxu1 %v5657_v62  ;;  %v5670_v62 = vld [vmem:[#allocation5 + $0xb0] sm:$0xff]  }
  0xc1   : > { %5129 = vmatpush3.bf16.msra.mxu0 %v5652_v23 }
  0xc2   : > { %5130 = vmatprep.subr.bf16.mxu0 %v5655_v30  ;;  %5089 = vmatpush3.bf16.msra.mxu1 %v5659_v22  ;;  %v2350_v30 = vld [vmem:[#allocation3] sm:$0x8] }
  0xc4   : > { %5311 = vmatmul.mubr.bf16.gmra.mrb[44].mxu0 %v5639_v3 }
  0xc5   : > { %5314 = vmatprep.mubr.msk.bf16.mxu0 %vm5885_vm6, %v7435_v6  ;;  %5131 = vmatpush3.bf16.msra.mxu0 %v5656_v36  ;;  %v2281_v36 = vld [vmem:[#allocation3] sm:$0x8] }
  0xc6   : > { %5132 = vmatprep.subr.bf16.mxu0 %v5658_v47  ;;  %v5668_v47 = vld [vmem:[#allocation5 + $0x30] sm:$0xff]  }
  0xcc   : > { %5315 = vmatmul.mubr.bf16.gmra.mrb[48].mxu0 %v5640_v4 }
  0xcd   : > { %5318 = vmatprep.mubr.msk.bf16.mxu0 %vm5885_vm6, %v7435_v6 }
  0xd4   : > { %5319 = vmatmul.mubr.bf16.gmra.mrb[52].mxu0 %v5641_v5  ;;  %v5660_v5 = vld [vmem:[#allocation5 + $0x98] sm:$0xff]  }
  0xd5   : > { %5322 = vmatprep.mubr.msk.bf16.mxu0 %vm5885_vm6, %v7435_v6  ;;  %5133 = vmatpush3.bf16.msra.mxu0 %v5660_v5  ;;  %v5671_v5 = vld [vmem:[#allocation5 + $0x78] sm:$0xff]  }
  0xd6   : > { %5134 = vmatprep.subr.bf16.mxu0 %v5661_v20 }
  0xd9   : > { %5135 = vmatpush3.bf16.msra.mxu0 %v5663_v63 }
  0xdc   : > { %5323 = vmatmul.mubr.bf16.gmra.mrb[56].mxu0 %v5642_v7 }
 0x12a   : > { %v4899_v14 = vpop.f32.mrb[0].mxu0 }
 0x12b   : > { %v4900_v9 = vpop.f32.mrb[1].mxu0 }
 0x12c   : > { %v4901_v10 = vadd.f32 %v4900_v9, %v4899_v14  ;;  %v4902_v15 = vpop.f32.mrb[2].mxu0  ;;  %v4945_v26 = vpop.f32.mrb[0].mxu1 }
 0x12d   : > { %v4903_v16 = vpop.f32.mrb[3].mxu0  ;;  %v4946_v28 = vpop.f32.mrb[1].mxu1 }
 0x12e   : > { %v4904_v19 = vadd.f32 %v4903_v16, %v4902_v15  ;;  %v1834_v25 = vadd.f32 %v4901_v10, %v6564_v12  ;;  %v4947_v33 = vadd.f32 %v4946_v28, %v4945_v26  ;;  %v4948_v34 = vpop.f32.mrb[2].mxu1  ;;  %v5665_v26 = vld [vmem:[#allocation5 + $0xe8] sm:$0xff]   ;;  %v2369_v28 = vshrl.u32 %v2351_v24, 16 }
 0x12f   : > { %v4949_v32 = vpop.f32.mrb[3].mxu1  ;;  %5136 = vmatprep.subr.bf16.mxu0 %v5665_v26 }
 0x130   : > { %v1837_v31 = vadd.f32 %v4904_v19, %v6564_v12  ;;  %v6568_v39 = vadd.f32 %v4947_v33, %v1834_v25  ;;  %v4950_v13 = vadd.f32 %v4949_v32, %v4948_v34  ;;  %v5662_v25 = vld [vmem:[#allocation5 + $0x68] sm:$0xff]   ;;  %v6586_v33 = vrot.slane %v2369_v28, 7 }
 0x131   : > { %5090 = vmatprep.subr.bf16.mxu1 %v5662_v25  ;;  %v2372_v34 = vshll.u32 %v2351_v24, 16  ;;  %v2306_v32 = vrot.slane %v6584_v27, 7 }
 0x132   : > { %v4905_v29 = vpop.f32.mrb[4].mxu0  ;;  %v6570_v44 = vadd.f32 %v4950_v13, %v1837_v31  ;;  %v2364_v31 = vshrl.u32 %v2350_v30, 16  ;;  %v4661_v13 = vrot.slane %v2281_v36, 11 }
 0x133   : > { %v4906_v35 = vpop.f32.mrb[5].mxu0 }
 0x134   : > { %v4907_v37 = vadd.f32 %v4906_v35, %v4905_v29  ;;  %v4908_v38 = vpop.f32.mrb[6].mxu0  ;;  %v4951_v48 = vpop.f32.mrb[4].mxu1  ;;  %v5664_v29 = vld [vmem:[#allocation5 + $0x28] sm:$0xff]  }
 0x135   : > { %v4909_v40 = vpop.f32.mrb[7].mxu0  ;;  %v4952_v49 = vpop.f32.mrb[5].mxu1  ;;  %5091 = vmatpush3.bf16.msra.mxu1 %v5664_v29 }
 0x136   : > { %v4910_v41 = vadd.f32 %v4909_v40, %v4908_v38  ;;  %v1842_v46 = vadd.f32 %v4907_v37, %v6564_v12  ;;  %v4953_v53 = vadd.f32 %v4952_v49, %v4951_v48  ;;  %v4954_v54 = vpop.f32.mrb[6].mxu1  ;;  %v5666_v38 = vld [vmem:[#allocation5 + $0xa8] sm:$0xff]   ;;  %v4662_v40 = vrot.slane %v2364_v31, 11 }
 0x137   : > { %v4955_v56 = vpop.f32.mrb[7].mxu1  ;;  %5137 = vmatpush3.bf16.msra.mxu0 %v5666_v38 }
 0x138   : > { %v1845_v51 = vadd.f32 %v4910_v41, %v6564_v12  ;;  %v6574_v58 = vadd.f32 %v4953_v53, %v1842_v46  ;;  %v4956_v59 = vadd.f32 %v4955_v56, %v4954_v54  ;;  %v2374_v41 = vor.u32 %v2372_v34, %v6586_v33  ;;  %v2466_v54 = vld [vmem:[#allocation3 + $0x4] sm:$0xf] }
 0x139   : > { %2475 = vst [vmem:[#allocation4 + $0x8] sm:$0xf] %v2466_v54 }
 0x13a   : > { %v4911_v55 = vpop.f32.mrb[8].mxu0  ;;  %v6576_v60 = vadd.f32 %v4956_v59, %v1845_v51  ;;  %v2307_v51 = vsel %vm6593_vm10, %v4661_v13, %v2306_v32  ;;  %v5669_v59 = vld [vmem:[#allocation5 + $0xf0] sm:$0xff]  }
 0x13b   : > { %v4912_v57 = vpop.f32.mrb[9].mxu0  ;;  %2341 = vst [vmem:[#allocation4] sm:$0xf] %v2307_v51  ;;  %5138 = vmatprep.subr.bf16.mxu0 %v5669_v59 }
 0x13c   : > { %v4913_v50 = vadd.f32 %v4912_v57, %v4911_v55  ;;  %v4914_v61 = vpop.f32.mrb[10].mxu0  ;;  %v4957_v2 = vpop.f32.mrb[8].mxu1  ;;  %v5667_v57 = vld [vmem:[#allocation5 + $0x70] sm:$0xff]   ;;  %5139 = vmatpush3.bf16.msra.mxu0 %v5670_v62 }
 0x13d   : > { %v4915_v43 = vpop.f32.mrb[11].mxu0  ;;  %v4958_v3 = vpop.f32.mrb[9].mxu1  ;;  %5092 = vmatprep.subr.bf16.mxu1 %v5667_v57 }
 0x13e   : > { %v4916_v0 = vadd.f32 %v4915_v43, %v4914_v61  ;;  %v1850_v1 = vadd.f32 %v4913_v50, %v6564_v12  ;;  %v4959_v8 = vadd.f32 %v4958_v3, %v4957_v2  ;;  %v4960_v11 = vpop.f32.mrb[10].mxu1  ;;  %v2375_v50 = vsel %vm6602_vm12, %v4662_v40, %v2374_v41  ;;  %5093 = vmatpush3.bf16.msra.mxu1 %v5668_v47 }
 0x13f   : > { %v4961_v9 = vpop.f32.mrb[11].mxu1  ;;  %2457 = vst [vmem:[#allocation4 + $0x4] sm:$0xf] %v2375_v50  ;;  %5094 = vmatprep.subr.bf16.mxu1 %v5671_v5 }
 0x140   : > { %v1853_v7 = vadd.f32 %v4916_v0, %v6564_v12  ;;  %v6580_v16 = vadd.f32 %v4959_v8, %v1850_v1  ;;  %v4962_v18 = vadd.f32 %v4961_v9, %v4960_v11  ;;  %v5672_v8 = vld [vmem:[#allocation5 + $0x38] sm:$0xff]  }
 0x141   : > { %v5674_v11 = vld [vmem:[#allocation5 + $0xb8] sm:$0xff]  }
 0x142   : > { %v4917_v4 = vpop.f32.mrb[12].mxu0  ;;  %v6582_v23 = vadd.f32 %v4962_v18, %v1853_v7  ;;  %v5673_v7 = vld [vmem:[#allocation5 + $0xf8] sm:$0xff]   ;;  %5095 = vmatpush3.bf16.msra.mxu1 %v5672_v8 }
 0x143   : > { %v4918_v14 = vpop.f32.mrb[13].mxu0  ;;  %5140 = vmatprep.subr.bf16.mxu0 %v5673_v7 }
 0x144   : > { %v4919_v10 = vadd.f32 %v4918_v14, %v4917_v4  ;;  %v4920_v15 = vpop.f32.mrb[14].mxu0  ;;  %5141 = vmatpush3.bf16.msra.mxu0 %v5674_v11 }
 0x145   : > { %v4921_v19 = vpop.f32.mrb[15].mxu0 }
 0x146   : > { %v4922_v21 = vadd.f32 %v4921_v19, %v4920_v15  ;;  %v1858_v35 = vadd.f32 %v4919_v10, %v6564_v12  ;;  %v4963_v37 = vpop.f32.mrb[12].mxu1 }
 0x147   : > { %v4964_v42 = vpop.f32.mrb[13].mxu1 }
 0x148   : > { %v1861_v46 = vadd.f32 %v4922_v21, %v6564_v12  ;;  %v4965_v48 = vadd.f32 %v4964_v42, %v4963_v37  ;;  %v4966_v49 = vpop.f32.mrb[14].mxu1  ;;  %v5690_v37 = vld [vmem:[#allocation5 + $0x1c0] sm:$0xff]  }
 0x149   : > { %v4967_v55 = vpop.f32.mrb[15].mxu1  ;;  %5218 = vmatprep.subr.bf16.mxu0 %v5690_v37 }
 0x14a   : > { %v4923_v56 = vpop.f32.mrb[16].mxu0  ;;  %v6608_v61 = vadd.f32 %v4965_v48, %v1858_v35  ;;  %v4968_v43 = vadd.f32 %v4967_v55, %v4966_v49 }
 0x14b   : > { %v4924_v0 = vpop.f32.mrb[17].mxu0 }
 0x14c   : > { %v4925_v1 = vadd.f32 %v4924_v0, %v4923_v56  ;;  %v4926_v2 = vpop.f32.mrb[18].mxu0  ;;  %v6610_v3 = vadd.f32 %v4968_v43, %v1861_v46 }
 0x14d   : > { %v4927_v4 = vpop.f32.mrb[19].mxu0 }
 0x14e   : > { %v1866_v14 = vadd.f32 %v4925_v1, %v6564_v12  ;;  %v4969_v9 = vpop.f32.mrb[16].mxu1  ;;  %v5681_v12 = vld [vmem:[#allocation5 + $0x140] sm:$0xff]  }
 0x14f   : > { %v4970_v10 = vpop.f32.mrb[17].mxu1  ;;  %5172 = vmatprep.subr.bf16.mxu1 %v5681_v12 }
 0x150   : > { %v4971_v15 = vadd.f32 %v4970_v10, %v4969_v9  ;;  %v4972_v18 = vpop.f32.mrb[18].mxu1 }
 0x151   : > { %v4973_v19 = vpop.f32.mrb[19].mxu1 }
 0x152   : > { %v6613_v20 = vadd.f32 %v4971_v15, %v1866_v14 }
 0x155   : > { %v4991_v21 = vpop.f32.mrb[20].mxu0 }
 0x156   : > { %v4992_v22 = vpop.f32.mrb[21].mxu0 }
 0x157   : > { %v4993_v63 = vadd.f32 %v4992_v22, %v4991_v21  ;;  %v4994_v24 = vpop.f32.mrb[22].mxu0 }
 0x158   : > { %v4995_v25 = vpop.f32.mrb[23].mxu0 }
 0x159   : > { %v1978_v26 = vadd.f32 %v4993_v63, %v6568_v39  ;;  %v4996_v28 = vadd.f32 %v4995_v25, %v4994_v24 }
 0x15b   : > { %v1981_v29 = vadd.f32 %v4996_v28, %v6570_v44 }
 0x160   : > { %v5037_v30 = vpop.f32.mrb[20].mxu1 }
 0x161   : > { %v5038_v31 = vpop.f32.mrb[21].mxu1 }
 0x162   : > { %v5039_v34 = vadd.f32 %v5038_v31, %v5037_v30  ;;  %v5040_v35 = vpop.f32.mrb[22].mxu1 }
 0x163   : > { %v5041_v36 = vpop.f32.mrb[23].mxu1  ;;  %v4997_v13 = vpop.f32.mrb[24].mxu0 }
 0x164   : > { %v5042_v38 = vadd.f32 %v5041_v36, %v5040_v35  ;;  %v2050_v40 = vadd.f32 %v5039_v34, %v1978_v26  ;;  %v4998_v41 = vpop.f32.mrb[25].mxu0 }
 0x165   : > { %v4999_v42 = vadd.f32 %v4998_v41, %v4997_v13  ;;  %v5000_v46 = vpop.f32.mrb[26].mxu0 }
 0x166   : > { %v6617_v48 = vadd.f32 %v5042_v38, %v1981_v29  ;;  %v5001_v39 = vpop.f32.mrb[27].mxu0 }
 0x167   : > { %v1986_v44 = vadd.f32 %v4999_v42, %v6574_v58  ;;  %v5002_v49 = vadd.f32 %v5001_v39, %v5000_v46  ;;  %v2180_v46 = vpop.permute.xlu0 %2179 }
 0x169   : > { %v1989_v51 = vadd.f32 %v5002_v49, %v6576_v60 }
 0x16b   : > { %v5043_v54 = vpop.f32.mrb[24].mxu1 }
 0x16c   : > { %v5044_v55 = vpop.f32.mrb[25].mxu1 }
 0x16d   : > { %v5045_v56 = vadd.f32 %v5044_v55, %v5043_v54  ;;  %v5046_v57 = vpop.f32.mrb[26].mxu1 }
 0x16e   : > { %v5047_v59 = vpop.f32.mrb[27].mxu1 }
 0x16f   : > { %v5048_v50 = vadd.f32 %v5047_v59, %v5046_v57  ;;  %v5003_v43 = vpop.f32.mrb[28].mxu0  ;;  %v2058_v0 = vadd.f32 %v5045_v56, %v1986_v44 }
 0x170   : > { %v5004_v47 = vpop.f32.mrb[29].mxu0 }
 0x171   : > { %v5005_v62 = vadd.f32 %v5004_v47, %v5003_v43  ;;  %v5006_v1 = vpop.f32.mrb[30].mxu0  ;;  %v6621_v2 = vadd.f32 %v5048_v50, %v1989_v51 }
 0x172   : > { %v5007_v4 = vpop.f32.mrb[31].mxu0 }
 0x173   : > { %v1994_v5 = vadd.f32 %v5005_v62, %v6580_v16  ;;  %v5008_v58 = vadd.f32 %v5007_v4, %v5006_v1  ;;  %v2190_v4 = vpop.permute.xlu1 %2189 }
 0x175   : > { %v1997_v7 = vadd.f32 %v5008_v58, %v6582_v23 }
 0x177   : > { %v5049_v60 = vpop.f32.mrb[28].mxu1 }
 0x178   : > { %v5050_v8 = vpop.f32.mrb[29].mxu1 }
 0x179   : > { %v5051_v11 = vadd.f32 %v5050_v8, %v5049_v60  ;;  %v5052_v14 = vpop.f32.mrb[30].mxu1  ;;  %v2484_v8 = vld [vmem:[#allocation3 + $0x4] sm:$0x8] }
 0x17a   : > { %v5053_v9 = vpop.f32.mrb[31].mxu1 }
 0x17b   : > { %v5054_v10 = vadd.f32 %v5053_v9, %v5052_v14  ;;  %v5009_v15 = vpop.f32.mrb[32].mxu0  ;;  %v6625_v18 = vadd.f32 %v5051_v11, %v1994_v5  ;;  %v2624_v14 = vld [vmem:[#allocation3 + $0x2c] sm:$0x1] }
 0x17c   : > { %v5010_v19 = vpop.f32.mrb[33].mxu0 }
 0x17d   : > { %v5011_v21 = vadd.f32 %v5010_v19, %v5009_v15  ;;  %v5012_v22 = vpop.f32.mrb[34].mxu0  ;;  %v6627_v63 = vadd.f32 %v5054_v10, %v1997_v7  ;;  %v2495_v15 = vshrl.u32 %v2484_v8, 16 }
 0x17e   : > { %v5013_v24 = vpop.f32.mrb[35].mxu0 }
 0x17f   : > { %v2002_v16 = vadd.f32 %v5011_v21, %v6608_v61  ;;  %v5014_v25 = vadd.f32 %v5013_v24, %v5012_v22  ;;  %v2715_v22 = vshll.u32 %v2624_v14, 16  ;;  %v6643_v24 = vld [vmem:[#allocation3 + $0x2c] sm:$0xf] }
 0x180   : > { %7491 = vst [vmem:[#allocation13_spill] sm:$0xff] %v6643_v24 }
 0x181   : > { %v2005_v23 = vadd.f32 %v5014_v25, %v6610_v3 }
 0x183   : > { %v5055_v26 = vpop.f32.mrb[32].mxu1 }
 0x184   : > { %v5056_v28 = vpop.f32.mrb[33].mxu1 }
 0x185   : > { %v5057_v29 = vadd.f32 %v5056_v28, %v5055_v26  ;;  %v5058_v12 = vpop.f32.mrb[34].mxu1 }
 0x186   : > { %v5059_v31 = vpop.f32.mrb[35].mxu1 }
 0x187   : > { %v5015_v30 = vpop.f32.mrb[36].mxu0  ;;  %v5060_v35 = vadd.f32 %v5059_v31, %v5058_v12  ;;  %v6631_v38 = vadd.f32 %v5057_v29, %v2002_v16  ;;  %v2195_v16 = vpop.permute.xlu1 %2194  ;;  %v6650_v29 = vrot.slane %v2495_v15, 11 }
 0x188   : > { %v5016_v34 = vpop.f32.mrb[37].mxu0 }
 0x189   : > { %v5017_v36 = vadd.f32 %v5016_v34, %v5015_v30  ;;  %v5018_v37 = vpop.f32.mrb[38].mxu0  ;;  %v6634_v42 = vadd.f32 %v5060_v35, %v2005_v23  ;;  %v6647_v23 = vrot.slane %v2306_v32, 4 }
 0x18a   : > { %v5019_v13 = vpop.f32.mrb[39].mxu0 }
 0x18b   : > { %v2010_v41 = vadd.f32 %v5017_v36, %v6613_v20  ;;  %v5061_v61 = vpop.f32.mrb[36].mxu1  ;;  %v2185_v20 = vpop.permute.xlu0 %2184  ;;  %v6659_v36 = vrot.slane %v2715_v22, 5 }
 0x18c   : > { %v5062_v3 = vpop.f32.mrb[37].mxu1 }
 0x18d   : > { %v5063_v39 = vadd.f32 %v5062_v3, %v5061_v61  ;;  %v5064_v49 = vpop.f32.mrb[38].mxu1  ;;  %7493 = vst [vmem:[#allocation15_spill] sm:$0xff] %v6659_v36 }
 0x18e   : > { %v5065_v55 = vpop.f32.mrb[39].mxu1 }
 0x18f   : > { %v2121_v44 = vpop.f32.mrb[40].mxu0  ;;  %v6636_v57 = vadd.f32 %v5063_v39, %v2010_v41 }
 0x190   : > { %v2122_v51 = vadd.f32 %v2121_v44, %v2050_v40  ;;  %v5308_v54 = vpop.f32.mrb[41].mxu0  ;;  %v6639_v40 = vld [vmem:[#allocation3 + $0x2c] sm:$0xf] }
 0x191   : > { %v2124_v56 = vpop.f32.mrb[42].mxu0  ;;  %7490 = vst [vmem:[#allocation12_spill] sm:$0xff] %v6639_v40  ;;  %v2845_v19 = vshll.u32 %v6639_v40, 16 }
 0x192   : > { %v2159_v59 = vmax.f32 %v2122_v51, 0.0  ;;  %v2125_v50 = vadd.f32 %v2124_v56, %v6617_v48  ;;  %v5309_v43 = vpop.f32.mrb[43].mxu0 }
 0x194   : > { %v2160_v47 = vmax.f32 %v2125_v50, 0.0  ;;  %v2222_v62 = vmul.f32 %v2180_v46, %v2159_v59 }
 0x196   : > { %v2223_v1 = vmul.f32 %v2185_v20, %v2160_v47 }
 0x197   : > { %v2129_v5 = vpop.f32.mrb[44].mxu0 }
 0x198   : > { %v4839_v58 = vpack.c.bf16 %v2223_v1, %v2222_v62  ;;  %v2130_v7 = vadd.f32 %v2129_v5, %v2058_v0  ;;  %v5312_v60 = vpop.f32.mrb[45].mxu0 }
 0x199   : > { %v2132_v11 = vpop.f32.mrb[46].mxu0 }
 0x19a   : > { %4876 = vst [vmem:[#allocation3 + $0x8] sm:$0xff] %v4839_v58   ;;  %v2161_v9 = vmax.f32 %v2130_v7, 0.0  ;;  %v2133_v10 = vadd.f32 %v2132_v11, %v6621_v2  ;;  %v5313_v48 = vpop.f32.mrb[47].mxu0  ;;  %v6652_v2 = vrot.slane %v2845_v19, 5 }
 0x19c   : > { %v2162_v21 = vmax.f32 %v2133_v10, 0.0  ;;  %v2224_v0 = vmul.f32 %v2190_v4, %v2161_v9  ;;  %7492 = vst [vmem:[#allocation14_spill] sm:$0xff] %v6652_v2 }
 0x19e   : > { %v2225_v25 = vmul.f32 %v2195_v16, %v2162_v21 }
 0x19f   : > { %v2137_v26 = vpop.f32.mrb[48].mxu0 }
 0x1a0   : > { %v4844_v30 = vpack.c.bf16 %v2225_v25, %v2224_v0  ;;  %v6656_v31 = vadd.f32 %v2137_v26, %v6625_v18  ;;  %v5316_v34 = vpop.f32.mrb[49].mxu0 }
 0x1a1   : > { %v6661_v27 = vld [vmem:[#allocation3 + $0x8] sm:$0xf]  ;;  %v6663_v32 = vld [vmem:[#allocation3 + $0xc] sm:$0xf]  ;;  %v2140_v60 = vpop.f32.mrb[50].mxu0 }
 0x1a2   : > { %v2352_v37 = vld [vmem:[#allocation3 + $0x8] sm:$0xf]  ;;  %v7440_v13 = vrot.slane %v6661_v27, 7  ;;  %v7438_v41 = vrot.slane %v6663_v32, 7  ;;  %v2353_v61 = vld [vmem:[#allocation3 + $0xc] sm:$0xf] }
 0x1a3   : > { %v2378_v46 = vshrl.u32 %v2352_v37, 16  ;;  %v2381_v3 = vshll.u32 %v2352_v37, 16  ;;  %4877 = vst [vmem:[#allocation3 + $0x10] sm:$0xff] %v4844_v30   ;;  %v2387_v18 = vshrl.u32 %v2353_v61, 16  ;;  %v2390_v39 = vshll.u32 %v2353_v61, 16  ;;  %v5317_v48 = vpop.f32.mrb[51].mxu0 }
 0x1a4   : > { %v2485_v44 = vld [vmem:[#allocation3 + $0x8] sm:$0xf]  ;;  %v2486_v49 = vld [vmem:[#allocation3 + $0xc] sm:$0xf]  ;;  %v6669_v51 = vrot.slane %v7440_v13, 4  ;;  %v6673_v54 = vrot.slane %v7438_v41, 4 }
 0x1a5   : > { %v6675_v55 = vrot.slane %v2378_v46, 7  ;;  %v2500_v56 = vshrl.u32 %v2485_v44, 16  ;;  %v2615_v59 = vld [vmem:[#allocation3 + $0x8] sm:$0xf]  ;;  %v6677_v50 = vrot.slane %v2387_v18, 7  ;;  %v2503_v43 = vshll.u32 %v2485_v44, 16 }
 0x1a6   : > { %v2509_v47 = vshrl.u32 %v2486_v49, 16  ;;  %v2512_v20 = vshll.u32 %v2486_v49, 16  ;;  %v2616_v62 = vld [vmem:[#allocation3 + $0xc] sm:$0xf]  ;;  %v2626_v5 = vshrl.u32 %v2615_v59, 16  ;;  %v2629_v58 = vshll.u32 %v2615_v59, 16 }
 0x1a7   : > { %v6680_v1 = vor.u32 %v2381_v3, %v6675_v55  ;;  %v6682_v4 = vrot.slane %v2500_v56, 7  ;;  %v2755_v7 = vld [vmem:[#allocation3 + $0xc] sm:$0xf]  ;;  %v6685_v8 = vor.u32 %v2390_v39, %v6677_v50  ;;  %v2635_v14 = vshll.u32 %v2616_v62, 16  ;;  %v6698_v16 = vpop.f32.mrb[52].mxu0 }
 0x1a8   : > { %v6687_v11 = vrot.slane %v2509_v47, 7  ;;  %v2639_v9 = vshrl.u32 %v2616_v62, 16  ;;  %v6689_v10 = vld [vmem:[#allocation3 + $0xc] sm:$0xe]  ;;  %v6694_v19 = vrot.slane %v2626_v5, 4  ;;  %v6696_v21 = vrot.slane %v2629_v58, 5 }
 0x1a9   : > { %v6692_v15 = vor.u32 %v2503_v43, %v6682_v4  ;;  %v2766_v22 = vshrl.u32 %v2755_v7, 16  ;;  %v2467_v0 = vld [vmem:[#allocation3 + $0x8] sm:$0xf]  ;;  %v6703_v26 = vrot.slane %v2635_v14, 5  ;;  %v2769_v34 = vshll.u32 %v2755_v7, 16  ;;  %v5320_v61 = vpop.f32.mrb[53].mxu0 }
 0x1aa   : > { %v6701_v25 = vor.u32 %v2512_v20, %v6687_v11  ;;  %v6705_v30 = vrot.slane %v2639_v9, 4  ;;  %v6707_v37 = vld [vmem:[#allocation3 + $0x10] sm:$0xf]  ;;  %2476 = vst [vmem:[#allocation4 + $0x2c] sm:$0xf] %v2467_v0  ;;  %v6717_v49 = vpop.f32.mrb[54].mxu0  ;;  %v6725_v62 = vadd.f32 %v2140_v60, %v6627_v63  ;;  %v2200_v60 = vpop.permute.xlu0 %2199 }
 0x1ab   : > { %7494 = vst [vmem:[#allocation16_spill] sm:$0xff] %v6703_v26  ;;  %v6711_v3 = vrot.slane %v2766_v22, 4  ;;  %v6714_v39 = vld [vmem:[#allocation3 + $0x14] sm:$0xf]  ;;  %v7437_v44 = vrot.slane %v6707_v37, 7  ;;  %v6721_v59 = vrot.slane %v2769_v34, 5 }
 0x1ac   : > { %7495 = vst [vmem:[#allocation17_spill] sm:$0xff] %v6705_v30  ;;  %v7439_v43 = vrot.slane %v6714_v39, 7  ;;  %v2354_v47 = vld [vmem:[#allocation3 + $0x10] sm:$0xf]  ;;  %v2355_v20 = vld [vmem:[#allocation3 + $0x14] sm:$0xf] }
 0x1ad   : > { %7496 = vst [vmem:[#allocation18_spill] sm:$0xff] %v6711_v3  ;;  %7497 = vst [vmem:[#allocation19_spill] sm:$0xff] %v6721_v59  ;;  %v6729_v5 = vrot.slane %v7437_v44, 4  ;;  %v2396_v58 = vshrl.u32 %v2354_v47, 16  ;;  %v2399_v7 = vshll.u32 %v2354_v47, 16  ;;  %v2405_v14 = vshrl.u32 %v2355_v20, 16 }
 0x1ae   : > { %v2487_v9 = vld [vmem:[#allocation3 + $0x10] sm:$0xf]  ;;  %v6735_v22 = vrot.slane %v7439_v43, 4  ;;  %v2408_v0 = vshll.u32 %v2355_v20, 16  ;;  %v2488_v34 = vld [vmem:[#allocation3 + $0x14] sm:$0xf]  ;;  %v2210_v3 = vpop.permute.xlu0 %2209 }
 0x1af   : > { %v2518_v61 = vshrl.u32 %v2487_v9, 16  ;;  %v5321_v63 = vpop.f32.mrb[55].mxu0  ;;  %v6737_v12 = vrot.slane %v2396_v58, 7  ;;  %v6739_v6 = vrot.slane %v2405_v14, 7  ;;  %v2521_v35 = vshll.u32 %v2487_v9, 16 }
 0x1b0   : > { %7498 = vst [vmem:[#allocation20_spill] sm:$0xff] %v6735_v22  ;;  %v2527_v47 = vshrl.u32 %v2488_v34, 16  ;;  %v2617_v56 = vld [vmem:[#allocation3 + $0x10] sm:$0xf]  ;;  %v2530_v44 = vshll.u32 %v2488_v34, 16  ;;  %v2153_v24 = vpop.f32.mrb[56].mxu0 }
 0x1b1   : > { %v6741_v46 = vrot.slane %v2518_v61, 7  ;;  %v2618_v48 = vld [vmem:[#allocation3 + $0x14] sm:$0xf]  ;;  %v2645_v41 = vshll.u32 %v2617_v56, 16  ;;  %v2649_v28 = vshrl.u32 %v2617_v56, 16  ;;  %v6744_v43 = vor.u32 %v2399_v7, %v6737_v12  ;;  %v5324_v2 = vpop.f32.mrb[57].mxu0 }
 0x1b2   : > { %v6747_v20 = vor.u32 %v2408_v0, %v6739_v6  ;;  %v6749_v63 = vrot.slane %v2527_v47, 7  ;;  %v2655_v58 = vshll.u32 %v2618_v48, 16  ;;  %v2756_v14 = vld [vmem:[#allocation3 + $0x10] sm:$0xf]  ;;  %v2757_v13 = vld [vmem:[#allocation3 + $0x14] sm:$0xf]  ;;  %v2146_v2 = vadd.f32 %v6698_v16, %v6631_v38 }
 0x1b3   : > { %v6752_v9 = vor.u32 %v2521_v35, %v6741_v46  ;;  %v6754_v61 = vrot.slane %v2645_v41, 5  ;;  %v6756_v34 = vrot.slane %v2649_v28, 4  ;;  %v2659_v18 = vshrl.u32 %v2618_v48, 16  ;;  %v2878_v56 = vld [vmem:[#allocation3 + $0x10] sm:$0xf]  ;;  %v2156_v48 = vpop.f32.mrb[58].mxu0 }
 0x1b4   : > { %v6759_v7 = vor.u32 %v2530_v44, %v6749_v63  ;;  %v6761_v0 = vrot.slane %v2655_v58, 5  ;;  %v2775_v47 = vshll.u32 %v2756_v14, 16  ;;  %v2779_v36 = vshrl.u32 %v2756_v14, 16  ;;  %v2879_v22 = vld [vmem:[#allocation3 + $0x14] sm:$0xf]  ;;  %v2205_v14 = vpop.permute.xlu1 %2204 }
 0x1b5   : > { %7499 = vst [vmem:[#allocation21_spill] sm:$0xff] %v6756_v34  ;;  %v6765_v40 = vrot.slane %v2659_v18, 4  ;;  %v2785_v41 = vshll.u32 %v2757_v13, 16  ;;  %v2789_v28 = vshrl.u32 %v2757_v13, 16  ;;  %v2468_v52 = vld [vmem:[#allocation3 + $0xc] sm:$0xf] }
 0x1b6   : > { %v6767_v59 = vrot.slane %v2775_v47, 5  ;;  %v6769_v44 = vrot.slane %v2779_v36, 4  ;;  %v2899_v58 = vrot.slane %v2878_v56, 5  ;;  %v2902_v26 = vrot.slane %v2879_v22, 5  ;;  %v2469_v30 = vld [vmem:[#allocation3 + $0x10] sm:$0xf] }
 0x1b7   : > { %2477 = vst [vmem:[#allocation4 + $0x50] sm:$0xf] %v2468_v52  ;;  %v6773_v35 = vrot.slane %v2785_v41, 5  ;;  %v6775_v18 = vrot.slane %v2789_v28, 4  ;;  %v2163_v13 = vmax.f32 %v6656_v31, 0.0  ;;  %v5325_v47 = vpop.f32.mrb[59].mxu0  ;;  %v2154_v36 = vadd.f32 %v2153_v24, %v6636_v57 }
 0x1b8   : > { %2478 = vst [vmem:[#allocation4 + $0x74] sm:$0xf] %v2469_v30  ;;  %v2470_v48 = vld [vmem:[#allocation3 + $0x14] sm:$0xf]  ;;  %v7500_v22 = vrot.slane %v6689_v10, 9  ;;  %v2901_v56 = vrot.slane %v2899_v58, 4  ;;  %v2506_v24 = vsel %vm6602_vm12, %v6650_v29, %v6692_v15 }
 0x1b9   : > { %v6784_v34 = vrot.slane %v2902_v26, 4  ;;  %2479 = vst [vmem:[#allocation4 + $0x98] sm:$0xf] %v2470_v48  ;;  %v2597_v41 = vld [vmem:[#allocation3 + $0x8] sm:$0xf]  ;;  %v2792_v31 = vor.u32 %v6775_v18, %v6773_v35  ;;  %v2226_v30 = vmul.f32 %v2200_v60, %v2163_v13  ;;  %v2164_v47 = vmax.f32 %v6725_v62, 0.0 }
 0x1ba   : > { %v2900_v52 = vsel %vm6513_vm5, %v7500_v22, %v2899_v58  ;;  %v2598_v28 = vld [vmem:[#allocation3 + $0xc] sm:$0xf]  ;;  %2606 = vst [vmem:[#allocation4 + $0x10] sm:$0xf] %v2597_v41  ;;  %v2738_v22 = vld [vmem:[#allocation3 + $0x10] sm:$0xf]  ;;  %v2903_v58 = vsel %vm6513_vm5, %v2901_v56, %v2902_v26  ;;  %v2149_v48 = vadd.f32 %v6717_v49, %v6634_v42 }
 0x1bb   : > { %2934 = vst [vmem:[#allocation4 + $0x20] sm:$0xf] %v2900_v52  ;;  %2607 = vst [vmem:[#allocation4 + $0x34] sm:$0xf] %v2598_v28  ;;  %v2737_v10 = vld [vmem:[#allocation3 + $0xc] sm:$0xf]  ;;  %v2227_v13 = vmul.f32 %v2205_v14, %v2164_v47  ;;  %v2220_v14 = vpop.permute.xlu0 %2219 }
 0x1bc   : > { %v7501_v52 = vrot.slane %v6661_v27, 7  ;;  %2746 = vst [vmem:[#allocation4 + $0x18] sm:$0xf] %v2737_v10  ;;  %2747 = vst [vmem:[#allocation4 + $0x3c] sm:$0xf] %v2738_v22  ;;  %v2165_v41 = vmax.f32 %v2146_v2, 0.0  ;;  %v2215_v2 = vpop.permute.xlu1 %2214 }
 0x1bd   : > { %v2599_v38 = vld [vmem:[#allocation3 + $0x10] sm:$0xf]  ;;  %v2600_v16 = vld [vmem:[#allocation3 + $0x14] sm:$0xf]  ;;  %2935 = vst [vmem:[#allocation4 + $0x44] sm:$0xf] %v2903_v58  ;;  %v4849_v56 = vpack.c.bf16 %v2227_v13, %v2226_v30 }
 0x1be   : > { %v2310_v62 = vsel %vm6593_vm10, %v6647_v23, %v7501_v52  ;;  %v2739_v60 = vld [vmem:[#allocation3 + $0x14] sm:$0xf]  ;;  %v7502_v42 = vrot.slane %v6586_v33, 4  ;;  %2608 = vst [vmem:[#allocation4 + $0x58] sm:$0xf] %v2599_v38  ;;  %v2166_v23 = vmax.f32 %v2149_v48, 0.0  ;;  %v2228_v29 = vmul.f32 %v2210_v3, %v2165_v41 }
 0x1bf   : > { %2342 = vst [vmem:[#allocation4 + $0x24] sm:$0xf] %v2310_v62  ;;  %2609 = vst [vmem:[#allocation4 + $0x7c] sm:$0xf] %v2600_v16  ;;  %v2167_v27 = vmax.f32 %v2154_v36, 0.0  ;;  %v2507_v26 = vrot.slane %v6682_v4, 4 }
 0x1c0   : > { %v2384_v57 = vsel %vm6602_vm12, %v7502_v42, %v6680_v1  ;;  %2748 = vst [vmem:[#allocation4 + $0x60] sm:$0xf] %v2739_v60  ;;  %2588 = vst [vmem:[#allocation4 + $0xc] sm:$0xf] %v2506_v24  ;;  %v7503_v49 = vrot.slane %v6663_v32, 7  ;;  %v7504_v15 = vrot.slane %v6707_v37, 7  ;;  %v2229_v32 = vmul.f32 %v2215_v2, %v2166_v23 }
 0x1c1   : > { %2458 = vst [vmem:[#allocation4 + $0x28] sm:$0xf] %v2384_v57  ;;  %v2745_v1 = vld [vmem:[#allocation3 + $0x2c] sm:$0xf]  ;;  %v2385_v4 = vrot.slane %v6675_v55, 4  ;;  %v2230_v28 = vmul.f32 %v2220_v14, %v2167_v27  ;;  %v2394_v30 = vrot.slane %v6677_v50, 4  ;;  %v7513_v42 = vor.u32 %v6769_v44, %v6767_v59 }
 0x1c2   : > { %v2313_v33 = vsel %vm6593_vm10, %v6669_v51, %v7503_v49  ;;  %v2316_v36 = vsel %vm6593_vm10, %v6673_v54, %v7504_v15  ;;  %2754 = vst [vmem:[#allocation4 + $0x138] sm:$0xf] %v2745_v1  ;;  %v2515_v51 = vsel %vm6602_vm12, %v2507_v26, %v6701_v25  ;;  %4878 = vst [vmem:[#allocation3 + $0x18] sm:$0xff] %v4849_v56   ;;  %v2516_v54 = vrot.slane %v6687_v11, 4  ;;  %v7507_v58 = vld [vmem:[#allocation17_spill] sm:$0xff]  ;;  %v7508_v48 = vld [vmem:[#allocation16_spill] sm:$0xff] }
 0x1c3   : > { %2343 = vst [vmem:[#allocation4 + $0x48] sm:$0xf] %v2313_v33  ;;  %2344 = vst [vmem:[#allocation4 + $0x6c] sm:$0xf] %v2316_v36  ;;  %v2393_v37 = vsel %vm6602_vm12, %v2385_v4, %v6685_v8  ;;  %v2525_v55 = vrot.slane %v6741_v46, 4  ;;  %v7505_v3 = vrot.slane %v6714_v39, 7  ;;  %v4854_v25 = vpack.c.bf16 %v2229_v32, %v2228_v29 }
 0x1c4   : > { %2589 = vst [vmem:[#allocation4 + $0x30] sm:$0xf] %v2515_v51  ;;  %v4826_v10 = vpack.c.bf16 %v2230_v28, %v2230_v28  ;;  %v2402_v50 = vsel %vm6602_vm12, %v2394_v30, %v6744_v43  ;;  %2459 = vst [vmem:[#allocation4 + $0x4c] sm:$0xf] %v2393_v37  ;;  %v2403_v8 = vrot.slane %v6737_v12, 4  ;;  %v2524_v11 = vsel %vm6602_vm12, %v2516_v54, %v6752_v9  ;;  %v5682_v43 = vld [vmem:[#allocation5 + $0x100] sm:$0xff]  }
 0x1c5   : > { %v2319_v47 = vsel %vm6593_vm10, %v6729_v5, %v7505_v3  ;;  %2460 = vst [vmem:[#allocation4 + $0x70] sm:$0xf] %v2402_v50  ;;  %v2533_v46 = vsel %vm6602_vm12, %v2525_v55, %v6759_v7  ;;  %4879 = vst [vmem:[#allocation3 + $0x20] sm:$0xff] %v4854_v25   ;;  %v7506_v9 = vor.u32 %v6696_v21, %v6694_v19  ;;  %v7510_v62 = vld [vmem:[#allocation19_spill] sm:$0xff]  ;;  %v7511_v38 = vld [vmem:[#allocation18_spill] sm:$0xff]  ;;  %v2783_v57 = vrot.slane %v7513_v42, 4 }
 0x1c6   : > { %2345 = vst [vmem:[#allocation4 + $0x90] sm:$0xf] %v2319_v47  ;;  %2280 = vst [vmem:[#allocation3 + $0x28] sm:$0xf] %v4826_v10  ;;  %v2411_v12 = vsel %vm6602_vm12, %v2403_v8, %v6747_v20  ;;  %v7509_v7 = vor.u32 %v7507_v58, %v7508_v48  ;;  %v7512_v16 = vor.u32 %v7510_v62, %v7511_v38  ;;  %v5675_v13 = vld [vmem:[#allocation4] ss:$36 sps:$4 sm:$0xff]  }
 0x1c7   : > { %2590 = vst [vmem:[#allocation4 + $0x54] sm:$0xf] %v2524_v11  ;;  %2591 = vst [vmem:[#allocation4 + $0x78] sm:$0xf] %v2533_v46  ;;  %v2633_v22 = vrot.slane %v7506_v9, 4  ;;  %v5683_v20 = vld [vmem:[#allocation5 + $0x148] sm:$0xff]   ;;  %v2788_v33 = vsel %vm6134_vm2, %v2783_v57, %v6773_v35  ;;  %v7517_v1 = vor.u32 %v6765_v40, %v6761_v0 }
 0x1c8   : > { %v2643_v52 = vrot.slane %v7509_v7, 4  ;;  %v2773_v60 = vrot.slane %v7512_v16, 4  ;;  %v5677_v41 = vld [vmem:[#allocation4 + $0x4] ss:$36 sps:$4 sm:$0xff]   ;;  %2461 = vst [vmem:[#allocation4 + $0x94] sm:$0xf] %v2411_v12 }
 0x1c9   : > { %v2638_v19 = vsel %vm6134_vm2, %v2633_v22, %v7508_v48  ;;  %v7515_v27 = vld [vmem:[#allocation21_spill] sm:$0xff]  ;;  %3819 = vmatprep.mubr.bf16.mxu1 %v5677_v41  ;;  %v5684_v44 = vld [vmem:[#allocation5 + $0x108] sm:$0xff]   ;;  %v6881_v14 = vrot.slane %v7517_v1, 4  ;;  %v6892_v29 = vld [vmem:[#allocation3 + $0x18] sm:$0xf] }
 0x1ca   : > { %v2648_v21 = vsel %vm6134_vm2, %v2643_v52, %v6754_v61  ;;  %v2778_v23 = vsel %vm6134_vm2, %v2773_v60, %v6767_v59  ;;  %v7516_v26 = vor.u32 %v7515_v27, %v6754_v61  ;;  %2728 = vst [vmem:[#allocation4 + $0x14] sm:$0xf] %v2638_v19  ;;  %v6886_v59 = vrot.slane %v2792_v31, 4  ;;  %v7518_v61 = vld [vmem:[#allocation12_spill] sm:$0xff]  ;;  %v6894_v15 = vld [vmem:[#allocation3 + $0x1c] sm:$0xf]  ;;  %3820 = vmatmul.mubr.bf16.vlgmr.msra.gmra.mrb[40].mxu1 %v5675_v13 }
 0x1cb   : > { %2729 = vst [vmem:[#allocation4 + $0x38] sm:$0xf] %v2648_v21  ;;  %2868 = vst [vmem:[#allocation4 + $0x1c] sm:$0xf] %v2778_v23  ;;  %v7519_v2 = vshrl.u32 %v7518_v61, 16  ;;  %v5692_v4 = vld [vmem:[#allocation5 + $0x150] sm:$0xff]   ;;  %5173 = vmatpush3.bf16.msra.mxu1 %v5682_v43 }
 0x1cc   : > { %v2653_v49 = vrot.slane %v7516_v26, 4  ;;  %v2356_v36 = vld [vmem:[#allocation3 + $0x18] sm:$0xf]  ;;  %2869 = vst [vmem:[#allocation4 + $0x40] sm:$0xf] %v2788_v33  ;;  %v7457_v35 = vrot.slane %v6892_v29, 7  ;;  %5174 = vmatprep.subr.bf16.mxu1 %v5683_v20 }
 0x1cd   : > { %v6890_v56 = vrot.slane %v7519_v2, 4  ;;  %v7455_v18 = vrot.slane %v6894_v15, 7  ;;  %v2357_v31 = vld [vmem:[#allocation3 + $0x1c] sm:$0xf]  ;;  %v2414_v32 = vshrl.u32 %v2356_v36, 16  ;;  %v2417_v28 = vshll.u32 %v2356_v36, 16 }
 0x1ce   : > { %v2658_v40 = vsel %vm6134_vm2, %v2653_v49, %v6761_v0  ;;  %v2423_v51 = vshrl.u32 %v2357_v31, 16  ;;  %v2426_v30 = vshll.u32 %v2357_v31, 16  ;;  %v2489_v37 = vld [vmem:[#allocation3 + $0x18] sm:$0xf]  ;;  %v2490_v54 = vld [vmem:[#allocation3 + $0x1c] sm:$0xf] }
 0x1cf   : > { %7520 = vst [vmem:[#allocation17_spill] sm:$0xff] %v6890_v56  ;;  %2730 = vst [vmem:[#allocation4 + $0x5c] sm:$0xf] %v2658_v40  ;;  %v7521_v55 = vld [vmem:[#allocation14_spill] sm:$0xff]  ;;  %v6905_v0 = vrot.slane %v7457_v35, 4  ;;  %v6909_v47 = vrot.slane %v7455_v18, 4  ;;  %5175 = vmatpush3.bf16.msra.mxu1 %v5684_v44 }
 0x1d0   : > { %v6911_v25 = vrot.slane %v2414_v32, 7  ;;  %v2536_v10 = vshrl.u32 %v2489_v37, 16  ;;  %v2619_v50 = vld [vmem:[#allocation3 + $0x18] sm:$0xf]  ;;  %v5693_v8 = vld [vmem:[#allocation5 + $0x110] sm:$0xff]   ;;  %v6913_v11 = vrot.slane %v2423_v51, 7  ;;  %5176 = vmatprep.subr.bf16.mxu1 %v5692_v4 }
 0x1d1   : > { %v2539_v46 = vshll.u32 %v2489_v37, 16  ;;  %v2545_v43 = vshrl.u32 %v2490_v54, 16  ;;  %v2548_v12 = vshll.u32 %v2490_v54, 16  ;;  %v2620_v9 = vld [vmem:[#allocation3 + $0x1c] sm:$0xf]  ;;  %v2665_v48 = vshll.u32 %v2619_v50, 16 }
 0x1d2   : > { %v6916_v22 = vor.u32 %v2417_v28, %v6911_v25  ;;  %v6918_v58 = vrot.slane %v2536_v10, 7  ;;  %v2669_v7 = vshrl.u32 %v2619_v50, 16  ;;  %v2758_v52 = vld [vmem:[#allocation3 + $0x18] sm:$0xf]  ;;  %v6921_v62 = vor.u32 %v2426_v30, %v6913_v11  ;;  %v2759_v13 = vld [vmem:[#allocation3 + $0x1c] sm:$0xf] }
 0x1d3   : > { %v6923_v38 = vrot.slane %v2545_v43, 7  ;;  %v2675_v16 = vshll.u32 %v2620_v9, 16  ;;  %v2679_v60 = vshrl.u32 %v2620_v9, 16  ;;  %v5700_v41 = vld [vmem:[#allocation5 + $0x158] sm:$0xff]   ;;  %v6928_v57 = vrot.slane %v2665_v48, 5  ;;  %v5705_v1 = vld [vmem:[#allocation5 + $0x160] sm:$0xff]   ;;  %5177 = vmatpush3.bf16.msra.mxu1 %v5693_v8 }
 0x1d4   : > { %v6926_v42 = vor.u32 %v2539_v46, %v6918_v58  ;;  %v6930_v20 = vrot.slane %v2669_v7, 4  ;;  %v2795_v19 = vshll.u32 %v2758_v52, 16  ;;  %v6932_v21 = vld [vmem:[#allocation3 + $0x18] sm:$0xf]  ;;  %v5702_v23 = vld [vmem:[#allocation5 + $0x118] sm:$0xff]   ;;  %v2799_v44 = vshrl.u32 %v2758_v52, 16  ;;  %5178 = vmatprep.subr.bf16.mxu1 %v5700_v41 }
 0x1d5   : > { %v6935_v27 = vor.u32 %v2548_v12, %v6923_v38  ;;  %v6937_v26 = vrot.slane %v2675_v16, 5  ;;  %v6939_v49 = vrot.slane %v2679_v60, 4  ;;  %v6941_v33 = vld [vmem:[#allocation3 + $0x1c] sm:$0xf]  ;;  %v2805_v36 = vshll.u32 %v2759_v13, 16  ;;  %v6957_v37 = vld [vmem:[#allocation4 + $0x6c] sm:$0xff] }
 0x1d6   : > { %7522 = vst [vmem:[#allocation16_spill] sm:$0xff] %v6941_v33  ;;  %v6945_v2 = vrot.slane %v2795_v19, 5  ;;  %v2809_v4 = vshrl.u32 %v2759_v13, 16  ;;  %v6947_v40 = vld [vmem:[#allocation3 + $0x20] sm:$0xf]  ;;  %v6951_v32 = vrot.slane %v2799_v44, 4 }
 0x1d7   : > { %v7454_v28 = vrot.slane %v6932_v21, 5  ;;  %v7453_v51 = vrot.slane %v6941_v33, 5  ;;  %v6955_v30 = vld [vmem:[#allocation3 + $0x24] sm:$0x7]  ;;  %v6959_v54 = vrot.slane %v2805_v36, 5  ;;  %v7456_v50 = vrot.slane %v6947_v40, 7  ;;  %5179 = vmatpush3.bf16.msra.mxu1 %v5702_v23 }
 0x1d8   : > { %v6961_v10 = vrot.slane %v2809_v4, 4  ;;  %v2358_v46 = vld [vmem:[#allocation3 + $0x20] sm:$0xf]  ;;  %v5707_v43 = vld [vmem:[#allocation5 + $0x120] sm:$0xff]   ;;  %v2359_v7 = vld [vmem:[#allocation3 + $0x24] sm:$0xf]  ;;  %5180 = vmatprep.subr.bf16.mxu1 %v5705_v1 }
 0x1d9   : > { %v6969_v9 = vrot.slane %v7454_v28, 4  ;;  %v6973_v48 = vrot.slane %v7453_v51, 4  ;;  %v2432_v52 = vshrl.u32 %v2358_v46, 16  ;;  %v6975_v16 = vld [vmem:[#allocation4 + $0x48] sm:$0xff]  ;;  %v6981_v41 = vrot.slane %v7456_v50, 4 }
 0x1da   : > { %7523 = vst [vmem:[#allocation19_spill] sm:$0xff] %v6961_v10  ;;  %v5716_v60 = vld [vmem:[#allocation5 + $0x168] sm:$0xff]   ;;  %v2435_v19 = vshll.u32 %v2358_v46, 16  ;;  %v2441_v44 = vshrl.u32 %v2359_v7, 16  ;;  %v2444_v3 = vshll.u32 %v2359_v7, 16  ;;  %v5734_v10 = vld [vmem:[#allocation5 + $0x178] sm:$0xff]   ;;  %v7543_v45 = vcombine.low %v6975_v16, %v6957_v37 }
 0x1db   : > { %7524 = vst [vmem:[#allocation18_spill] sm:$0xff] %v6969_v9  ;;  %7525 = vst [vmem:[#allocation11_spill] sm:$0xff] %v6973_v48  ;;  %v2491_v36 = vld [vmem:[#allocation3 + $0x20] sm:$0xf]  ;;  %v6983_v4 = vrot.slane %v2432_v52, 7  ;;  %5181 = vmatpush3.bf16.msra.mxu1 %v5707_v43 }
 0x1dc   : > { %v2492_v51 = vld [vmem:[#allocation3 + $0x24] sm:$0xf]  ;;  %v2554_v31 = vshrl.u32 %v2491_v36, 16  ;;  %v2557_v28 = vshll.u32 %v2491_v36, 16  ;;  %v2443_v61 = vrot.slane %v2441_v44, 7  ;;  %5182 = vmatprep.subr.bf16.mxu1 %v5716_v60  ;;  %v5723_v60 = vld [vmem:[#allocation5 + $0x130] sm:$0xff]  }
 0x1dd   : > { %v2563_v12 = vshrl.u32 %v2492_v51, 16  ;;  %v2566_v8 = vshll.u32 %v2492_v51, 16  ;;  %v2621_v18 = vld [vmem:[#allocation3 + $0x20] sm:$0xf]  ;;  %v6988_v50 = vor.u32 %v2435_v19, %v6983_v4  ;;  %v2622_v23 = vld [vmem:[#allocation3 + $0x24] sm:$0xf] }
 0x1de   : > { %v6990_v46 = vrot.slane %v2554_v31, 7  ;;  %v2685_v52 = vshll.u32 %v2621_v18, 16  ;;  %v2689_v5 = vshrl.u32 %v2621_v18, 16  ;;  %v6992_v7 = vor.u32 %v2444_v3, %v2443_v61  ;;  %v2760_v36 = vld [vmem:[#allocation3 + $0x20] sm:$0xf]  ;;  %v5722_v18 = vld [vmem:[#allocation5 + $0x170] sm:$0xff]  }
 0x1df   : > { %v6994_v39 = vrot.slane %v2563_v12, 7  ;;  %v2695_v1 = vshll.u32 %v2622_v23, 16  ;;  %v2699_v44 = vshrl.u32 %v2622_v23, 16  ;;  %v5718_v51 = vld [vmem:[#allocation5 + $0x128] sm:$0xff]   ;;  %v2815_v56 = vshll.u32 %v2760_v36, 16 }
 0x1e0   : > { %v6997_v35 = vor.u32 %v2557_v28, %v6990_v46  ;;  %v6999_v13 = vrot.slane %v2685_v52, 5  ;;  %v7001_v19 = vrot.slane %v2689_v5, 4  ;;  %v2761_v31 = vld [vmem:[#allocation3 + $0x24] sm:$0xf]  ;;  %v2819_v43 = vshrl.u32 %v2760_v36, 16  ;;  %5183 = vmatpush3.bf16.msra.mxu1 %v5718_v51 }
 0x1e1   : > { %v7004_v3 = vor.u32 %v2566_v8, %v6994_v39  ;;  %v7006_v61 = vrot.slane %v2695_v1, 5  ;;  %v7008_v12 = vrot.slane %v2699_v44, 4  ;;  %v7010_v23 = vld [vmem:[#allocation3 + $0x20] sm:$0xf]  ;;  %v7014_v52 = vrot.slane %v2815_v56, 5  ;;  %5184 = vmatprep.subr.bf16.mxu1 %v5722_v18 }
 0x1e2   : > { %7526 = vst [vmem:[#allocation21_spill] sm:$0xff] %v6999_v13  ;;  %7527 = vst [vmem:[#allocation12_spill] sm:$0xff] %v7001_v19  ;;  %v2825_v5 = vshll.u32 %v2761_v31, 16  ;;  %v2829_v48 = vshrl.u32 %v2761_v31, 16  ;;  %v7016_v9 = vld [vmem:[#allocation3 + $0x24] sm:$0xf] }
 0x1e3   : > { %7528 = vst [vmem:[#allocation14_spill] sm:$0xff] %v7006_v61  ;;  %7529 = vst [vmem:[#allocation22_spill] sm:$0xff] %v7008_v12  ;;  %v7020_v1 = vrot.slane %v2819_v43, 4  ;;  %v7468_v44 = vrot.slane %v7010_v23, 5  ;;  %v7469_v36 = vrot.slane %v7016_v9, 5  ;;  %v7537_v12 = vld [vmem:[#allocation20_spill] sm:$0xff] }
 0x1e4   : > { %7530 = vst [vmem:[#allocation23_spill] sm:$0xff] %v7010_v23  ;;  %7531 = vst [vmem:[#allocation24_spill] sm:$0xff] %v7014_v52  ;;  %v2493_v33 = vld [vmem:[#allocation3 + $0x28] sm:$0xf]  ;;  %v7024_v28 = vrot.slane %v2825_v5, 5  ;;  %v7026_v56 = vrot.slane %v2829_v48, 4  ;;  %5185 = vmatpush3.bf16.msra.mxu1 %v5723_v60 }
 0x1e5   : > { %7532 = vst [vmem:[#allocation25_spill] sm:$0xff] %v7016_v9  ;;  %v2572_v31 = vshrl.u32 %v2493_v33, 16  ;;  %v2575_v13 = vshll.u32 %v2493_v33, 16  ;;  %v2605_v19 = vld [vmem:[#allocation3 + $0x28] sm:$0xf]  ;;  %v7032_v43 = vrot.slane %v7468_v44, 4  ;;  %5186 = vmatprep.subr.bf16.mxu1 %v5734_v10 }
 0x1e6   : > { %7533 = vst [vmem:[#allocation26_spill] sm:$0xff] %v7026_v56  ;;  %v7036_v61 = vrot.slane %v7469_v36, 4  ;;  %v2623_v51 = vld [vmem:[#allocation3 + $0x28] sm:$0xf]  ;;  %2614 = vst [vmem:[#allocation4 + $0x130] sm:$0xf] %v2605_v19 }
 0x1e7   : > { %7534 = vst [vmem:[#allocation27_spill] sm:$0xff] %v7032_v43  ;;  %v2744_v5 = vld [vmem:[#allocation3 + $0x28] sm:$0xf]  ;;  %v7536_v48 = vrot.slane %v6892_v29, 7  ;;  %v2574_v8 = vrot.slane %v2572_v31, 7  ;;  %v2705_v23 = vshll.u32 %v2623_v51, 16 }
 0x1e8   : > { %7535 = vst [vmem:[#allocation28_spill] sm:$0xff] %v7036_v61  ;;  %v2709_v44 = vshrl.u32 %v2623_v51, 16  ;;  %v2762_v43 = vld [vmem:[#allocation3 + $0x28] sm:$0xf]  ;;  %2753 = vst [vmem:[#allocation4 + $0x114] sm:$0xf] %v2744_v5 }
 0x1e9   : > { %v2322_v33 = vsel %vm6593_vm10, %v7537_v12, %v7536_v48  ;;  %v2835_v36 = vshll.u32 %v2762_v43, 16  ;;  %v2839_v61 = vshrl.u32 %v2762_v43, 16  ;;  %v7045_v9 = vld [vmem:[#allocation3 + $0x28] sm:$0xf]  ;;  %v5678_v19 = vld [vmem:[#allocation4 + $0x8] ss:$36 sps:$4 sm:$0xff]   ;;  %v7057_v5 = vor.u32 %v2575_v13, %v2574_v8 }
 0x1ea   : > { %2346 = vst [vmem:[#allocation4 + $0xb4] sm:$0xf] %v2322_v33  ;;  %v5691_v52 = vld [vmem:[#allocation5 + $0x180] sm:$0xff]   ;;  %v7538_v29 = vrot.slane %v6739_v6, 4  ;;  %v7539_v31 = vrot.slane %v6749_v63, 4  ;;  %v7059_v43 = vrot.slane %v2705_v23, 5 }
 0x1eb   : > { %v2711_v48 = vrot.slane %v2709_v44, 4  ;;  %v2917_v33 = vrot.slane %v7045_v9, 5  ;;  %v5680_v18 = vld [vmem:[#allocation4 + $0xc] ss:$36 sps:$4 sm:$0xff]   ;;  %v5735_v6 = vld [vmem:[#allocation5 + $0x138] sm:$0xff]   ;;  %v7541_v23 = vrot.slane %v6947_v40, 7 }
 0x1ec   : > { %v2420_v12 = vsel %vm6602_vm12, %v7538_v29, %v6916_v22  ;;  %v2542_v51 = vsel %vm6602_vm12, %v7539_v31, %v6926_v42  ;;  %v7062_v22 = vrot.slane %v2835_v36, 5  ;;  %v2841_v29 = vrot.slane %v2839_v61, 4  ;;  %v5685_v63 = vld [vmem:[#allocation4 + $0x4c] ss:$36 sps:$4 sm:$0xff]   ;;  %v5687_v56 = vld [vmem:[#allocation4 + $0x54] ss:$36 sps:$4 sm:$0xff]   ;;  %3891 = vmatprep.mubr.bf16.mxu0 %v5680_v18  ;;  %5187 = vmatpush3.bf16.msra.mxu1 %v5735_v6 }
 0x1ed   : > { %2462 = vst [vmem:[#allocation4 + $0xb8] sm:$0xf] %v2420_v12  ;;  %2592 = vst [vmem:[#allocation4 + $0x9c] sm:$0xf] %v2542_v51  ;;  %v7540_v42 = vrot.slane %v6894_v15, 7  ;;  %v2328_v60 = vsel %vm6593_vm10, %v6909_v47, %v7541_v23  ;;  %v2712_v10 = vor.u32 %v2711_v48, %v7059_v43  ;;  %v7077_v8 = vrot.slane %v2917_v33, 4  ;;  %3892 = vmatmul.mubr.bf16.vlgmr.msra.gmra.mrb[60].mxu0 %v5678_v19 }
 0x1ee   : > { %v5694_v61 = vld [vmem:[#allocation5 + $0x1c8] sm:$0xff]   ;;  %v2471_v44 = vld [vmem:[#allocation3 + $0x18] sm:$0xf]  ;;  %v2543_v15 = vrot.slane %v6918_v58, 4  ;;  %2348 = vst [vmem:[#allocation4 + $0xfc] sm:$0xf] %v2328_v60  ;;  %v2842_v47 = vor.u32 %v2841_v29, %v7062_v22  ;;  %3827 = vmatprep.mubr.bf16.mxu1 %v5685_v63  ;;  %v2668_v58 = vsel %vm6134_vm2, %v6881_v14, %v6928_v57  ;;  %3899 = vmatprep.mubr.bf16.mxu0 %v5687_v56 }
 0x1ef   : > { %v2325_v13 = vsel %vm6593_vm10, %v6905_v0, %v7540_v42  ;;  %v7542_v0 = vrot.slane %v6955_v30, 7  ;;  %2480 = vst [vmem:[#allocation4 + $0xbc] sm:$0xf] %v2471_v44  ;;  %v2421_v36 = vrot.slane %v6911_v25, 4  ;;  %v2430_v18 = vrot.slane %v6913_v11, 4  ;;  %3828 = vmatmul.mubr.bf16.gmra.mrb[44].mxu1 %v7543_v45  ;;  %5219 = vmatpush3.bf16.msra.mxu0 %v5691_v52  ;;  %v5695_v51 = vld [vmem:[#allocation5 + $0x188] sm:$0xff]  }
 0x1f0   : > { %2347 = vst [vmem:[#allocation4 + $0xd8] sm:$0xf] %v2325_v13  ;;  %v2472_v12 = vld [vmem:[#allocation3 + $0x1c] sm:$0xf]  ;;  %v2473_v31 = vld [vmem:[#allocation3 + $0x20] sm:$0xf]  ;;  %v2551_v25 = vsel %vm6602_vm12, %v2543_v15, %v6935_v27  ;;  %5220 = vmatprep.subr.bf16.mxu0 %v5694_v61  ;;  %v2798_v48 = vsel %vm6134_vm2, %v6886_v59, %v6945_v2  ;;  %v7546_v42 = vor.u32 %v6930_v20, %v6928_v57 }
 0x1f1   : > { %v2331_v40 = vsel %vm6593_vm10, %v6981_v41, %v7542_v0  ;;  %v7092_v30 = vrot.slane %v2712_v10, 4  ;;  %2481 = vst [vmem:[#allocation4 + $0xe0] sm:$0xf] %v2472_v12  ;;  %2482 = vst [vmem:[#allocation4 + $0x104] sm:$0xf] %v2473_v31  ;;  %v2552_v11 = vrot.slane %v6923_v38, 4  ;;  %v2429_v37 = vsel %vm6602_vm12, %v2421_v36, %v6921_v62 }
 0x1f2   : > { %2349 = vst [vmem:[#allocation4 + $0x120] sm:$0xf] %v2331_v40  ;;  %v2561_v41 = vrot.slane %v6990_v46, 4  ;;  %v2474_v19 = vld [vmem:[#allocation3 + $0x24] sm:$0xf]  ;;  %v2843_v14 = vrot.slane %v2842_v47, 4  ;;  %v2438_v27 = vsel %vm6602_vm12, %v2430_v18, %v6988_v50 }
 0x1f3   : > { %2731 = vst [vmem:[#allocation4 + $0x80] sm:$0xf] %v2668_v58  ;;  %2593 = vst [vmem:[#allocation4 + $0xc0] sm:$0xf] %v2551_v25  ;;  %v2439_v16 = vrot.slane %v6983_v4, 4  ;;  %v7109_v46 = vld [vmem:[#allocation4 + $0x90] sm:$0xff]  ;;  %v2560_v52 = vsel %vm6602_vm12, %v2552_v11, %v6997_v35  ;;  %5221 = vmatpush3.bf16.msra.mxu0 %v5695_v51 }
 0x1f4   : > { %2483 = vst [vmem:[#allocation4 + $0x128] sm:$0xf] %v2474_v19  ;;  %v5689_v38 = vld [vmem:[#allocation4 + $0x50] ss:$36 sps:$4 sm:$0xff]   ;;  %2463 = vst [vmem:[#allocation4 + $0xdc] sm:$0xf] %v2429_v37  ;;  %v2569_v62 = vsel %vm6602_vm12, %v2561_v41, %v7004_v3  ;;  %v2848_v59 = vsel %vm6134_vm2, %v2843_v14, %v7521_v55 }
 0x1f5   : > { %v5703_v56 = vld [vmem:[#allocation5 + $0x1d0] sm:$0xff]   ;;  %2464 = vst [vmem:[#allocation4 + $0x100] sm:$0xf] %v2438_v27  ;;  %v2570_v50 = vrot.slane %v6994_v39, 4  ;;  %v7544_v4 = vmov 0.0   ;;  %v2447_v35 = vsel %vm6602_vm12, %v2439_v16, %v6992_v7  ;;  %v7545_v39 = vor.u32 %v6951_v32, %v6945_v2  ;;  %v7138_v60 = vld [vmem:[#allocation5 + $0x1d8] sm:$0xff]   ;;  %3900 = vmatmul.mubr.bf16.gmra.mrb[64].mxu0 %v5689_v38 }
 0x1f6   : > { %5326 = vmatprep.subr.bf16.mxu1 %v7544_v4  ;;  %v2968_v6 = vld [vmem:[#allocation4 + $0xb4] sm:$0xff]  ;;  %2594 = vst [vmem:[#allocation4 + $0xe4] sm:$0xf] %v2560_v52  ;;  %2595 = vst [vmem:[#allocation4 + $0x108] sm:$0xf] %v2569_v62  ;;  %v2673_v13 = vrot.slane %v7546_v42, 4  ;;  %5222 = vmatprep.subr.bf16.mxu0 %v5703_v56 }
 0x1f7   : > { %v5696_v29 = vld [vmem:[#allocation4 + $0x94] ss:$36 sps:$4 sm:$0xff]   ;;  %v2803_v3 = vrot.slane %v7545_v39, 4  ;;  %2870 = vst [vmem:[#allocation4 + $0x64] sm:$0xf] %v2798_v48  ;;  %v4684_v23 = vcombine.low %v7109_v46, %v2968_v6  ;;  %v2578_v7 = vsel %vm6602_vm12, %v2570_v50, %v7057_v5  ;;  %v7547_v61 = vld [vmem:[#allocation15_spill] sm:$0xff] }
 0x1f8   : > { %v7123_v63 = vld [vmem:[#allocation5 + $0x190] sm:$0xff]   ;;  %2465 = vst [vmem:[#allocation4 + $0x124] sm:$0xf] %v2447_v35  ;;  %v2740_v2 = vld [vmem:[#allocation3 + $0x18] sm:$0xf]  ;;  %v2718_v57 = vsel %vm6134_vm2, %v7092_v30, %v7547_v61  ;;  %v7548_v44 = vrot.slane %v6932_v21, 5  ;;  %3835 = vmatprep.mubr.bf16.mxu1 %v5696_v29  ;;  %v2678_v5 = vsel %vm6134_vm2, %v2673_v13, %v6937_v26  ;;  %v7549_v21 = vor.u32 %v6939_v49, %v6937_v26 }
 0x1f9   : > { %v2601_v32 = vld [vmem:[#allocation3 + $0x18] sm:$0xf]  ;;  %v2602_v10 = vld [vmem:[#allocation3 + $0x1c] sm:$0xf]  ;;  %2875 = vst [vmem:[#allocation4 + $0x118] sm:$0xf] %v2848_v59  ;;  %v2808_v53 = vsel %vm6134_vm2, %v2803_v3, %v6959_v54  ;;  %3836 = vmatmul.mubr.bf16.gmra.mrb[48].mxu1 %v4684_v23  ;;  %5223 = vmatpush3.bf16.msra.mxu0 %v7123_v63 }
 0x1fa   : > { %v7147_v20 = vld [vmem:[#allocation3 + $0x30] sm:$0x1]  ;;  %v2906_v15 = vsel %vm6513_vm5, %v6784_v34, %v7548_v44  ;;  %2596 = vst [vmem:[#allocation4 + $0x12c] sm:$0xf] %v2578_v7  ;;  %2749 = vst [vmem:[#allocation4 + $0x84] sm:$0xf] %v2740_v2  ;;  %5224 = vmatprep.subr.bf16.mxu0 %v7138_v60 }
 0x1fb   : > { %2610 = vst [vmem:[#allocation4 + $0xa0] sm:$0xf] %v2601_v32  ;;  %2611 = vst [vmem:[#allocation4 + $0xc4] sm:$0xf] %v2602_v10  ;;  %v2683_v0 = vrot.slane %v7549_v21, 4  ;;  %v7550_v47 = vld [vmem:[#allocation19_spill] sm:$0xff] }
 0x1fc   : > { %v2741_v40 = vld [vmem:[#allocation3 + $0x1c] sm:$0xf]  ;;  %v2742_v34 = vld [vmem:[#allocation3 + $0x20] sm:$0xf]  ;;  %v7551_v36 = vor.u32 %v7550_v47, %v6959_v54  ;;  %2736 = vst [vmem:[#allocation4 + $0x134] sm:$0xf] %v2718_v57 }
 0x1fd   : > { %2936 = vst [vmem:[#allocation4 + $0x68] sm:$0xf] %v2906_v15  ;;  %2871 = vst [vmem:[#allocation4 + $0x88] sm:$0xf] %v2808_v53  ;;  %v7552_v12 = vld [vmem:[#allocation24_spill] sm:$0xff]  ;;  %v7555_v45 = vld [vmem:[#allocation21_spill] sm:$0xff] }
 0x1fe   : > { %v2813_v18 = vrot.slane %v7551_v36, 4  ;;  %2732 = vst [vmem:[#allocation4 + $0xa4] sm:$0xf] %v2678_v5  ;;  %2750 = vst [vmem:[#allocation4 + $0xa8] sm:$0xf] %v2741_v40  ;;  %v7553_v31 = vor.u32 %v7020_v1, %v7552_v12  ;;  %v7554_v49 = vld [vmem:[#allocation12_spill] sm:$0xff]  ;;  %v2688_v46 = vsel %vm6134_vm2, %v2683_v0, %v7555_v45 }
 0x1ff   : > { %2751 = vst [vmem:[#allocation4 + $0xcc] sm:$0xf] %v2742_v34  ;;  %v2603_v30 = vld [vmem:[#allocation3 + $0x20] sm:$0xf]  ;;  %v2604_v26 = vld [vmem:[#allocation3 + $0x24] sm:$0xf]  ;;  %v7556_v25 = vor.u32 %v7554_v49, %v7555_v45 }
 0x200   : > { %v2823_v58 = vrot.slane %v7553_v31, 4  ;;  %v7557_v41 = vld [vmem:[#allocation16_spill] sm:$0xff]  ;;  %v7559_v19 = vld [vmem:[#allocation18_spill] sm:$0xff]  ;;  %v7560_v51 = vld [vmem:[#allocation23_spill] sm:$0xff]  ;;  %v2818_v56 = vsel %vm6134_vm2, %v2813_v18, %v7552_v12  ;;  %2612 = vst [vmem:[#allocation4 + $0xe8] sm:$0xf] %v2603_v30 }
 0x201   : > { %v2693_v11 = vrot.slane %v7556_v25, 4  ;;  %v7558_v54 = vrot.slane %v7557_v41, 5  ;;  %v7561_v37 = vrot.slane %v7560_v51, 5  ;;  %v7562_v27 = vld [vmem:[#allocation11_spill] sm:$0xff]  ;;  %v5708_v1 = vld [vmem:[#allocation5 + $0x198] sm:$0xff]   ;;  %v7563_v52 = vld [vmem:[#allocation22_spill] sm:$0xff] }
 0x202   : > { %2613 = vst [vmem:[#allocation4 + $0x10c] sm:$0xf] %v2604_v26  ;;  %v7564_v62 = vld [vmem:[#allocation14_spill] sm:$0xff]  ;;  %v2743_v6 = vld [vmem:[#allocation3 + $0x24] sm:$0xf]  ;;  %v7566_v29 = vld [vmem:[#allocation25_spill] sm:$0xff]  ;;  %v2828_v42 = vsel %vm6134_vm2, %v2823_v58, %v7024_v28  ;;  %5225 = vmatpush3.bf16.msra.mxu0 %v5708_v1 }
 0x203   : > { %v2909_v14 = vsel %vm6513_vm5, %v7559_v19, %v7558_v54  ;;  %v2912_v16 = vsel %vm6513_vm5, %v7562_v27, %v7561_v37  ;;  %v7565_v50 = vor.u32 %v7563_v52, %v7564_v62  ;;  %v7567_v35 = vrot.slane %v7566_v29, 5  ;;  %v7568_v38 = vld [vmem:[#allocation27_spill] sm:$0xff]  ;;  %v5698_v3 = vld [vmem:[#allocation4 + $0x9c] ss:$36 sps:$4 sm:$0xff]   ;;  %2733 = vst [vmem:[#allocation4 + $0xc8] sm:$0xf] %v2688_v46 }
 0x204   : > { %2937 = vst [vmem:[#allocation4 + $0x8c] sm:$0xf] %v2909_v14  ;;  %2938 = vst [vmem:[#allocation4 + $0xb0] sm:$0xf] %v2912_v16  ;;  %v2698_v13 = vsel %vm6134_vm2, %v2693_v11, %v7564_v62  ;;  %v7569_v59 = vld [vmem:[#allocation26_spill] sm:$0xff]  ;;  %v2978_v23 = vld [vmem:[#allocation4 + $0xfc] sm:$0xff]  ;;  %3907 = vmatprep.mubr.bf16.mxu0 %v5698_v3 }
 0x205   : > { %v2703_v48 = vrot.slane %v7565_v50, 4  ;;  %v2915_v39 = vsel %vm6513_vm5, %v7568_v38, %v7567_v35  ;;  %2872 = vst [vmem:[#allocation4 + $0xac] sm:$0xf] %v2818_v56  ;;  %2752 = vst [vmem:[#allocation4 + $0xf0] sm:$0xf] %v2743_v6  ;;  %v7570_v7 = vor.u32 %v7569_v59, %v7024_v28  ;;  %v5714_v61 = vld [vmem:[#allocation5 + $0x1e0] sm:$0xff]  }
 0x206   : > { %2939 = vst [vmem:[#allocation4 + $0xd4] sm:$0xf] %v2915_v39  ;;  %v2886_v32 = vld [vmem:[#allocation3 + $0x30] sm:$0x1]  ;;  %2873 = vst [vmem:[#allocation4 + $0xd0] sm:$0xf] %v2828_v42  ;;  %5226 = vmatprep.subr.bf16.mxu0 %v5714_v61 }
 0x207   : > { %v2833_v2 = vrot.slane %v7570_v7, 4  ;;  %v5709_v10 = vld [vmem:[#allocation4 + $0xdc] ss:$36 sps:$4 sm:$0xff]   ;;  %v2708_v57 = vsel %vm6134_vm2, %v2703_v48, %v7059_v43  ;;  %2734 = vst [vmem:[#allocation4 + $0xec] sm:$0xf] %v2698_v13  ;;  %v2855_v44 = vshll.u32 %v7147_v20, 16 }
 0x208   : > { %v7571_v15 = vld [vmem:[#allocation28_spill] sm:$0xff]  ;;  %2735 = vst [vmem:[#allocation4 + $0x110] sm:$0xf] %v2708_v57  ;;  %v7572_v5 = vld [vmem:[#allocation17_spill] sm:$0xff]  ;;  %3843 = vmatprep.mubr.bf16.mxu1 %v5709_v10  ;;  %v5711_v36 = vld [vmem:[#allocation4 + $0xe4] ss:$36 sps:$4 sm:$0xff]  }
 0x209   : > { %v2918_v28 = vsel %vm6513_vm5, %v7571_v15, %v2917_v33  ;;  %v5701_v53 = vld [vmem:[#allocation4 + $0x98] ss:$36 sps:$4 sm:$0xff]   ;;  %v2838_v63 = vsel %vm6134_vm2, %v2833_v2, %v7062_v22  ;;  %v7573_v43 = vor.u32 %v7572_v5, %v7521_v55  ;;  %v2983_v34 = vld [vmem:[#allocation4 + $0x120] sm:$0xff]  ;;  %v2857_v47 = vrot.slane %v2855_v44, 5  ;;  %v5719_v31 = vld [vmem:[#allocation5 + $0x1e8] sm:$0xff]  }
 0x20a   : > { %v7574_v20 = vld [vmem:[#allocation13_spill] sm:$0xff]  ;;  %2940 = vst [vmem:[#allocation4 + $0xf8] sm:$0xf] %v2918_v28  ;;  %2874 = vst [vmem:[#allocation4 + $0xf4] sm:$0xf] %v2838_v63  ;;  %v2923_v22 = vrot.slane %v2886_v32, 5  ;;  %v4703_v18 = vcombine.high %v2983_v34, %v2983_v34  ;;  %3908 = vmatmul.mubr.bf16.gmra.mrb[68].mxu0 %v5701_v53  ;;  %v4702_v24 = vcombine.low %v2983_v34, %v2983_v34 }
 0x20b   : > { %v2853_v21 = vrot.slane %v7573_v43, 4  ;;  %v7575_v0 = vrot.slane %v7574_v20, 5  ;;  %v2973_v60 = vld [vmem:[#allocation4 + $0xd8] sm:$0xff]  ;;  %v5717_v12 = vld [vmem:[#allocation5 + $0x1a0] sm:$0xff]   ;;  %3915 = vmatprep.mubr.bf16.mxu0 %v5711_v36  ;;  %v5721_v30 = vld [vmem:[#allocation5 + $0x1a8] sm:$0xff]  }
 0x20c   : > { %v4693_v55 = vcombine.low %v2973_v60, %v2978_v23  ;;  %5227 = vmatpush3.bf16.msra.mxu0 %v5717_v12  ;;  %v2984_v26 = vld [vmem:[#allocation4 + $0x128] sm:$0xff]  ;;  %v5726_v49 = vld [vmem:[#allocation5 + $0x1f0] sm:$0xff]   ;;  %v5713_v45 = vld [vmem:[#allocation4 + $0xe0] ss:$36 sps:$4 sm:$0xff]  }
 0x20d   : > { %v2921_v9 = vsel %vm6513_vm5, %v7077_v8, %v7575_v0  ;;  %v7576_v33 = vmov %v7575_v0  ;;  %v2858_v8 = vsel %vm6134_vm2, %v2853_v21, %v2857_v47  ;;  %5228 = vmatprep.subr.bf16.mxu0 %v5719_v31  ;;  %v4705_v25 = vcombine.high %v2984_v26, %v2984_v26  ;;  %v5730_v11 = vld [vmem:[#allocation5 + $0x1b0] sm:$0xff]   ;;  %v5736_v41 = vld [vmem:[#allocation5 + $0x1f8] sm:$0xff]   ;;  %v5742_v14 = vld [vmem:[#allocation5 + $0x200] sm:$0xff]  }
 0x20e   : > { %v2922_v40 = vrot.slane %v7576_v33, 4  ;;  %2941 = vst [vmem:[#allocation4 + $0x11c] sm:$0xf] %v2921_v9  ;;  %2876 = vst [vmem:[#allocation4 + $0x13c] sm:$0xf] %v2858_v8  ;;  %3844 = vmatmul.mubr.bf16.gmra.mrb[52].mxu1 %v4693_v55  ;;  %v5737_v54 = vld [vmem:[#allocation5 + $0x1b8] sm:$0xff]   ;;  %v4704_v19 = vcombine.low %v2984_v26, %v2984_v26 }
 0x20f   : > { %3851 = vmatprep.mubr.bf16.mxu1 %v4703_v18  ;;  %v5729_v17 = vld [vmem:[#allocation4 + $0x14] ss:$36 sps:$4 sm:$0xff]   ;;  %v5733_v37 = vld [vmem:[#allocation4 + $0x1c] ss:$36 sps:$4 sm:$0xff]   ;;  %v5743_v16 = vld [vmem:[#allocation5 + $0x208] sm:$0xff]  }
 0x210   : > { %v2924_v58 = vsel %vm6513_vm5, %v2922_v40, %v2923_v22  ;;  %5229 = vmatpush3.bf16.msra.mxu0 %v5721_v30  ;;  %v5727_v51 = vld [vmem:[#allocation4 + $0x10] ss:$36 sps:$4 sm:$0xff]   ;;  %v5738_v27 = vld [vmem:[#allocation4 + $0x5c] ss:$36 sps:$4 sm:$0xff]   ;;  %v5740_v62 = vld [vmem:[#allocation4 + $0x64] ss:$36 sps:$4 sm:$0xff]  }
 0x211   : > { %2942 = vst [vmem:[#allocation4 + $0x140] sm:$0xf] %v2924_v58  ;;  %5230 = vmatprep.subr.bf16.mxu0 %v5726_v49  ;;  %v2960_v1 = vld [vmem:[#allocation4 + $0x7c] sm:$0xff]  ;;  %v5749_v52 = vld [vmem:[#allocation5 + $0x210] sm:$0xff]   ;;  %v7239_v48 = vld [vmem:[%s7429_s6] sm:$0xff]  }
 0x212   : > { %3916 = vmatmul.mubr.bf16.gmra.mrb[72].mxu0 %v5713_v45  ;;  %v5731_v46 = vld [vmem:[#allocation4 + $0x18] ss:$36 sps:$4 sm:$0xff]   ;;  %v5745_v6 = vld [vmem:[#allocation4 + $0xa4] ss:$36 sps:$4 sm:$0xff]   ;;  %v7246_v35 = vld [vmem:[%s7429_s6 + $0x8] sm:$0xff]  }
 0x213   : > { %3923 = vmatprep.mubr.bf16.mxu0 %v4705_v25  ;;  %v2955_v56 = vld [vmem:[#allocation4 + $0x58] sm:$0xff]  ;;  %v2970_v38 = vld [vmem:[#allocation4 + $0xc4] sm:$0xff]  ;;  %v5747_v13 = vld [vmem:[#allocation4 + $0xac] ss:$36 sps:$4 sm:$0xff]  }
 0x214   : > { %5231 = vmatpush3.bf16.msra.mxu0 %v5730_v11  ;;  %v4679_v50 = vcombine.low %v2955_v56, %v2960_v1  ;;  %v5752_v29 = vld [vmem:[#allocation5 + $0x218] sm:$0xff]   ;;  %v5758_v42 = vld [vmem:[#allocation5 + $0x220] sm:$0xff]   ;;  %v5753_v2 = vld [vmem:[#allocation4 + $0xec] ss:$36 sps:$4 sm:$0xff]  }
 0x215   : > { %5232 = vmatprep.subr.bf16.mxu0 %v5736_v41  ;;  %v5744_v39 = vld [vmem:[#allocation4 + $0x60] ss:$36 sps:$4 sm:$0xff]   ;;  %v7254_v7 = vld [vmem:[%s7429_s6 + $0x10] sm:$0xff]   ;;  %v5764_v32 = vld [vmem:[#allocation5 + $0x228] sm:$0xff]  }
 0x216   : > { %3852 = vmatmul.mubr.bf16.gmra.mrb[56].mxu1 %v4702_v24  ;;  %v2965_v3 = vld [vmem:[#allocation4 + $0xa0] sm:$0xff]  ;;  %v2985_v10 = vld [vmem:[#allocation4 + $0x130] sm:$0xff]  ;;  %v5751_v61 = vld [vmem:[#allocation4 + $0xa8] ss:$36 sps:$4 sm:$0xff]  }
 0x217   : > { %3963 = vmatprep.mubr.bf16.mxu1 %v5729_v17  ;;  %v4688_v59 = vcombine.low %v2965_v3, %v2970_v38  ;;  %v5763_v23 = vld [vmem:[%s7429_s6 + $0x18] sm:$0xff]   ;;  %v5766_v57 = vld [vmem:[#allocation5 + $0x230] sm:$0xff]   ;;  %v5760_v15 = vld [vmem:[#allocation4 + $0xe8] ss:$36 sps:$4 sm:$0xff]   ;;  %v4707_v53 = vcombine.high %v2985_v10, %v2985_v10  ;;  %v4706_v0 = vcombine.low %v2985_v10, %v2985_v10 }
 0x218   : > { %5233 = vmatpush3.bf16.msra.mxu0 %v5737_v54  ;;  %v5755_v44 = vld [vmem:[#allocation4 + $0xf4] ss:$36 sps:$4 sm:$0xff]   ;;  %v5765_v28 = vld [vmem:[%s7429_s6 + $0x20] sm:$0xff]   ;;  %v5771_v5 = vld [vmem:[#allocation5 + $0x238] sm:$0xff]  }
 0x219   : > { %5362 = vmatprep.subr.bf16.mxu0 %v7544_v4  ;;  %v2986_v63 = vld [vmem:[#allocation4 + $0x138] sm:$0xff]  ;;  %v5769_v43 = vld [vmem:[%s7429_s6 + $0x28] sm:$0xff]   ;;  %v5774_v33 = vld [vmem:[%s7429_s6 + $0x38] sm:$0xff]  }
 0x21a   : > { %3924 = vmatmul.mubr.bf16.gmra.mrb[76].mxu0 %v4704_v19  ;;  %v4709_v21 = vcombine.high %v2986_v63, %v2986_v63  ;;  %v5761_v20 = vld [vmem:[#allocation4 + $0xf0] ss:$36 sps:$4 sm:$0xff]   ;;  %v5772_v9 = vld [vmem:[%s7429_s6 + $0x30] sm:$0xff]   ;;  %v4708_v40 = vcombine.low %v2986_v63, %v2986_v63  ;;  %v5773_v60 = vld [vmem:[#allocation4 + $0x20] ss:$36 sps:$4 sm:$0xff]  }
 0x21b   : > { %4035 = vmatprep.mubr.bf16.mxu0 %v5733_v37  ;;  %v5775_v34 = vld [vmem:[%s6115_s24 + $0x90] sm:$0xff]   ;;  %v5776_v47 = vld [vmem:[#allocation4 + $0x68] ss:$36 sps:$4 sm:$0xff]   ;;  %v5777_v22 = vld [vmem:[%s6115_s24 + $0x98] sm:$0xff]  }
 0x21c   : > { %v5778_v36 = vld [vmem:[#allocation4 + $0xb0] ss:$36 sps:$4 sm:$0xff]   ;;  %v5779_v55 = vld [vmem:[#allocation4 + $0xf8] ss:$36 sps:$4 sm:$0xff]   ;;  %v5780_v18 = vld [vmem:[#allocation4 + $0x140] ss:$0 sps:$4 sm:$0xff]  }
 0x21d   : > { %v5781_v12 = vld [vmem:[%s6115_s24 + $0xa0] sm:$0xff]   ;;  %v5782_v31 = vld [vmem:[%s6115_s24 + $0xa8] sm:$0xff]   ;;  %v5783_v8 = vld [vmem:[%s6115_s24 + $0xb0] ss:$0 sps:$4 sm:$0xff]   ;;  %s5818_s24 = scalar_lea.vmem %s5817_s23, 1152 }
 0x21e   : > { %3964 = vmatmul.mubr.bf16.vlgmr.msra.gmra.mrb[60].mxu1 %v5727_v51  ;;  %v7320_v11 = vld [vmem:[%s7428_s5] ss:$0 sm:$0xff]  ;;  %p5820_p3 = scmp.lt.s32.totalorder %s5818_s24, %s5812_s22 }
 0x21f   : > { %3971 = vmatprep.mubr.bf16.mxu1 %v5738_v27  ;;  %5327 = vmatpush3.bf16.msra.mxu1 %v5742_v14 }
 0x220   : > { %5328 = vmatprep.subr.bf16.mxu1 %v7544_v4  ;;  %p5821_p4 = por %p5820_p3, %p5819_p2 }
 0x222   : > { %4036 = vmatmul.mubr.bf16.vlgmr.msra.gmra.mrb[80].mxu0 %v5731_v46  ;;  %p5822_p7 = pnand %p5821_p4, %p5815_p12 }
 0x223   : > { %5329 = vmatpush3.bf16.msra.mxu1 %v5743_v16  ;;  %4043 = vmatprep.mubr.bf16.mxu0 %v5740_v62 }
 0x224   : > { %5330 = vmatprep.subr.bf16.mxu1 %v7544_v4  ;;  %5363 = vmatpush3.bf16.msra.mxu0 %v7239_v48 }
 0x225   : > { %5364 = vmatprep.subr.bf16.mxu0 %v7544_v4 }
 0x226   : > { %3972 = vmatmul.mubr.bf16.gmra.mrb[64].mxu1 %v4679_v50 }
 0x227   : > { %3979 = vmatprep.mubr.bf16.mxu1 %v5745_v6  ;;  %5331 = vmatpush3.bf16.msra.mxu1 %v5749_v52 }
 0x228   : > { %5332 = vmatprep.subr.bf16.mxu1 %v7544_v4  ;;  %5365 = vmatpush3.bf16.msra.mxu0 %v7246_v35 }
 0x229   : > { %5366 = vmatprep.subr.bf16.mxu0 %v7544_v4 }
 0x22a   : > { %4044 = vmatmul.mubr.bf16.gmra.mrb[84].mxu0 %v5744_v39 }
 0x22b   : > { %5333 = vmatpush3.bf16.msra.mxu1 %v5752_v29  ;;  %4051 = vmatprep.mubr.bf16.mxu0 %v5747_v13 }
 0x22c   : > { %5334 = vmatprep.subr.bf16.mxu1 %v7544_v4  ;;  %5367 = vmatpush3.bf16.msra.mxu0 %v7254_v7 }
 0x22d   : > { %5368 = vmatprep.subr.bf16.mxu0 %v7544_v4 }
 0x22e   : > { %3980 = vmatmul.mubr.bf16.gmra.mrb[68].mxu1 %v4688_v59 }
 0x22f   : > { %3987 = vmatprep.mubr.bf16.mxu1 %v5753_v2  ;;  %5335 = vmatpush3.bf16.msra.mxu1 %v5758_v42 }
 0x230   : > { %5336 = vmatprep.subr.bf16.mxu1 %v7544_v4  ;;  %5369 = vmatpush3.bf16.msra.mxu0 %v5763_v23 }
 0x231   : > { %5370 = vmatprep.subr.bf16.mxu0 %v7544_v4 }
 0x232   : > { %4052 = vmatmul.mubr.bf16.gmra.mrb[88].mxu0 %v5751_v61 }
 0x233   : > { %5337 = vmatpush3.bf16.msra.mxu1 %v5764_v32  ;;  %4059 = vmatprep.mubr.bf16.mxu0 %v5755_v44 }
 0x234   : > { %5338 = vmatprep.subr.bf16.mxu1 %v7544_v4  ;;  %5371 = vmatpush3.bf16.msra.mxu0 %v5765_v28 }
 0x235   : > { %5372 = vmatprep.subr.bf16.mxu0 %v7544_v4 }
 0x236   : > { %3988 = vmatmul.mubr.bf16.gmra.mrb[72].mxu1 %v5760_v15 }
 0x237   : > { %3995 = vmatprep.mubr.bf16.mxu1 %v4707_v53  ;;  %5339 = vmatpush3.bf16.msra.mxu1 %v5766_v57 }
 0x238   : > { %5340 = vmatprep.subr.bf16.mxu1 %v7544_v4  ;;  %5373 = vmatpush3.bf16.msra.mxu0 %v5769_v43 }
 0x239   : > { %5374 = vmatprep.subr.bf16.mxu0 %v7544_v4 }
 0x23a   : > { %4060 = vmatmul.mubr.bf16.gmra.mrb[92].mxu0 %v5761_v20 }
 0x23b   : > { %5341 = vmatpush3.bf16.msra.mxu1 %v5771_v5  ;;  %4067 = vmatprep.mubr.bf16.mxu0 %v4709_v21 }
 0x23c   : > { %5398 = vmatprep.subr.bf16.mxu1 %v7544_v4  ;;  %5375 = vmatpush3.bf16.msra.mxu0 %v5772_v9 }
 0x23d   : > { %5376 = vmatprep.subr.bf16.mxu0 %v7544_v4 }
 0x23e   : > { %3996 = vmatmul.mubr.bf16.gmra.mrb[76].mxu1 %v4706_v0 }
 0x23f   : > { %5342 = vmatprep.mubr.msk.bf16.mxu1 %vm5885_vm6, %v7544_v4 }
 0x240   : > { %5377 = vmatpush3.bf16.msra.mxu0 %v5774_v33 }
 0x242   : > { %4068 = vmatmul.mubr.bf16.gmra.mrb[96].mxu0 %v4708_v40 }
 0x243   : > { %5378 = vmatprep.mubr.msk.bf16.mxu0 %vm5885_vm6, %v7544_v4 }
 0x246   : > { %5343 = vmatmul.mubr.bf16.vlgmr.msra.gmra.mrb[80].mxu1 %v5773_v60 }
 0x247   : > { %5406 = vmatpush3.bf16.msra.mxu1 %v7239_v48  ;;  %5346 = vmatprep.mubr.msk.bf16.mxu1 %vm5885_vm6, %v7544_v4 }
 0x248   : > { %5399 = vmatprep.subr.bf16.mxu1 %v7544_v4 }
 0x24a   : > { %5379 = vmatmul.mubr.bf16.vlgmr.msra.gmra.mrb[100].mxu0 %v5775_v34 }
 0x24b   : > { %5407 = vmatpush3.bf16.msra.mxu1 %v7246_v35  ;;  %5382 = vmatprep.mubr.msk.bf16.mxu0 %vm5885_vm6, %v7544_v4 }
 0x24c   : > { %5400 = vmatprep.subr.bf16.mxu1 %v7544_v4 }
 0x24e   : > { %5347 = vmatmul.mubr.bf16.gmra.mrb[84].mxu1 %v5776_v47 }
 0x24f   : > { %5408 = vmatpush3.bf16.msra.mxu1 %v7254_v7  ;;  %5350 = vmatprep.mubr.msk.bf16.mxu1 %vm5885_vm6, %v7544_v4 }
 0x250   : > { %5401 = vmatprep.subr.bf16.mxu1 %v7544_v4 }
 0x252   : > { %5383 = vmatmul.mubr.bf16.gmra.mrb[104].mxu0 %v5777_v22 }
 0x253   : > { %5409 = vmatpush3.bf16.msra.mxu1 %v5763_v23 }
 0x254   : > { %5402 = vmatprep.subr.bf16.mxu1 %v7544_v4 }
 0x256   : > { %5351 = vmatmul.mubr.bf16.gmra.mrb[88].mxu1 %v5778_v36 }
 0x257   : > { %5410 = vmatpush3.bf16.msra.mxu1 %v5765_v28  ;;  %5354 = vmatprep.mubr.msk.bf16.mxu1 %vm5885_vm6, %v7544_v4 }
 0x258   : > { %5403 = vmatprep.subr.bf16.mxu1 %v7544_v4 }
 0x25b   : > { %5411 = vmatpush3.bf16.msra.mxu1 %v5769_v43 }
 0x25c   : > { %5404 = vmatprep.subr.bf16.mxu1 %v7544_v4 }
 0x25e   : > { %5355 = vmatmul.mubr.bf16.gmra.mrb[92].mxu1 %v5779_v55 }
 0x25f   : > { %5358 = vmatprep.mubr.msk.bf16.mxu1 %vm5885_vm6, %v7544_v4  ;;  %5412 = vmatpush3.bf16.msra.mxu1 %v5772_v9 }
 0x260   : > { %5405 = vmatprep.subr.bf16.mxu1 %v7544_v4 }
 0x263   : > { %5413 = vmatpush3.bf16.msra.mxu1 %v5774_v33 }
 0x266   : > { %5359 = vmatmul.mubr.bf16.gmra.mrb[96].mxu1 %v5780_v18 }
 0x267   : > { %5386 = vmatprep.mubr.msk.bf16.mxu1 %vm5885_vm6, %v7544_v4 }
 0x26e   : > { %5387 = vmatmul.mubr.bf16.vlgmr.msra.gmra.mrb[88].mxu1 %v5781_v12 }
 0x26f   : > { %5390 = vmatprep.mubr.msk.bf16.mxu1 %vm5885_vm6, %v7544_v4 }
 0x276   : > { %5391 = vmatmul.mubr.bf16.gmra.mrb[92].mxu1 %v5782_v31 }
 0x277   : > { %5394 = vmatprep.mubr.msk.bf16.mxu1 %vm5885_vm6, %v7544_v4 }
 0x27e   : > { %5395 = vmatmul.mubr.bf16.gmra.mrb[96].mxu1 %v5783_v8 }
 0x29d   : > { %v5096_v58 = vpop.f32.mrb[40].mxu1 }
 0x29e   : > { %v5097_v30 = vpop.f32.mrb[41].mxu1 }
 0x29f   : > { %v5098_v26 = vadd.f32 %v5097_v30, %v5096_v58  ;;  %v5099_v49 = vpop.f32.mrb[42].mxu1 }
 0x2a0   : > { %v5100_v45 = vpop.f32.mrb[43].mxu1 }
 0x2a1   : > { %v5101_v25 = vadd.f32 %v5100_v45, %v5099_v49  ;;  %v3822_v41 = vadd.f32 %v5098_v26, %v7320_v11 }
 0x2a3   : > { %v3825_v14 = vadd.f32 %v5101_v25, %v7320_v11 }
 0x2c0   : > { %v5142_v24 = vpop.f32.mrb[60].mxu0 }
 0x2c1   : > { %v5143_v17 = vpop.f32.mrb[61].mxu0 }
 0x2c2   : > { %v5102_v54 = vpop.f32.mrb[44].mxu1  ;;  %v5144_v19 = vadd.f32 %v5143_v17, %v5142_v24  ;;  %v5145_v4 = vpop.f32.mrb[62].mxu0 }
 0x2c3   : > { %v5103_v51 = vpop.f32.mrb[45].mxu1  ;;  %v5146_v37 = vpop.f32.mrb[63].mxu0 }
 0x2c4   : > { %v5104_v27 = vadd.f32 %v5103_v51, %v5102_v54  ;;  %v5105_v16 = vpop.f32.mrb[46].mxu1  ;;  %v7324_v1 = vadd.f32 %v5144_v19, %v3822_v41  ;;  %v5147_v46 = vadd.f32 %v5146_v37, %v5145_v4 }
 0x2c5   : > { %v5106_v56 = vpop.f32.mrb[47].mxu1 }
 0x2c6   : > { %v5107_v52 = vadd.f32 %v5106_v56, %v5105_v16  ;;  %v3897_v62 = vadd.f32 %v5147_v46, %v3825_v14  ;;  %v3830_v48 = vadd.f32 %v5104_v27, %v7320_v11 }
 0x2c8   : > { %v5148_v50 = vpop.f32.mrb[64].mxu0  ;;  %v3833_v39 = vadd.f32 %v5107_v52, %v7320_v11 }
 0x2c9   : > { %v5149_v6 = vpop.f32.mrb[65].mxu0 }
 0x2ca   : > { %v5150_v35 = vadd.f32 %v5149_v6, %v5148_v50  ;;  %v5151_v38 = vpop.f32.mrb[66].mxu0 }
 0x2cb   : > { %v5152_v42 = vpop.f32.mrb[67].mxu0 }
 0x2cc   : > { %v5108_v29 = vpop.f32.mrb[48].mxu1  ;;  %v7328_v7 = vadd.f32 %v5150_v35, %v3830_v48  ;;  %v5153_v2 = vadd.f32 %v5152_v42, %v5151_v38 }
 0x2cd   : > { %v5109_v3 = vpop.f32.mrb[49].mxu1 }
 0x2ce   : > { %v5110_v13 = vadd.f32 %v5109_v3, %v5108_v29  ;;  %v5111_v59 = vpop.f32.mrb[50].mxu1  ;;  %v3905_v10 = vadd.f32 %v5153_v2, %v3833_v39 }
 0x2cf   : > { %v5112_v32 = vpop.f32.mrb[51].mxu1 }
 0x2d0   : > { %v5113_v23 = vadd.f32 %v5112_v32, %v5111_v59  ;;  %v3838_v57 = vadd.f32 %v5110_v13, %v7320_v11 }
 0x2d2   : > { %v3841_v63 = vadd.f32 %v5113_v23, %v7320_v11 }
 0x2dd   : > { %v5154_v61 = vpop.f32.mrb[68].mxu0 }
 0x2de   : > { %v5155_v44 = vpop.f32.mrb[69].mxu0 }
 0x2df   : > { %v5156_v28 = vadd.f32 %v5155_v44, %v5154_v61  ;;  %v5157_v53 = vpop.f32.mrb[70].mxu0 }
 0x2e0   : > { %v5158_v43 = vpop.f32.mrb[71].mxu0 }
 0x2e1   : > { %v5114_v15 = vpop.f32.mrb[52].mxu1  ;;  %v7332_v0 = vadd.f32 %v5156_v28, %v3838_v57  ;;  %v5159_v9 = vadd.f32 %v5158_v43, %v5157_v53 }
 0x2e2   : > { %v5115_v5 = vpop.f32.mrb[53].mxu1 }
 0x2e3   : > { %v5116_v21 = vadd.f32 %v5115_v5, %v5114_v15  ;;  %v5117_v20 = vpop.f32.mrb[54].mxu1  ;;  %v3913_v60 = vadd.f32 %v5159_v9, %v3841_v63 }
 0x2e4   : > { %v5118_v33 = vpop.f32.mrb[55].mxu1 }
 0x2e5   : > { %v5119_v40 = vadd.f32 %v5118_v33, %v5117_v20  ;;  %v5160_v34 = vpop.f32.mrb[72].mxu0  ;;  %v3846_v47 = vadd.f32 %v5116_v21, %v7320_v11 }
 0x2e6   : > { %v5161_v22 = vpop.f32.mrb[73].mxu0 }
 0x2e7   : > { %v5162_v55 = vadd.f32 %v5161_v22, %v5160_v34  ;;  %v5163_v18 = vpop.f32.mrb[74].mxu0  ;;  %v3849_v12 = vadd.f32 %v5119_v40, %v7320_v11 }
 0x2e8   : > { %v5164_v8 = vpop.f32.mrb[75].mxu0 }
 0x2e9   : > { %v5120_v36 = vpop.f32.mrb[56].mxu1  ;;  %v7336_v26 = vadd.f32 %v5162_v55, %v3846_v47  ;;  %v5165_v49 = vadd.f32 %v5164_v8, %v5163_v18 }
 0x2ea   : > { %v5121_v31 = vpop.f32.mrb[57].mxu1 }
 0x2eb   : > { %v5122_v58 = vadd.f32 %v5121_v31, %v5120_v36  ;;  %v5123_v30 = vpop.f32.mrb[58].mxu1  ;;  %v7338_v25 = vadd.f32 %v5165_v49, %v3849_v12 }
 0x2ec   : > { %v5124_v45 = vpop.f32.mrb[59].mxu1 }
 0x2ed   : > { %v5166_v24 = vpop.f32.mrb[76].mxu0  ;;  %v3854_v41 = vadd.f32 %v5122_v58, %v7320_v11 }
 0x2ee   : > { %v5167_v17 = vpop.f32.mrb[77].mxu0 }
 0x2ef   : > { %v5168_v19 = vadd.f32 %v5167_v17, %v5166_v24  ;;  %v5169_v4 = vpop.f32.mrb[78].mxu0 }
 0x2f0   : > { %v5170_v51 = vpop.f32.mrb[79].mxu0 }
 0x2f1   : > { %v5188_v54 = vpop.f32.mrb[60].mxu1  ;;  %v7341_v16 = vadd.f32 %v5168_v19, %v3854_v41 }
 0x2f2   : > { %v5189_v14 = vpop.f32.mrb[61].mxu1 }
 0x2f3   : > { %v5190_v37 = vadd.f32 %v5189_v14, %v5188_v54  ;;  %v5191_v27 = vpop.f32.mrb[62].mxu1 }
 0x2f4   : > { %v5192_v46 = vpop.f32.mrb[63].mxu1 }
 0x2f5   : > { %v3966_v56 = vadd.f32 %v5190_v37, %v7324_v1  ;;  %v5193_v52 = vadd.f32 %v5192_v46, %v5191_v27  ;;  %v5234_v48 = vpop.f32.mrb[80].mxu0 }
 0x2f6   : > { %v5235_v6 = vpop.f32.mrb[81].mxu0 }
 0x2f7   : > { %v3969_v50 = vadd.f32 %v5193_v52, %v3897_v62  ;;  %v5236_v35 = vadd.f32 %v5235_v6, %v5234_v48  ;;  %v5237_v11 = vpop.f32.mrb[82].mxu0 }
 0x2f8   : > { %v5238_v39 = vpop.f32.mrb[83].mxu0 }
 0x2f9   : > { %v5194_v29 = vpop.f32.mrb[64].mxu1  ;;  %v5239_v13 = vadd.f32 %v5238_v39, %v5237_v11  ;;  %v4038_v2 = vadd.f32 %v5236_v35, %v3966_v56 }
 0x2fa   : > { %v5195_v38 = vpop.f32.mrb[65].mxu1 }
 0x2fb   : > { %v5196_v3 = vadd.f32 %v5195_v38, %v5194_v29  ;;  %v5197_v42 = vpop.f32.mrb[66].mxu1  ;;  %v4041_v61 = vadd.f32 %v5239_v13, %v3969_v50 }
 0x2fc   : > { %v5198_v59 = vpop.f32.mrb[67].mxu1 }
 0x2fd   : > { %v3974_v32 = vadd.f32 %v5196_v3, %v7328_v7  ;;  %v5199_v23 = vadd.f32 %v5198_v59, %v5197_v42  ;;  %v5240_v1 = vpop.f32.mrb[84].mxu0 }
 0x2fe   : > { %v5241_v44 = vpop.f32.mrb[85].mxu0 }
 0x2ff   : > { %v3977_v57 = vadd.f32 %v5199_v23, %v3905_v10  ;;  %v5242_v15 = vadd.f32 %v5241_v44, %v5240_v1  ;;  %v5243_v28 = vpop.f32.mrb[86].mxu0 }
 0x300   : > { %v5244_v63 = vpop.f32.mrb[87].mxu0 }
 0x301   : > { %v5200_v62 = vpop.f32.mrb[68].mxu1  ;;  %v5245_v21 = vadd.f32 %v5244_v63, %v5243_v28  ;;  %v4046_v9 = vadd.f32 %v5242_v15, %v3974_v32 }
 0x302   : > { %v5201_v53 = vpop.f32.mrb[69].mxu1 }
 0x303   : > { %v5202_v5 = vadd.f32 %v5201_v53, %v5200_v62  ;;  %v5203_v43 = vpop.f32.mrb[70].mxu1  ;;  %v4049_v34 = vadd.f32 %v5245_v21, %v3977_v57 }
 0x304   : > { %v5204_v20 = vpop.f32.mrb[71].mxu1 }
 0x305   : > { %v3982_v33 = vadd.f32 %v5202_v5, %v7332_v0  ;;  %v5205_v40 = vadd.f32 %v5204_v20, %v5203_v43  ;;  %v5246_v47 = vpop.f32.mrb[88].mxu0 }
 0x306   : > { %v5247_v22 = vpop.f32.mrb[89].mxu0 }
 0x307   : > { %v3985_v7 = vadd.f32 %v5205_v40, %v3913_v60  ;;  %v5248_v36 = vadd.f32 %v5247_v22, %v5246_v47  ;;  %v5249_v55 = vpop.f32.mrb[90].mxu0 }
 0x308   : > { %v5250_v12 = vpop.f32.mrb[91].mxu0 }
 0x309   : > { %v5206_v10 = vpop.f32.mrb[72].mxu1  ;;  %v7346_v58 = vadd.f32 %v5248_v36, %v3982_v33  ;;  %v5251_v30 = vadd.f32 %v5250_v12, %v5249_v55 }
 0x30a   : > { %v5207_v18 = vpop.f32.mrb[73].mxu1 }
 0x30b   : > { %v5208_v31 = vadd.f32 %v5207_v18, %v5206_v10  ;;  %v5209_v8 = vpop.f32.mrb[74].mxu1  ;;  %v7349_v0 = vadd.f32 %v5251_v30, %v3985_v7 }
 0x30c   : > { %v5210_v49 = vpop.f32.mrb[75].mxu1 }
 0x30d   : > { %v3990_v45 = vadd.f32 %v5208_v31, %v7336_v26  ;;  %v5211_v24 = vadd.f32 %v5210_v49, %v5209_v8  ;;  %v5252_v41 = vpop.f32.mrb[92].mxu0 }
 0x30e   : > { %v5253_v17 = vpop.f32.mrb[93].mxu0 }
 0x30f   : > { %v3993_v60 = vadd.f32 %v5211_v24, %v7338_v25  ;;  %v5254_v19 = vadd.f32 %v5253_v17, %v5252_v41  ;;  %v5255_v4 = vpop.f32.mrb[94].mxu0 }
 0x310   : > { %v5256_v51 = vpop.f32.mrb[95].mxu0 }
 0x311   : > { %v5212_v54 = vpop.f32.mrb[76].mxu1  ;;  %v4062_v46 = vadd.f32 %v5254_v19, %v3990_v45  ;;  %v5257_v56 = vadd.f32 %v5256_v51, %v5255_v4 }
 0x312   : > { %v5213_v14 = vpop.f32.mrb[77].mxu1 }
 0x313   : > { %v5214_v37 = vadd.f32 %v5213_v14, %v5212_v54  ;;  %v5215_v27 = vpop.f32.mrb[78].mxu1  ;;  %v7353_v26 = vadd.f32 %v5257_v56, %v3993_v60 }
 0x314   : > { %v5216_v52 = vpop.f32.mrb[79].mxu1 }
 0x315   : > { %v3998_v50 = vadd.f32 %v5214_v37, %v7341_v16  ;;  %v5258_v48 = vpop.f32.mrb[96].mxu0  ;;  %v4792_v16 = vld [vmem:[%s7430_s7] ss:$0 sm:$0xff] }
 0x316   : > { %v5259_v6 = vpop.f32.mrb[97].mxu0  ;;  %v5426_v31 = vadd.f32 %v4792_v16, %v7346_v58  ;;  %v5428_v45 = vadd.f32 %v4792_v16, %v7349_v0  ;;  %v5430_v4 = vadd.f32 %v4792_v16, %v4062_v46  ;;  %v5432_v58 = vadd.f32 %v4792_v16, %v7353_v26 }
 0x317   : > { %v5260_v29 = vadd.f32 %v5259_v6, %v5258_v48  ;;  %v5261_v38 = vpop.f32.mrb[98].mxu0 }
 0x318   : > { %v5262_v3 = vpop.f32.mrb[99].mxu0 }
 0x319   : > { %v4109_v25 = vpop.f32.mrb[80].mxu1  ;;  %v4070_v42 = vadd.f32 %v5260_v29, %v3998_v50 }
 0x31a   : > { %v4110_v35 = vadd.f32 %v4109_v25, %v4038_v2  ;;  %v5344_v11 = vpop.f32.mrb[81].mxu1 }
 0x31b   : > { %v4112_v39 = vpop.f32.mrb[82].mxu1  ;;  %v5434_v6 = vadd.f32 %v4792_v16, %v4070_v42 }
 0x31c   : > { %v4113_v13 = vadd.f32 %v4112_v39, %v4041_v61  ;;  %v5345_v59 = vpop.f32.mrb[83].mxu1  ;;  %v5415_v32 = vadd.f32 %v4792_v16, %v4110_v35 }
 0x31d   : > { %v4289_v57 = vpop.f32.mrb[100].mxu0 }
 0x31e   : > { %v5418_v23 = vadd.f32 %v4792_v16, %v4113_v13  ;;  %v5416_v1 = vadd.f32 %v5415_v32, %v4289_v57  ;;  %v5380_v44 = vpop.f32.mrb[101].mxu0 }
 0x31f   : > { %v4292_v2 = vpop.f32.mrb[102].mxu0 }
 0x320   : > { %v5419_v53 = vadd.f32 %v5418_v23, %v4292_v2  ;;  %v5381_v61 = vpop.f32.mrb[103].mxu0  ;;  %v4336_v21 = vmax.f32 %v5416_v1, 0.0 }
 0x321   : > { %v4117_v62 = vpop.f32.mrb[84].mxu1 }
 0x322   : > { %v4118_v15 = vadd.f32 %v4117_v62, %v4046_v9  ;;  %v5348_v28 = vpop.f32.mrb[85].mxu1  ;;  %v4337_v20 = vmax.f32 %v5419_v53, 0.0 }
 0x323   : > { %v4120_v63 = vpop.f32.mrb[86].mxu1 }
 0x324   : > { %v4121_v5 = vadd.f32 %v4120_v63, %v4049_v34  ;;  %v5349_v43 = vpop.f32.mrb[87].mxu1  ;;  %v5421_v33 = vadd.f32 %v4792_v16, %v4118_v15  ;;  %v4859_v40 = vpack.c.bf16 %v4337_v20, %v4336_v21 }
 0x325   : > { %v4297_v47 = vpop.f32.mrb[104].mxu0 }
 0x326   : > { %v5424_v7 = vadd.f32 %v4792_v16, %v4121_v5  ;;  %4860 = vst [vmem:[%s7361_s19] sm:$0xff] %v4859_v40   ;;  %v5422_v22 = vadd.f32 %v5421_v33, %v4297_v47  ;;  %v5384_v10 = vpop.f32.mrb[105].mxu0 }
 0x327   : > { %v4300_v9 = vpop.f32.mrb[106].mxu0 }
 0x328   : > { %v5425_v36 = vadd.f32 %v5424_v7, %v4300_v9  ;;  %v5385_v55 = vpop.f32.mrb[107].mxu0  ;;  %v4338_v18 = vmax.f32 %v5422_v22, 0.0 }
 0x32a   : > { %v4339_v12 = vmax.f32 %v5425_v36, 0.0 }
 0x32c   : > { %v4864_v34 = vpack.c.bf16 %v4339_v12, %v4338_v18 }
 0x32e   : > { %4880 = vst [vmem:[%s7361_s19 + $0x8] sm:$0xff] %v4864_v34  }
 0x341   : > { %v4305_v8 = vpop.f32.mrb[88].mxu1 }
 0x342   : > { %v5427_v30 = vadd.f32 %v5426_v31, %v4305_v8  ;;  %v5388_v49 = vpop.f32.mrb[89].mxu1 }
 0x343   : > { %v4308_v24 = vpop.f32.mrb[90].mxu1 }
 0x344   : > { %v5429_v60 = vadd.f32 %v5428_v45, %v4308_v24  ;;  %v5389_v41 = vpop.f32.mrb[91].mxu1  ;;  %v4340_v17 = vmax.f32 %v5427_v30, 0.0 }
 0x346   : > { %v4341_v54 = vmax.f32 %v5429_v60, 0.0 }
 0x348   : > { %v4869_v19 = vpack.c.bf16 %v4341_v54, %v4340_v17 }
 0x349   : > { %v4313_v14 = vpop.f32.mrb[92].mxu1 }
 0x34a   : > { %4881 = vst [vmem:[%s7361_s19 + $0x10] sm:$0xff] %v4869_v19   ;;  %v5431_v51 = vadd.f32 %v5430_v4, %v4313_v14  ;;  %v5392_v37 = vpop.f32.mrb[93].mxu1 }
 0x34b   : > { %v4316_v27 = vpop.f32.mrb[94].mxu1 }
 0x34c   : > { %v5433_v56 = vadd.f32 %v5432_v58, %v4316_v27  ;;  %v5393_v52 = vpop.f32.mrb[95].mxu1  ;;  %v4342_v0 = vmax.f32 %v5431_v51, 0.0 }
 0x34e   : > { %v4343_v50 = vmax.f32 %v5433_v56, 0.0 }
 0x350   : > { %v4874_v48 = vpack.c.bf16 %v4343_v50, %v4342_v0 }
 0x351   : > { %v4321_v25 = vpop.f32.mrb[96].mxu1 }
 0x352   : > { %4882 = vst [vmem:[%s7361_s19 + $0x18] sm:$0xff] %v4874_v48   ;;  %v5435_v46 = vadd.f32 %v5434_v6, %v4321_v25  ;;  %v5396_v29 = vpop.f32.mrb[97].mxu1 }
 0x353   : > { %v4324_v35 = vpop.f32.mrb[98].mxu1 }
 0x354   : > { %v4344_v11 = vmax.f32 %v5435_v46, 0.0  ;;  %v5397_v38 = vpop.f32.mrb[99].mxu1 }
 0x356   : > { %v4835_v26 = vpack.c.bf16 %v4344_v11, %v4344_v11 }
 0x358   : > { %4390 = vst [vmem:[%s7361_s19 + $0x20] sm:$0xf] %v4835_v26 }
 0x359   : > { %5825 = shalt.err (!%p5822_p7)
}
 0x35a   : > { %s5826_s25 = scalar_lea.hbm %s7377_s21, 576  ;;  %s5830_s19 = scalar_lea.hbm %s7431_s8, 1152 }
 0x35b   : > { %p5827_p8 = scmp.ne.s32.totalorder %s7377_s21, %s5826_s25  ;;  %p5831_p1 = scmp.lt.u32.totalorder %s7377_s21, %s7431_s8 }
 0x35c   : > { %p5832_p0 = scmp.lt.u32.totalorder %s5830_s19, %s5826_s25  ;;  %p5834_p6 = scmp.lt.u32.totalorder %s5826_s25, %s7377_s21 }
 0x35d   : > { %p5828_p11 = pnand %p5827_p8, %p7577_p9 }
 0x35e   : > { %p5833_p5 = por %p5832_p0, %p5831_p1 }
 0x35f   : > { %p5829_p13 = pneg %p5828_p11 }
 0x360   : > { %p5835_p10 = por %p5834_p6, %p5833_p5 }
 0x362   : > { %p5836_p12 = pnand %p5835_p10, %p5829_p13 }
 0x364   : > { %5839 = shalt.err (!%p5836_p12)
}
 0x365   : > { %s5887_s18 = smov 64   ;;  %s5888_s22 = smov 4  }
 0x366   : > { %5455 = dma.vmem_to_hbm [thread:$0]  (%p7577_p9), %s7372_s17, 576, %s7377_s21, %s7382_s10, %s5887_s18, %s5887_s18, %s5888_s22  }
 0x367 PF: > { %p5467_p2 = scmp.ge.s32.totalorder %s5878_s30, 2  ;;  %s4420_s9 = sand.u32 1, %s5866_s27  }
 0x368   : > { %p7578_p3 = scmp.ne.s32.totalorder %s7475_s16, 0  ;;  %s4421_s23 = scalar_lea.sflag [#allocation7], %s4420_s9 }
 0x36a   : > { %p5462_p4 = pnand %p5467_p2, %p7578_p3 }
 0x36c   : > { %5861 = dma.done.wait (!%p5462_p4), %s4421_s23, 576  }
 0x36d   : > { %5863 = vsyncadd (!%p5462_p4), %s4421_s23, 4294966720  ;;  %p19_p7 = scmp.ge.s32.totalorder %s5959_s11, 4   ;;  %s7579_s27 = smov %s5870_s28 }
 0x36e   : > { %s7580_s28 = smov %s5874_s29  ;;  %s7581_s29 = smov %s5970_s14 }
 0x36f   : > { %s7582_s30 = smov %s5959_s11  ;;  %21 = sbr.rel (!%p19_p7) target bundleno = 4 (0x4), region = 95 }
 0x376   :  { %4426 = vsyncpa [#allocation6], 1 }
 0x377   :  { %4428 = vsyncpa [#allocation6 + $0x1], 1 }
 0x378   :  { %4429 = vsyncpa [#allocation7], 1 }
 0x379   :  { %4431 = vsyncpa [#allocation7 + $0x1], 1 }

</bundles_post_ra>
